<compile_context>
chip_gen: v5e
topology: v5e:2x2
jax: 0.10.0
libtpu: 0.0.40
codegen_flags: <defaults>
</compile_context>

<pallas_src>
import functools

import jax
import jax.numpy as jnp
from jax.experimental import pallas as pl
from jax.experimental.pallas import tpu as pltpu

# ---- hyperparameters from the PyTorch module ----
D_MODEL = 128
INPUT_SIZE = 5            # ['open', 'high', 'low', 'close', 'volume']
NHEAD = 4
NUM_LAYERS = 3
OUTPUT_SIZE = 2
DIM_FF = 512
HEAD_DIM = D_MODEL // NHEAD
LN_EPS = 1e-5

assert D_MODEL % NHEAD == 0


def _layernorm(h, w, b):
    """Single-pass LayerNorm: mean and mean-of-squares from one read of h."""
    mu = jnp.mean(h, axis=-1, keepdims=True)
    ms = jnp.mean(h * h, axis=-1, keepdims=True)
    var = ms - mu * mu
    return (h - mu) * jax.lax.rsqrt(var + LN_EPS) * w + b


# --------------------------- Pallas kernel ---------------------------
def encoder_kernel(
    h_ref,                           # (BP, D)    tokens at t = T-1 (rows >= B are padding)
    inp_wT_ref, inp_b_ref,           # (L, D, 3D), (L, 1, 3D)   (q part pre-scaled)
    outp_wT_ref, outp_b_ref,         # (L, D, D),  (L, 1, D)
    lin1_wT_ref, lin1_b_ref,         # (L, D, FF), (L, 1, FF)
    lin2_wT_ref, lin2_b_ref,         # (L, FF, D), (L, 1, D)
    ln1_w_ref, ln1_b_ref,            # (L, 1, D),  (L, 1, D)
    ln2_w_ref, ln2_b_ref,            # (L, 1, D),  (L, 1, D)
    o_ref,                           # (BP, D)    encoder output at t = T-1
    *, B, BP, approx_softmax,
):
    f32 = jnp.float32
    w_dtype = inp_wT_ref.dtype       # bf16 on the fast path, f32 otherwise
    h = h_ref[...]                   # (BP, D) f32

    # Padded rows (index >= B) must never be attended to as keys (built once).
    if BP != B:
        key_mask = jax.lax.broadcasted_iota(jnp.int32, (NHEAD, BP, BP), 2) < B

    def split_heads(x2d):
        # (BP, D) -> (H, BP, HD): lane slices stacked along a new major axis.
        # Layout-only; the matmuls below are batched over ALL heads at once.
        return jnp.stack(
            [x2d[:, hh * HEAD_DIM:(hh + 1) * HEAD_DIM] for hh in range(NHEAD)],
            axis=0)

    for l in range(NUM_LAYERS):                       # static unroll (3 layers)
        # ----------- multi-head self-attention over the B axis -----------
        qkv = jnp.dot(h.astype(w_dtype), inp_wT_ref[l],
                      preferred_element_type=f32) + inp_b_ref[l]     # (BP, 3D) f32

        q = split_heads(qkv[:, :D_MODEL])             # q already scaled by 1/sqrt(HD)
        k = split_heads(qkv[:, D_MODEL:2 * D_MODEL])
        v = split_heads(qkv[:, 2 * D_MODEL:])

        # One batched contraction per step (no per-head matmul loop).
        s = jnp.einsum('hbd,hcd->hbc', q, k,
                       preferred_element_type=f32)                   # (H, BP, BP)
        if BP != B:
            s = jnp.where(key_mask, s, -1e30)
        s = s - jnp.max(s, axis=-1, keepdims=True)
        e = jnp.exp(s)
        denom = jnp.sum(e, axis=-1, keepdims=True)
        if approx_softmax:
            p_attn = e * pl.reciprocal(denom, approx=True)
        else:
            p_attn = e / denom
        o = jnp.einsum('hbc,hcd->hbd', p_attn, v,
                       preferred_element_type=f32)                   # (H, BP, HD)
        # merge heads (lane concat) then ONE K=128 out_proj matmul
        o = jnp.concatenate([o[hh] for hh in range(NHEAD)], axis=-1)  # (BP, D)

        attn = jnp.dot(o.astype(w_dtype), outp_wT_ref[l],
                       preferred_element_type=f32) + outp_b_ref[l]
        # residual + LayerNorm1 (dropout == identity at inference)
        h = _layernorm(h + attn, ln1_w_ref[l], ln1_b_ref[l])

        # --------------------------- feed-forward ---------------------------
        ff = jnp.dot(h.astype(w_dtype), lin1_wT_ref[l],
                     preferred_element_type=f32) + lin1_b_ref[l]
        ff = jnp.maximum(ff, 0.0)                     # relu, f32 elementwise
        ff = jnp.dot(ff.astype(w_dtype), lin2_wT_ref[l],
                     preferred_element_type=f32) + lin2_b_ref[l]
        # residual + LayerNorm2
        h = _layernorm(h + ff, ln2_w_ref[l], ln2_b_ref[l])

    o_ref[...] = h


# --------------------------- wrapper ---------------------------
def _pack_params(p, fast_math):
    """Pre-transpose weights for lane-dense (x @ W) matmuls, fold the
    1/sqrt(head_dim) scale into the q part of in_proj, and (fast path) cast
    the big MXU operands to bf16.  Biases / LN params stay f32."""
    scale = 1.0 / (HEAD_DIM ** 0.5)
    inp_w = p['inp_w'].at[:, :D_MODEL, :].multiply(scale)     # scale q rows
    inp_b = p['inp_b'].at[:, :, :D_MODEL].multiply(scale)     # scale q bias
    mm = jnp.bfloat16 if fast_math else jnp.float32
    f32 = jnp.float32
    return (
        jnp.transpose(inp_w, (0, 2, 1)).astype(mm),           # (L, D, 3D)
        inp_b.astype(f32),
        jnp.transpose(p['outp_w'], (0, 2, 1)).astype(mm),     # (L, D, D)
        p['outp_b'].astype(f32),
        jnp.transpose(p['lin1_w'], (0, 2, 1)).astype(mm),     # (L, D, FF)
        p['lin1_b'].astype(f32),
        jnp.transpose(p['lin2_w'], (0, 2, 1)).astype(mm),     # (L, FF, D)
        p['lin2_b'].astype(f32),
        p['ln1_w'].astype(f32), p['ln1_b'].astype(f32),
        p['ln2_w'].astype(f32), p['ln2_b'].astype(f32),
    )


def transformer_regression(x, p, *, fast_math=True):
    """x: (B, T, INPUT_SIZE) float32 -> (B, OUTPUT_SIZE) float32.

    Matches PyTorch TransformerRegression.forward (eval mode).  Only the
    t = T-1 slice is embedded and encoded (attention mixes over B only)."""
    B, T, _ = x.shape
    BP = max(8, ((B + 7) // 8) * 8)                  # pad rows to a sublane multiple

    # Tiny 5->128 embedding in XLA, only for t = T-1.
    x_last = x[:, -1, :].astype(jnp.float32)                   # (B, 5)
    h0 = x_last @ p['emb_w'].T + p['emb_b']                    # (B, 128)
    h0 = jnp.pad(h0, ((0, BP - B), (0, 0)))                    # (BP, 128)

    weight_args = _pack_params(p, fast_math)
    kernel = functools.partial(encoder_kernel, B=B, BP=BP,
                               approx_softmax=fast_math)

    # Single grid step: every operand is one whole-array VMEM block
    # (weights ~1.2 MiB bf16 / ~2.3 MiB f32 — fits v5e/v6e/v7x with big margin).
    in_specs = [pl.BlockSpec(memory_space=pltpu.MemorySpace.VMEM)
                for _ in range(1 + len(weight_args))]

    h_last = pl.pallas_call(
        kernel,
        out_shape=jax.ShapeDtypeStruct((BP, D_MODEL), jnp.float32),
        in_specs=in_specs,
        out_specs=pl.BlockSpec(memory_space=pltpu.MemorySpace.VMEM),
        compiler_params=pltpu.CompilerParams(
            vmem_limit_bytes=32 * 1024 * 1024,
        ),
    )(h0, *weight_args)

    # Final 128->2 fc in XLA (a 2-lane output block inside the kernel would be
    # a lane-sparse masked store — pure waste).
    return h_last[:B] @ p['fc_w'].T + p['fc_b']


# ---------------- deterministic parameter init ----------------
def init_params(key):
    keys = iter(jax.random.split(key, 24))

    def dense(k, shape, fan_in):
        return (jax.random.normal(k, shape, jnp.float32) / jnp.sqrt(fan_in)).astype(jnp.float32)

    L, D, FF = NUM_LAYERS, D_MODEL, DIM_FF
    p = {}
    p['emb_w'] = dense(next(keys), (D, INPUT_SIZE), INPUT_SIZE)
    p['emb_b'] = dense(next(keys), (1, D), D)
    p['inp_w'] = dense(next(keys), (L, 3 * D, D), D)
    p['inp_b'] = dense(next(keys), (L, 1, 3 * D), D)
    p['outp_w'] = dense(next(keys), (L, D, D), D)
    p['outp_b'] = dense(next(keys), (L, 1, D), D)
    p['lin1_w'] = dense(next(keys), (L, FF, D), D)
    p['lin1_b'] = dense(next(keys), (L, 1, FF), D)
    p['lin2_w'] = dense(next(keys), (L, D, FF), FF)
    p['lin2_b'] = dense(next(keys), (L, 1, D), FF)
    p['ln1_w'] = jnp.ones((L, 1, D), jnp.float32)
    p['ln1_b'] = jnp.zeros((L, 1, D), jnp.float32)
    p['ln2_w'] = jnp.ones((L, 1, D), jnp.float32)
    p['ln2_b'] = jnp.zeros((L, 1, D), jnp.float32)
    p['fc_w'] = dense(next(keys), (OUTPUT_SIZE, D), D)
    p['fc_b'] = dense(next(keys), (1, OUTPUT_SIZE), D)
    return p


# ---------------- pure-JAX reference (full (B, T) compute) ----------------
def reference_forward(x, p):
    B, T, _ = x.shape
    h = x @ p['emb_w'].T + p['emb_b']                       # (B, T, D)
    for l in range(NUM_LAYERS):
        qkv = h @ p['inp_w'][l].T + p['inp_b'][l]           # (B, T, 3D)
        q, k, v = jnp.split(qkv, 3, axis=-1)

        def split_heads(a):                                 # (B,T,D) -> (T,H,B,Dh)
            return a.reshape(B, T, NHEAD, HEAD_DIM).transpose(1, 2, 0, 3)

        qh, kh, vh = map(split_heads, (q, k, v))
        s = jnp.einsum('thbd,thcd->thbc', qh, kh) / jnp.sqrt(float(HEAD_DIM))
        a = jax.nn.softmax(s, axis=-1)
        oh = jnp.einsum('thbc,thcd->thbd', a, vh)           # (T,H,B,Dh)
        oh = oh.transpose(2, 0, 1, 3).reshape(B, T, D_MODEL)
        attn = oh @ p['outp_w'][l].T + p['outp_b'][l]
        h = _layernorm(h + attn, p['ln1_w'][l], p['ln1_b'][l])
        ff = jax.nn.relu(h @ p['lin1_w'][l].T + p['lin1_b'][l])
        ff = ff @ p['lin2_w'][l].T + p['lin2_b'][l]
        h = _layernorm(h + ff, p['ln2_w'][l], p['ln2_b'][l])
    return h[:, -1, :] @ p['fc_w'].T + p['fc_b']


if __name__ == "__main__":
    key = jax.random.PRNGKey(0)
    k_params, k_x = jax.random.split(key)
    params = init_params(k_params)

    # (B, T): a padded case (B=2 -> BP=8), a different T, and an exactly
    # sublane-aligned case (B=8: no padding, no softmax mask branch).
    cases = [(2, 8), (4, 16), (8, 4)]
    for (B, T) in cases:
        kx = jax.random.fold_in(k_x, 100 * B + T)
        x = jax.random.normal(kx, (B, T, INPUT_SIZE), jnp.float32)
        ref = reference_forward(x, params)

        # exact path: f32 MXU operands + exact softmax division
        out = jax.block_until_ready(
            transformer_regression(x, params, fast_math=False))
        assert out.shape == (B, OUTPUT_SIZE), out.shape
        if not jnp.allclose(out, ref, atol=2e-2, rtol=2e-2):
            raise AssertionError(
                f"f32 path mismatch for B={B} T={T}:\nkernel={out}\nref={ref}")

        # fast path (default): bf16 MXU operands (f32 accum) + approx reciprocal
        out_fast = jax.block_until_ready(
            transformer_regression(x, params, fast_math=True))
        assert out_fast.shape == (B, OUTPUT_SIZE), out_fast.shape
        if not jnp.allclose(out_fast, ref, atol=3e-2, rtol=3e-2):
            raise AssertionError(
                f"fast path mismatch for B={B} T={T}:\nkernel={out_fast}\nref={ref}")

    print("KERNEL_OK")
</pallas_src>

<mosaic_0001>
module attributes {stable_mosaic.version = 11 : i64} {
  func.func @encoder_kernel(%arg0: memref<8x128xf32, #tpu.memory_space<vmem>>, %arg1: memref<3x128x384xf32, #tpu.memory_space<vmem>>, %arg2: memref<3x1x384xf32, #tpu.memory_space<vmem>>, %arg3: memref<3x128x128xf32, #tpu.memory_space<vmem>>, %arg4: memref<3x1x128xf32, #tpu.memory_space<vmem>>, %arg5: memref<3x128x512xf32, #tpu.memory_space<vmem>>, %arg6: memref<3x1x512xf32, #tpu.memory_space<vmem>>, %arg7: memref<3x512x128xf32, #tpu.memory_space<vmem>>, %arg8: memref<3x1x128xf32, #tpu.memory_space<vmem>>, %arg9: memref<3x1x128xf32, #tpu.memory_space<vmem>>, %arg10: memref<3x1x128xf32, #tpu.memory_space<vmem>>, %arg11: memref<3x1x128xf32, #tpu.memory_space<vmem>>, %arg12: memref<3x1x128xf32, #tpu.memory_space<vmem>>, %arg13: memref<8x128xf32, #tpu.memory_space<vmem>>) attributes {dimension_semantics = [], scalar_prefetch = 0 : i64, scratch_operands = 0 : i64, tpu.core_type = #tpu.core_type<tc>} {
    %c0 = arith.constant 0 : index
    %c0_0 = arith.constant 0 : index
    %0 = vector.load %arg0[%c0, %c0_0] : memref<8x128xf32, #tpu.memory_space<vmem>>, vector<8x128xf32>
    %1 = tpu.iota {dimensions = array<i32: 2>} : vector<4x8x8xi32>
    %c2_i32 = arith.constant 2 : i32
    %2 = vector.broadcast %c2_i32 : i32 to vector<4x8x8xi32>
    %3 = arith.cmpi slt, %1, %2 : vector<4x8x8xi32>
    %c0_1 = arith.constant 0 : index
    %c0_2 = arith.constant 0 : index
    %c0_3 = arith.constant 0 : index
    %4 = vector.load %arg1[%c0_1, %c0_2, %c0_3] : memref<3x128x384xf32, #tpu.memory_space<vmem>>, vector<1x128x384xf32>
    %5 = vector.shape_cast %4 : vector<1x128x384xf32> to vector<128x384xf32>
    %cst = arith.constant dense<0.000000e+00> : vector<8x384xf32>
    %6 = tpu.matmul %0, %5, %cst {dimension_numbers = #tpu.dot_dimension_numbers<[1], [0], [0], [1], [0, 0, 1, 1], [], []>} : vector<8x128xf32>, vector<128x384xf32>, vector<8x384xf32> -> vector<8x384xf32>
    %c0_4 = arith.constant 0 : index
    %c0_5 = arith.constant 0 : index
    %c0_6 = arith.constant 0 : index
    %7 = vector.load %arg2[%c0_4, %c0_5, %c0_6] : memref<3x1x384xf32, #tpu.memory_space<vmem>>, vector<1x1x384xf32>
    %8 = vector.shape_cast %7 : vector<1x1x384xf32> to vector<1x384xf32>
    %9 = vector.broadcast %8 : vector<1x384xf32> to vector<8x384xf32>
    %10 = arith.addf %6, %9 : vector<8x384xf32>
    %11 = vector.extract_strided_slice %10 {offsets = [0, 0], sizes = [8, 128], strides = [1, 1]} : vector<8x384xf32> to vector<8x128xf32>
    %12 = vector.extract_strided_slice %11 {offsets = [0, 0], sizes = [8, 32], strides = [1, 1]} : vector<8x128xf32> to vector<8x32xf32>
    %13 = vector.extract_strided_slice %11 {offsets = [0, 32], sizes = [8, 32], strides = [1, 1]} : vector<8x128xf32> to vector<8x32xf32>
    %14 = vector.extract_strided_slice %11 {offsets = [0, 64], sizes = [8, 32], strides = [1, 1]} : vector<8x128xf32> to vector<8x32xf32>
    %15 = vector.extract_strided_slice %11 {offsets = [0, 96], sizes = [8, 32], strides = [1, 1]} : vector<8x128xf32> to vector<8x32xf32>
    %16 = vector.shape_cast %12 : vector<8x32xf32> to vector<1x8x32xf32>
    %17 = vector.shape_cast %13 : vector<8x32xf32> to vector<1x8x32xf32>
    %18 = vector.shape_cast %14 : vector<8x32xf32> to vector<1x8x32xf32>
    %19 = vector.shape_cast %15 : vector<8x32xf32> to vector<1x8x32xf32>
    %20 = tpu.concatenate %16, %17, %18, %19 in 0 : vector<1x8x32xf32>, vector<1x8x32xf32>, vector<1x8x32xf32>, vector<1x8x32xf32> -> vector<4x8x32xf32>
    %21 = vector.extract_strided_slice %10 {offsets = [0, 128], sizes = [8, 128], strides = [1, 1]} : vector<8x384xf32> to vector<8x128xf32>
    %22 = vector.extract_strided_slice %21 {offsets = [0, 0], sizes = [8, 32], strides = [1, 1]} : vector<8x128xf32> to vector<8x32xf32>
    %23 = vector.extract_strided_slice %21 {offsets = [0, 32], sizes = [8, 32], strides = [1, 1]} : vector<8x128xf32> to vector<8x32xf32>
    %24 = vector.extract_strided_slice %21 {offsets = [0, 64], sizes = [8, 32], strides = [1, 1]} : vector<8x128xf32> to vector<8x32xf32>
    %25 = vector.extract_strided_slice %21 {offsets = [0, 96], sizes = [8, 32], strides = [1, 1]} : vector<8x128xf32> to vector<8x32xf32>
    %26 = vector.shape_cast %22 : vector<8x32xf32> to vector<1x8x32xf32>
    %27 = vector.shape_cast %23 : vector<8x32xf32> to vector<1x8x32xf32>
    %28 = vector.shape_cast %24 : vector<8x32xf32> to vector<1x8x32xf32>
    %29 = vector.shape_cast %25 : vector<8x32xf32> to vector<1x8x32xf32>
    %30 = tpu.concatenate %26, %27, %28, %29 in 0 : vector<1x8x32xf32>, vector<1x8x32xf32>, vector<1x8x32xf32>, vector<1x8x32xf32> -> vector<4x8x32xf32>
    %31 = vector.extract_strided_slice %10 {offsets = [0, 256], sizes = [8, 128], strides = [1, 1]} : vector<8x384xf32> to vector<8x128xf32>
    %32 = vector.extract_strided_slice %31 {offsets = [0, 0], sizes = [8, 32], strides = [1, 1]} : vector<8x128xf32> to vector<8x32xf32>
    %33 = vector.extract_strided_slice %31 {offsets = [0, 32], sizes = [8, 32], strides = [1, 1]} : vector<8x128xf32> to vector<8x32xf32>
    %34 = vector.extract_strided_slice %31 {offsets = [0, 64], sizes = [8, 32], strides = [1, 1]} : vector<8x128xf32> to vector<8x32xf32>
    %35 = vector.extract_strided_slice %31 {offsets = [0, 96], sizes = [8, 32], strides = [1, 1]} : vector<8x128xf32> to vector<8x32xf32>
    %36 = vector.shape_cast %32 : vector<8x32xf32> to vector<1x8x32xf32>
    %37 = vector.shape_cast %33 : vector<8x32xf32> to vector<1x8x32xf32>
    %38 = vector.shape_cast %34 : vector<8x32xf32> to vector<1x8x32xf32>
    %39 = vector.shape_cast %35 : vector<8x32xf32> to vector<1x8x32xf32>
    %40 = tpu.concatenate %36, %37, %38, %39 in 0 : vector<1x8x32xf32>, vector<1x8x32xf32>, vector<1x8x32xf32>, vector<1x8x32xf32> -> vector<4x8x32xf32>
    "tpu.trace_start"() <{level = 10 : i32, message = "hbd,hcd->hbc"}> : () -> ()
    %cst_7 = arith.constant dense<0.000000e+00> : vector<4x8x8xf32>
    %41 = tpu.matmul %20, %30, %cst_7 {dimension_numbers = #tpu.dot_dimension_numbers<[2], [2], [1], [1], [0, 0, 0, 1, 1, 1], [0], [0]>} : vector<4x8x32xf32>, vector<4x8x32xf32>, vector<4x8x8xf32> -> vector<4x8x8xf32>
    %cst_8 = arith.constant -1.000000e+30 : f32
    "tpu.trace_stop"() : () -> ()
    %42 = vector.broadcast %cst_8 : f32 to vector<4x8x8xf32>
    %43 = arith.select %3, %41, %42 : vector<4x8x8xi1>, vector<4x8x8xf32>
    %cst_9 = arith.constant dense<0xFF800000> : vector<4x8xf32>
    %44 = vector.multi_reduction <maximumf>, %43, %cst_9 [2] : vector<4x8x8xf32> to vector<4x8xf32>
    %45 = vector.shape_cast %44 : vector<4x8xf32> to vector<4x8x1xf32>
    %46 = vector.broadcast %45 : vector<4x8x1xf32> to vector<4x8x8xf32>
    %47 = arith.subf %43, %46 : vector<4x8x8xf32>
    %48 = math.exp %47 : vector<4x8x8xf32>
    %cst_10 = arith.constant dense<0.000000e+00> : vector<4x8xf32>
    %49 = vector.multi_reduction <add>, %48, %cst_10 [2] : vector<4x8x8xf32> to vector<4x8xf32>
    %50 = vector.shape_cast %49 : vector<4x8xf32> to vector<4x8x1xf32>
    %51 = vector.broadcast %50 : vector<4x8x1xf32> to vector<4x8x8xf32>
    %52 = arith.divf %48, %51 : vector<4x8x8xf32>
    "tpu.trace_start"() <{level = 10 : i32, message = "hbc,hcd->hbd"}> : () -> ()
    %cst_11 = arith.constant dense<0.000000e+00> : vector<4x8x32xf32>
    %53 = tpu.matmul %52, %40, %cst_11 {dimension_numbers = #tpu.dot_dimension_numbers<[2], [1], [1], [2], [0, 0, 0, 1, 1, 2], [0], [0]>} : vector<4x8x8xf32>, vector<4x8x32xf32>, vector<4x8x32xf32> -> vector<4x8x32xf32>
    "tpu.trace_stop"() : () -> ()
    %54 = vector.extract_strided_slice %53 {offsets = [0, 0, 0], sizes = [1, 8, 32], strides = [1, 1, 1]} : vector<4x8x32xf32> to vector<1x8x32xf32>
    %55 = vector.shape_cast %54 : vector<1x8x32xf32> to vector<8x32xf32>
    %56 = vector.extract_strided_slice %53 {offsets = [1, 0, 0], sizes = [1, 8, 32], strides = [1, 1, 1]} : vector<4x8x32xf32> to vector<1x8x32xf32>
    %57 = vector.shape_cast %56 : vector<1x8x32xf32> to vector<8x32xf32>
    %58 = vector.extract_strided_slice %53 {offsets = [2, 0, 0], sizes = [1, 8, 32], strides = [1, 1, 1]} : vector<4x8x32xf32> to vector<1x8x32xf32>
    %59 = vector.shape_cast %58 : vector<1x8x32xf32> to vector<8x32xf32>
    %60 = vector.extract_strided_slice %53 {offsets = [3, 0, 0], sizes = [1, 8, 32], strides = [1, 1, 1]} : vector<4x8x32xf32> to vector<1x8x32xf32>
    %61 = vector.shape_cast %60 : vector<1x8x32xf32> to vector<8x32xf32>
    %62 = tpu.concatenate %55, %57, %59, %61 in 1 : vector<8x32xf32>, vector<8x32xf32>, vector<8x32xf32>, vector<8x32xf32> -> vector<8x128xf32>
    %c0_12 = arith.constant 0 : index
    %c0_13 = arith.constant 0 : index
    %c0_14 = arith.constant 0 : index
    %63 = vector.load %arg3[%c0_12, %c0_13, %c0_14] : memref<3x128x128xf32, #tpu.memory_space<vmem>>, vector<1x128x128xf32>
    %64 = vector.shape_cast %63 : vector<1x128x128xf32> to vector<128x128xf32>
    %cst_15 = arith.constant dense<0.000000e+00> : vector<8x128xf32>
    %65 = tpu.matmul %62, %64, %cst_15 {dimension_numbers = #tpu.dot_dimension_numbers<[1], [0], [0], [1], [0, 0, 1, 1], [], []>} : vector<8x128xf32>, vector<128x128xf32>, vector<8x128xf32> -> vector<8x128xf32>
    %c0_16 = arith.constant 0 : index
    %c0_17 = arith.constant 0 : index
    %c0_18 = arith.constant 0 : index
    %66 = vector.load %arg4[%c0_16, %c0_17, %c0_18] : memref<3x1x128xf32, #tpu.memory_space<vmem>>, vector<1x1x128xf32>
    %67 = vector.shape_cast %66 : vector<1x1x128xf32> to vector<1x128xf32>
    %68 = vector.broadcast %67 : vector<1x128xf32> to vector<8x128xf32>
    %69 = arith.addf %65, %68 : vector<8x128xf32>
    %70 = arith.addf %0, %69 : vector<8x128xf32>
    %c0_19 = arith.constant 0 : index
    %c0_20 = arith.constant 0 : index
    %c0_21 = arith.constant 0 : index
    %71 = vector.load %arg9[%c0_19, %c0_20, %c0_21] : memref<3x1x128xf32, #tpu.memory_space<vmem>>, vector<1x1x128xf32>
    %72 = vector.shape_cast %71 : vector<1x1x128xf32> to vector<1x128xf32>
    %c0_22 = arith.constant 0 : index
    %c0_23 = arith.constant 0 : index
    %c0_24 = arith.constant 0 : index
    %73 = vector.load %arg10[%c0_22, %c0_23, %c0_24] : memref<3x1x128xf32, #tpu.memory_space<vmem>>, vector<1x1x128xf32>
    %74 = vector.shape_cast %73 : vector<1x1x128xf32> to vector<1x128xf32>
    %cst_25 = arith.constant dense<0.000000e+00> : vector<8xf32>
    %75 = vector.multi_reduction <add>, %70, %cst_25 [1] : vector<8x128xf32> to vector<8xf32>
    %76 = vector.shape_cast %75 : vector<8xf32> to vector<8x1xf32>
    %cst_26 = arith.constant 1.280000e+02 : f32
    %77 = vector.broadcast %cst_26 : f32 to vector<8x1xf32>
    %78 = arith.divf %76, %77 : vector<8x1xf32>
    %79 = arith.mulf %70, %70 : vector<8x128xf32>
    %cst_27 = arith.constant dense<0.000000e+00> : vector<8xf32>
    %80 = vector.multi_reduction <add>, %79, %cst_27 [1] : vector<8x128xf32> to vector<8xf32>
    %81 = vector.shape_cast %80 : vector<8xf32> to vector<8x1xf32>
    %cst_28 = arith.constant 1.280000e+02 : f32
    %82 = vector.broadcast %cst_28 : f32 to vector<8x1xf32>
    %83 = arith.divf %81, %82 : vector<8x1xf32>
    %84 = arith.mulf %78, %78 : vector<8x1xf32>
    %85 = arith.subf %83, %84 : vector<8x1xf32>
    %86 = vector.broadcast %78 : vector<8x1xf32> to vector<8x128xf32>
    %87 = arith.subf %70, %86 : vector<8x128xf32>
    %cst_29 = arith.constant 9.99999974E-6 : f32
    %88 = vector.broadcast %cst_29 : f32 to vector<8x1xf32>
    %89 = arith.addf %85, %88 : vector<8x1xf32>
    %90 = math.rsqrt %89 : vector<8x1xf32>
    %91 = vector.broadcast %90 : vector<8x1xf32> to vector<8x128xf32>
    %92 = arith.mulf %87, %91 : vector<8x128xf32>
    %93 = vector.broadcast %72 : vector<1x128xf32> to vector<8x128xf32>
    %94 = arith.mulf %92, %93 : vector<8x128xf32>
    %95 = vector.broadcast %74 : vector<1x128xf32> to vector<8x128xf32>
    %96 = arith.addf %94, %95 : vector<8x128xf32>
    %c0_30 = arith.constant 0 : index
    %c0_31 = arith.constant 0 : index
    %c0_32 = arith.constant 0 : index
    %97 = vector.load %arg5[%c0_30, %c0_31, %c0_32] : memref<3x128x512xf32, #tpu.memory_space<vmem>>, vector<1x128x512xf32>
    %98 = vector.shape_cast %97 : vector<1x128x512xf32> to vector<128x512xf32>
    %cst_33 = arith.constant dense<0.000000e+00> : vector<8x512xf32>
    %99 = tpu.matmul %96, %98, %cst_33 {dimension_numbers = #tpu.dot_dimension_numbers<[1], [0], [0], [1], [0, 0, 1, 1], [], []>} : vector<8x128xf32>, vector<128x512xf32>, vector<8x512xf32> -> vector<8x512xf32>
    %c0_34 = arith.constant 0 : index
    %c0_35 = arith.constant 0 : index
    %c0_36 = arith.constant 0 : index
    %100 = vector.load %arg6[%c0_34, %c0_35, %c0_36] : memref<3x1x512xf32, #tpu.memory_space<vmem>>, vector<1x1x512xf32>
    %101 = vector.shape_cast %100 : vector<1x1x512xf32> to vector<1x512xf32>
    %102 = vector.broadcast %101 : vector<1x512xf32> to vector<8x512xf32>
    %103 = arith.addf %99, %102 : vector<8x512xf32>
    %cst_37 = arith.constant 0.000000e+00 : f32
    %104 = vector.broadcast %cst_37 : f32 to vector<8x512xf32>
    %105 = arith.maximumf %103, %104 : vector<8x512xf32>
    %c0_38 = arith.constant 0 : index
    %c0_39 = arith.constant 0 : index
    %c0_40 = arith.constant 0 : index
    %106 = vector.load %arg7[%c0_38, %c0_39, %c0_40] : memref<3x512x128xf32, #tpu.memory_space<vmem>>, vector<1x512x128xf32>
    %107 = vector.shape_cast %106 : vector<1x512x128xf32> to vector<512x128xf32>
    %cst_41 = arith.constant dense<0.000000e+00> : vector<8x128xf32>
    %108 = tpu.matmul %105, %107, %cst_41 {dimension_numbers = #tpu.dot_dimension_numbers<[1], [0], [0], [1], [0, 0, 1, 1], [], []>} : vector<8x512xf32>, vector<512x128xf32>, vector<8x128xf32> -> vector<8x128xf32>
    %c0_42 = arith.constant 0 : index
    %c0_43 = arith.constant 0 : index
    %c0_44 = arith.constant 0 : index
    %109 = vector.load %arg8[%c0_42, %c0_43, %c0_44] : memref<3x1x128xf32, #tpu.memory_space<vmem>>, vector<1x1x128xf32>
    %110 = vector.shape_cast %109 : vector<1x1x128xf32> to vector<1x128xf32>
    %111 = vector.broadcast %110 : vector<1x128xf32> to vector<8x128xf32>
    %112 = arith.addf %108, %111 : vector<8x128xf32>
    %113 = arith.addf %96, %112 : vector<8x128xf32>
    %c0_45 = arith.constant 0 : index
    %c0_46 = arith.constant 0 : index
    %c0_47 = arith.constant 0 : index
    %114 = vector.load %arg11[%c0_45, %c0_46, %c0_47] : memref<3x1x128xf32, #tpu.memory_space<vmem>>, vector<1x1x128xf32>
    %115 = vector.shape_cast %114 : vector<1x1x128xf32> to vector<1x128xf32>
    %c0_48 = arith.constant 0 : index
    %c0_49 = arith.constant 0 : index
    %c0_50 = arith.constant 0 : index
    %116 = vector.load %arg12[%c0_48, %c0_49, %c0_50] : memref<3x1x128xf32, #tpu.memory_space<vmem>>, vector<1x1x128xf32>
    %117 = vector.shape_cast %116 : vector<1x1x128xf32> to vector<1x128xf32>
    %cst_51 = arith.constant dense<0.000000e+00> : vector<8xf32>
    %118 = vector.multi_reduction <add>, %113, %cst_51 [1] : vector<8x128xf32> to vector<8xf32>
    %119 = vector.shape_cast %118 : vector<8xf32> to vector<8x1xf32>
    %cst_52 = arith.constant 1.280000e+02 : f32
    %120 = vector.broadcast %cst_52 : f32 to vector<8x1xf32>
    %121 = arith.divf %119, %120 : vector<8x1xf32>
    %122 = arith.mulf %113, %113 : vector<8x128xf32>
    %cst_53 = arith.constant dense<0.000000e+00> : vector<8xf32>
    %123 = vector.multi_reduction <add>, %122, %cst_53 [1] : vector<8x128xf32> to vector<8xf32>
    %124 = vector.shape_cast %123 : vector<8xf32> to vector<8x1xf32>
    %cst_54 = arith.constant 1.280000e+02 : f32
    %125 = vector.broadcast %cst_54 : f32 to vector<8x1xf32>
    %126 = arith.divf %124, %125 : vector<8x1xf32>
    %127 = arith.mulf %121, %121 : vector<8x1xf32>
    %128 = arith.subf %126, %127 : vector<8x1xf32>
    %129 = vector.broadcast %121 : vector<8x1xf32> to vector<8x128xf32>
    %130 = arith.subf %113, %129 : vector<8x128xf32>
    %cst_55 = arith.constant 9.99999974E-6 : f32
    %131 = vector.broadcast %cst_55 : f32 to vector<8x1xf32>
    %132 = arith.addf %128, %131 : vector<8x1xf32>
    %133 = math.rsqrt %132 : vector<8x1xf32>
    %134 = vector.broadcast %133 : vector<8x1xf32> to vector<8x128xf32>
    %135 = arith.mulf %130, %134 : vector<8x128xf32>
    %136 = vector.broadcast %115 : vector<1x128xf32> to vector<8x128xf32>
    %137 = arith.mulf %135, %136 : vector<8x128xf32>
    %138 = vector.broadcast %117 : vector<1x128xf32> to vector<8x128xf32>
    %139 = arith.addf %137, %138 : vector<8x128xf32>
    %c1 = arith.constant 1 : index
    %c0_56 = arith.constant 0 : index
    %c0_57 = arith.constant 0 : index
    %140 = vector.load %arg1[%c1, %c0_56, %c0_57] : memref<3x128x384xf32, #tpu.memory_space<vmem>>, vector<1x128x384xf32>
    %141 = vector.shape_cast %140 : vector<1x128x384xf32> to vector<128x384xf32>
    %cst_58 = arith.constant dense<0.000000e+00> : vector<8x384xf32>
    %142 = tpu.matmul %139, %141, %cst_58 {dimension_numbers = #tpu.dot_dimension_numbers<[1], [0], [0], [1], [0, 0, 1, 1], [], []>} : vector<8x128xf32>, vector<128x384xf32>, vector<8x384xf32> -> vector<8x384xf32>
    %c1_59 = arith.constant 1 : index
    %c0_60 = arith.constant 0 : index
    %c0_61 = arith.constant 0 : index
    %143 = vector.load %arg2[%c1_59, %c0_60, %c0_61] : memref<3x1x384xf32, #tpu.memory_space<vmem>>, vector<1x1x384xf32>
    %144 = vector.shape_cast %143 : vector<1x1x384xf32> to vector<1x384xf32>
    %145 = vector.broadcast %144 : vector<1x384xf32> to vector<8x384xf32>
    %146 = arith.addf %142, %145 : vector<8x384xf32>
    %147 = vector.extract_strided_slice %146 {offsets = [0, 0], sizes = [8, 128], strides = [1, 1]} : vector<8x384xf32> to vector<8x128xf32>
    %148 = vector.extract_strided_slice %147 {offsets = [0, 0], sizes = [8, 32], strides = [1, 1]} : vector<8x128xf32> to vector<8x32xf32>
    %149 = vector.extract_strided_slice %147 {offsets = [0, 32], sizes = [8, 32], strides = [1, 1]} : vector<8x128xf32> to vector<8x32xf32>
    %150 = vector.extract_strided_slice %147 {offsets = [0, 64], sizes = [8, 32], strides = [1, 1]} : vector<8x128xf32> to vector<8x32xf32>
    %151 = vector.extract_strided_slice %147 {offsets = [0, 96], sizes = [8, 32], strides = [1, 1]} : vector<8x128xf32> to vector<8x32xf32>
    %152 = vector.shape_cast %148 : vector<8x32xf32> to vector<1x8x32xf32>
    %153 = vector.shape_cast %149 : vector<8x32xf32> to vector<1x8x32xf32>
    %154 = vector.shape_cast %150 : vector<8x32xf32> to vector<1x8x32xf32>
    %155 = vector.shape_cast %151 : vector<8x32xf32> to vector<1x8x32xf32>
    %156 = tpu.concatenate %152, %153, %154, %155 in 0 : vector<1x8x32xf32>, vector<1x8x32xf32>, vector<1x8x32xf32>, vector<1x8x32xf32> -> vector<4x8x32xf32>
    %157 = vector.extract_strided_slice %146 {offsets = [0, 128], sizes = [8, 128], strides = [1, 1]} : vector<8x384xf32> to vector<8x128xf32>
    %158 = vector.extract_strided_slice %157 {offsets = [0, 0], sizes = [8, 32], strides = [1, 1]} : vector<8x128xf32> to vector<8x32xf32>
    %159 = vector.extract_strided_slice %157 {offsets = [0, 32], sizes = [8, 32], strides = [1, 1]} : vector<8x128xf32> to vector<8x32xf32>
    %160 = vector.extract_strided_slice %157 {offsets = [0, 64], sizes = [8, 32], strides = [1, 1]} : vector<8x128xf32> to vector<8x32xf32>
    %161 = vector.extract_strided_slice %157 {offsets = [0, 96], sizes = [8, 32], strides = [1, 1]} : vector<8x128xf32> to vector<8x32xf32>
    %162 = vector.shape_cast %158 : vector<8x32xf32> to vector<1x8x32xf32>
    %163 = vector.shape_cast %159 : vector<8x32xf32> to vector<1x8x32xf32>
    %164 = vector.shape_cast %160 : vector<8x32xf32> to vector<1x8x32xf32>
    %165 = vector.shape_cast %161 : vector<8x32xf32> to vector<1x8x32xf32>
    %166 = tpu.concatenate %162, %163, %164, %165 in 0 : vector<1x8x32xf32>, vector<1x8x32xf32>, vector<1x8x32xf32>, vector<1x8x32xf32> -> vector<4x8x32xf32>
    %167 = vector.extract_strided_slice %146 {offsets = [0, 256], sizes = [8, 128], strides = [1, 1]} : vector<8x384xf32> to vector<8x128xf32>
    %168 = vector.extract_strided_slice %167 {offsets = [0, 0], sizes = [8, 32], strides = [1, 1]} : vector<8x128xf32> to vector<8x32xf32>
    %169 = vector.extract_strided_slice %167 {offsets = [0, 32], sizes = [8, 32], strides = [1, 1]} : vector<8x128xf32> to vector<8x32xf32>
    %170 = vector.extract_strided_slice %167 {offsets = [0, 64], sizes = [8, 32], strides = [1, 1]} : vector<8x128xf32> to vector<8x32xf32>
    %171 = vector.extract_strided_slice %167 {offsets = [0, 96], sizes = [8, 32], strides = [1, 1]} : vector<8x128xf32> to vector<8x32xf32>
    %172 = vector.shape_cast %168 : vector<8x32xf32> to vector<1x8x32xf32>
    %173 = vector.shape_cast %169 : vector<8x32xf32> to vector<1x8x32xf32>
    %174 = vector.shape_cast %170 : vector<8x32xf32> to vector<1x8x32xf32>
    %175 = vector.shape_cast %171 : vector<8x32xf32> to vector<1x8x32xf32>
    %176 = tpu.concatenate %172, %173, %174, %175 in 0 : vector<1x8x32xf32>, vector<1x8x32xf32>, vector<1x8x32xf32>, vector<1x8x32xf32> -> vector<4x8x32xf32>
    "tpu.trace_start"() <{level = 10 : i32, message = "hbd,hcd->hbc"}> : () -> ()
    %cst_62 = arith.constant dense<0.000000e+00> : vector<4x8x8xf32>
    %177 = tpu.matmul %156, %166, %cst_62 {dimension_numbers = #tpu.dot_dimension_numbers<[2], [2], [1], [1], [0, 0, 0, 1, 1, 1], [0], [0]>} : vector<4x8x32xf32>, vector<4x8x32xf32>, vector<4x8x8xf32> -> vector<4x8x8xf32>
    %cst_63 = arith.constant -1.000000e+30 : f32
    "tpu.trace_stop"() : () -> ()
    %178 = vector.broadcast %cst_63 : f32 to vector<4x8x8xf32>
    %179 = arith.select %3, %177, %178 : vector<4x8x8xi1>, vector<4x8x8xf32>
    %cst_64 = arith.constant dense<0xFF800000> : vector<4x8xf32>
    %180 = vector.multi_reduction <maximumf>, %179, %cst_64 [2] : vector<4x8x8xf32> to vector<4x8xf32>
    %181 = vector.shape_cast %180 : vector<4x8xf32> to vector<4x8x1xf32>
    %182 = vector.broadcast %181 : vector<4x8x1xf32> to vector<4x8x8xf32>
    %183 = arith.subf %179, %182 : vector<4x8x8xf32>
    %184 = math.exp %183 : vector<4x8x8xf32>
    %cst_65 = arith.constant dense<0.000000e+00> : vector<4x8xf32>
    %185 = vector.multi_reduction <add>, %184, %cst_65 [2] : vector<4x8x8xf32> to vector<4x8xf32>
    %186 = vector.shape_cast %185 : vector<4x8xf32> to vector<4x8x1xf32>
    %187 = vector.broadcast %186 : vector<4x8x1xf32> to vector<4x8x8xf32>
    %188 = arith.divf %184, %187 : vector<4x8x8xf32>
    "tpu.trace_start"() <{level = 10 : i32, message = "hbc,hcd->hbd"}> : () -> ()
    %cst_66 = arith.constant dense<0.000000e+00> : vector<4x8x32xf32>
    %189 = tpu.matmul %188, %176, %cst_66 {dimension_numbers = #tpu.dot_dimension_numbers<[2], [1], [1], [2], [0, 0, 0, 1, 1, 2], [0], [0]>} : vector<4x8x8xf32>, vector<4x8x32xf32>, vector<4x8x32xf32> -> vector<4x8x32xf32>
    "tpu.trace_stop"() : () -> ()
    %190 = vector.extract_strided_slice %189 {offsets = [0, 0, 0], sizes = [1, 8, 32], strides = [1, 1, 1]} : vector<4x8x32xf32> to vector<1x8x32xf32>
    %191 = vector.shape_cast %190 : vector<1x8x32xf32> to vector<8x32xf32>
    %192 = vector.extract_strided_slice %189 {offsets = [1, 0, 0], sizes = [1, 8, 32], strides = [1, 1, 1]} : vector<4x8x32xf32> to vector<1x8x32xf32>
    %193 = vector.shape_cast %192 : vector<1x8x32xf32> to vector<8x32xf32>
    %194 = vector.extract_strided_slice %189 {offsets = [2, 0, 0], sizes = [1, 8, 32], strides = [1, 1, 1]} : vector<4x8x32xf32> to vector<1x8x32xf32>
    %195 = vector.shape_cast %194 : vector<1x8x32xf32> to vector<8x32xf32>
    %196 = vector.extract_strided_slice %189 {offsets = [3, 0, 0], sizes = [1, 8, 32], strides = [1, 1, 1]} : vector<4x8x32xf32> to vector<1x8x32xf32>
    %197 = vector.shape_cast %196 : vector<1x8x32xf32> to vector<8x32xf32>
    %198 = tpu.concatenate %191, %193, %195, %197 in 1 : vector<8x32xf32>, vector<8x32xf32>, vector<8x32xf32>, vector<8x32xf32> -> vector<8x128xf32>
    %c1_67 = arith.constant 1 : index
    %c0_68 = arith.constant 0 : index
    %c0_69 = arith.constant 0 : index
    %199 = vector.load %arg3[%c1_67, %c0_68, %c0_69] : memref<3x128x128xf32, #tpu.memory_space<vmem>>, vector<1x128x128xf32>
    %200 = vector.shape_cast %199 : vector<1x128x128xf32> to vector<128x128xf32>
    %cst_70 = arith.constant dense<0.000000e+00> : vector<8x128xf32>
    %201 = tpu.matmul %198, %200, %cst_70 {dimension_numbers = #tpu.dot_dimension_numbers<[1], [0], [0], [1], [0, 0, 1, 1], [], []>} : vector<8x128xf32>, vector<128x128xf32>, vector<8x128xf32> -> vector<8x128xf32>
    %c1_71 = arith.constant 1 : index
    %c0_72 = arith.constant 0 : index
    %c0_73 = arith.constant 0 : index
    %202 = vector.load %arg4[%c1_71, %c0_72, %c0_73] : memref<3x1x128xf32, #tpu.memory_space<vmem>>, vector<1x1x128xf32>
    %203 = vector.shape_cast %202 : vector<1x1x128xf32> to vector<1x128xf32>
    %204 = vector.broadcast %203 : vector<1x128xf32> to vector<8x128xf32>
    %205 = arith.addf %201, %204 : vector<8x128xf32>
    %206 = arith.addf %139, %205 : vector<8x128xf32>
    %c1_74 = arith.constant 1 : index
    %c0_75 = arith.constant 0 : index
    %c0_76 = arith.constant 0 : index
    %207 = vector.load %arg9[%c1_74, %c0_75, %c0_76] : memref<3x1x128xf32, #tpu.memory_space<vmem>>, vector<1x1x128xf32>
    %208 = vector.shape_cast %207 : vector<1x1x128xf32> to vector<1x128xf32>
    %c1_77 = arith.constant 1 : index
    %c0_78 = arith.constant 0 : index
    %c0_79 = arith.constant 0 : index
    %209 = vector.load %arg10[%c1_77, %c0_78, %c0_79] : memref<3x1x128xf32, #tpu.memory_space<vmem>>, vector<1x1x128xf32>
    %210 = vector.shape_cast %209 : vector<1x1x128xf32> to vector<1x128xf32>
    %cst_80 = arith.constant dense<0.000000e+00> : vector<8xf32>
    %211 = vector.multi_reduction <add>, %206, %cst_80 [1] : vector<8x128xf32> to vector<8xf32>
    %212 = vector.shape_cast %211 : vector<8xf32> to vector<8x1xf32>
    %cst_81 = arith.constant 1.280000e+02 : f32
    %213 = vector.broadcast %cst_81 : f32 to vector<8x1xf32>
    %214 = arith.divf %212, %213 : vector<8x1xf32>
    %215 = arith.mulf %206, %206 : vector<8x128xf32>
    %cst_82 = arith.constant dense<0.000000e+00> : vector<8xf32>
    %216 = vector.multi_reduction <add>, %215, %cst_82 [1] : vector<8x128xf32> to vector<8xf32>
    %217 = vector.shape_cast %216 : vector<8xf32> to vector<8x1xf32>
    %cst_83 = arith.constant 1.280000e+02 : f32
    %218 = vector.broadcast %cst_83 : f32 to vector<8x1xf32>
    %219 = arith.divf %217, %218 : vector<8x1xf32>
    %220 = arith.mulf %214, %214 : vector<8x1xf32>
    %221 = arith.subf %219, %220 : vector<8x1xf32>
    %222 = vector.broadcast %214 : vector<8x1xf32> to vector<8x128xf32>
    %223 = arith.subf %206, %222 : vector<8x128xf32>
    %cst_84 = arith.constant 9.99999974E-6 : f32
    %224 = vector.broadcast %cst_84 : f32 to vector<8x1xf32>
    %225 = arith.addf %221, %224 : vector<8x1xf32>
    %226 = math.rsqrt %225 : vector<8x1xf32>
    %227 = vector.broadcast %226 : vector<8x1xf32> to vector<8x128xf32>
    %228 = arith.mulf %223, %227 : vector<8x128xf32>
    %229 = vector.broadcast %208 : vector<1x128xf32> to vector<8x128xf32>
    %230 = arith.mulf %228, %229 : vector<8x128xf32>
    %231 = vector.broadcast %210 : vector<1x128xf32> to vector<8x128xf32>
    %232 = arith.addf %230, %231 : vector<8x128xf32>
    %c1_85 = arith.constant 1 : index
    %c0_86 = arith.constant 0 : index
    %c0_87 = arith.constant 0 : index
    %233 = vector.load %arg5[%c1_85, %c0_86, %c0_87] : memref<3x128x512xf32, #tpu.memory_space<vmem>>, vector<1x128x512xf32>
    %234 = vector.shape_cast %233 : vector<1x128x512xf32> to vector<128x512xf32>
    %cst_88 = arith.constant dense<0.000000e+00> : vector<8x512xf32>
    %235 = tpu.matmul %232, %234, %cst_88 {dimension_numbers = #tpu.dot_dimension_numbers<[1], [0], [0], [1], [0, 0, 1, 1], [], []>} : vector<8x128xf32>, vector<128x512xf32>, vector<8x512xf32> -> vector<8x512xf32>
    %c1_89 = arith.constant 1 : index
    %c0_90 = arith.constant 0 : index
    %c0_91 = arith.constant 0 : index
    %236 = vector.load %arg6[%c1_89, %c0_90, %c0_91] : memref<3x1x512xf32, #tpu.memory_space<vmem>>, vector<1x1x512xf32>
    %237 = vector.shape_cast %236 : vector<1x1x512xf32> to vector<1x512xf32>
    %238 = vector.broadcast %237 : vector<1x512xf32> to vector<8x512xf32>
    %239 = arith.addf %235, %238 : vector<8x512xf32>
    %cst_92 = arith.constant 0.000000e+00 : f32
    %240 = vector.broadcast %cst_92 : f32 to vector<8x512xf32>
    %241 = arith.maximumf %239, %240 : vector<8x512xf32>
    %c1_93 = arith.constant 1 : index
    %c0_94 = arith.constant 0 : index
    %c0_95 = arith.constant 0 : index
    %242 = vector.load %arg7[%c1_93, %c0_94, %c0_95] : memref<3x512x128xf32, #tpu.memory_space<vmem>>, vector<1x512x128xf32>
    %243 = vector.shape_cast %242 : vector<1x512x128xf32> to vector<512x128xf32>
    %cst_96 = arith.constant dense<0.000000e+00> : vector<8x128xf32>
    %244 = tpu.matmul %241, %243, %cst_96 {dimension_numbers = #tpu.dot_dimension_numbers<[1], [0], [0], [1], [0, 0, 1, 1], [], []>} : vector<8x512xf32>, vector<512x128xf32>, vector<8x128xf32> -> vector<8x128xf32>
    %c1_97 = arith.constant 1 : index
    %c0_98 = arith.constant 0 : index
    %c0_99 = arith.constant 0 : index
    %245 = vector.load %arg8[%c1_97, %c0_98, %c0_99] : memref<3x1x128xf32, #tpu.memory_space<vmem>>, vector<1x1x128xf32>
    %246 = vector.shape_cast %245 : vector<1x1x128xf32> to vector<1x128xf32>
    %247 = vector.broadcast %246 : vector<1x128xf32> to vector<8x128xf32>
    %248 = arith.addf %244, %247 : vector<8x128xf32>
    %249 = arith.addf %232, %248 : vector<8x128xf32>
    %c1_100 = arith.constant 1 : index
    %c0_101 = arith.constant 0 : index
    %c0_102 = arith.constant 0 : index
    %250 = vector.load %arg11[%c1_100, %c0_101, %c0_102] : memref<3x1x128xf32, #tpu.memory_space<vmem>>, vector<1x1x128xf32>
    %251 = vector.shape_cast %250 : vector<1x1x128xf32> to vector<1x128xf32>
    %c1_103 = arith.constant 1 : index
    %c0_104 = arith.constant 0 : index
    %c0_105 = arith.constant 0 : index
    %252 = vector.load %arg12[%c1_103, %c0_104, %c0_105] : memref<3x1x128xf32, #tpu.memory_space<vmem>>, vector<1x1x128xf32>
    %253 = vector.shape_cast %252 : vector<1x1x128xf32> to vector<1x128xf32>
    %cst_106 = arith.constant dense<0.000000e+00> : vector<8xf32>
    %254 = vector.multi_reduction <add>, %249, %cst_106 [1] : vector<8x128xf32> to vector<8xf32>
    %255 = vector.shape_cast %254 : vector<8xf32> to vector<8x1xf32>
    %cst_107 = arith.constant 1.280000e+02 : f32
    %256 = vector.broadcast %cst_107 : f32 to vector<8x1xf32>
    %257 = arith.divf %255, %256 : vector<8x1xf32>
    %258 = arith.mulf %249, %249 : vector<8x128xf32>
    %cst_108 = arith.constant dense<0.000000e+00> : vector<8xf32>
    %259 = vector.multi_reduction <add>, %258, %cst_108 [1] : vector<8x128xf32> to vector<8xf32>
    %260 = vector.shape_cast %259 : vector<8xf32> to vector<8x1xf32>
    %cst_109 = arith.constant 1.280000e+02 : f32
    %261 = vector.broadcast %cst_109 : f32 to vector<8x1xf32>
    %262 = arith.divf %260, %261 : vector<8x1xf32>
    %263 = arith.mulf %257, %257 : vector<8x1xf32>
    %264 = arith.subf %262, %263 : vector<8x1xf32>
    %265 = vector.broadcast %257 : vector<8x1xf32> to vector<8x128xf32>
    %266 = arith.subf %249, %265 : vector<8x128xf32>
    %cst_110 = arith.constant 9.99999974E-6 : f32
    %267 = vector.broadcast %cst_110 : f32 to vector<8x1xf32>
    %268 = arith.addf %264, %267 : vector<8x1xf32>
    %269 = math.rsqrt %268 : vector<8x1xf32>
    %270 = vector.broadcast %269 : vector<8x1xf32> to vector<8x128xf32>
    %271 = arith.mulf %266, %270 : vector<8x128xf32>
    %272 = vector.broadcast %251 : vector<1x128xf32> to vector<8x128xf32>
    %273 = arith.mulf %271, %272 : vector<8x128xf32>
    %274 = vector.broadcast %253 : vector<1x128xf32> to vector<8x128xf32>
    %275 = arith.addf %273, %274 : vector<8x128xf32>
    %c2 = arith.constant 2 : index
    %c0_111 = arith.constant 0 : index
    %c0_112 = arith.constant 0 : index
    %276 = vector.load %arg1[%c2, %c0_111, %c0_112] : memref<3x128x384xf32, #tpu.memory_space<vmem>>, vector<1x128x384xf32>
    %277 = vector.shape_cast %276 : vector<1x128x384xf32> to vector<128x384xf32>
    %cst_113 = arith.constant dense<0.000000e+00> : vector<8x384xf32>
    %278 = tpu.matmul %275, %277, %cst_113 {dimension_numbers = #tpu.dot_dimension_numbers<[1], [0], [0], [1], [0, 0, 1, 1], [], []>} : vector<8x128xf32>, vector<128x384xf32>, vector<8x384xf32> -> vector<8x384xf32>
    %c2_114 = arith.constant 2 : index
    %c0_115 = arith.constant 0 : index
    %c0_116 = arith.constant 0 : index
    %279 = vector.load %arg2[%c2_114, %c0_115, %c0_116] : memref<3x1x384xf32, #tpu.memory_space<vmem>>, vector<1x1x384xf32>
    %280 = vector.shape_cast %279 : vector<1x1x384xf32> to vector<1x384xf32>
    %281 = vector.broadcast %280 : vector<1x384xf32> to vector<8x384xf32>
    %282 = arith.addf %278, %281 : vector<8x384xf32>
    %283 = vector.extract_strided_slice %282 {offsets = [0, 0], sizes = [8, 128], strides = [1, 1]} : vector<8x384xf32> to vector<8x128xf32>
    %284 = vector.extract_strided_slice %283 {offsets = [0, 0], sizes = [8, 32], strides = [1, 1]} : vector<8x128xf32> to vector<8x32xf32>
    %285 = vector.extract_strided_slice %283 {offsets = [0, 32], sizes = [8, 32], strides = [1, 1]} : vector<8x128xf32> to vector<8x32xf32>
    %286 = vector.extract_strided_slice %283 {offsets = [0, 64], sizes = [8, 32], strides = [1, 1]} : vector<8x128xf32> to vector<8x32xf32>
    %287 = vector.extract_strided_slice %283 {offsets = [0, 96], sizes = [8, 32], strides = [1, 1]} : vector<8x128xf32> to vector<8x32xf32>
    %288 = vector.shape_cast %284 : vector<8x32xf32> to vector<1x8x32xf32>
    %289 = vector.shape_cast %285 : vector<8x32xf32> to vector<1x8x32xf32>
    %290 = vector.shape_cast %286 : vector<8x32xf32> to vector<1x8x32xf32>
    %291 = vector.shape_cast %287 : vector<8x32xf32> to vector<1x8x32xf32>
    %292 = tpu.concatenate %288, %289, %290, %291 in 0 : vector<1x8x32xf32>, vector<1x8x32xf32>, vector<1x8x32xf32>, vector<1x8x32xf32> -> vector<4x8x32xf32>
    %293 = vector.extract_strided_slice %282 {offsets = [0, 128], sizes = [8, 128], strides = [1, 1]} : vector<8x384xf32> to vector<8x128xf32>
    %294 = vector.extract_strided_slice %293 {offsets = [0, 0], sizes = [8, 32], strides = [1, 1]} : vector<8x128xf32> to vector<8x32xf32>
    %295 = vector.extract_strided_slice %293 {offsets = [0, 32], sizes = [8, 32], strides = [1, 1]} : vector<8x128xf32> to vector<8x32xf32>
    %296 = vector.extract_strided_slice %293 {offsets = [0, 64], sizes = [8, 32], strides = [1, 1]} : vector<8x128xf32> to vector<8x32xf32>
    %297 = vector.extract_strided_slice %293 {offsets = [0, 96], sizes = [8, 32], strides = [1, 1]} : vector<8x128xf32> to vector<8x32xf32>
    %298 = vector.shape_cast %294 : vector<8x32xf32> to vector<1x8x32xf32>
    %299 = vector.shape_cast %295 : vector<8x32xf32> to vector<1x8x32xf32>
    %300 = vector.shape_cast %296 : vector<8x32xf32> to vector<1x8x32xf32>
    %301 = vector.shape_cast %297 : vector<8x32xf32> to vector<1x8x32xf32>
    %302 = tpu.concatenate %298, %299, %300, %301 in 0 : vector<1x8x32xf32>, vector<1x8x32xf32>, vector<1x8x32xf32>, vector<1x8x32xf32> -> vector<4x8x32xf32>
    %303 = vector.extract_strided_slice %282 {offsets = [0, 256], sizes = [8, 128], strides = [1, 1]} : vector<8x384xf32> to vector<8x128xf32>
    %304 = vector.extract_strided_slice %303 {offsets = [0, 0], sizes = [8, 32], strides = [1, 1]} : vector<8x128xf32> to vector<8x32xf32>
    %305 = vector.extract_strided_slice %303 {offsets = [0, 32], sizes = [8, 32], strides = [1, 1]} : vector<8x128xf32> to vector<8x32xf32>
    %306 = vector.extract_strided_slice %303 {offsets = [0, 64], sizes = [8, 32], strides = [1, 1]} : vector<8x128xf32> to vector<8x32xf32>
    %307 = vector.extract_strided_slice %303 {offsets = [0, 96], sizes = [8, 32], strides = [1, 1]} : vector<8x128xf32> to vector<8x32xf32>
    %308 = vector.shape_cast %304 : vector<8x32xf32> to vector<1x8x32xf32>
    %309 = vector.shape_cast %305 : vector<8x32xf32> to vector<1x8x32xf32>
    %310 = vector.shape_cast %306 : vector<8x32xf32> to vector<1x8x32xf32>
    %311 = vector.shape_cast %307 : vector<8x32xf32> to vector<1x8x32xf32>
    %312 = tpu.concatenate %308, %309, %310, %311 in 0 : vector<1x8x32xf32>, vector<1x8x32xf32>, vector<1x8x32xf32>, vector<1x8x32xf32> -> vector<4x8x32xf32>
    "tpu.trace_start"() <{level = 10 : i32, message = "hbd,hcd->hbc"}> : () -> ()
    %cst_117 = arith.constant dense<0.000000e+00> : vector<4x8x8xf32>
    %313 = tpu.matmul %292, %302, %cst_117 {dimension_numbers = #tpu.dot_dimension_numbers<[2], [2], [1], [1], [0, 0, 0, 1, 1, 1], [0], [0]>} : vector<4x8x32xf32>, vector<4x8x32xf32>, vector<4x8x8xf32> -> vector<4x8x8xf32>
    %cst_118 = arith.constant -1.000000e+30 : f32
    "tpu.trace_stop"() : () -> ()
    %314 = vector.broadcast %cst_118 : f32 to vector<4x8x8xf32>
    %315 = arith.select %3, %313, %314 : vector<4x8x8xi1>, vector<4x8x8xf32>
    %cst_119 = arith.constant dense<0xFF800000> : vector<4x8xf32>
    %316 = vector.multi_reduction <maximumf>, %315, %cst_119 [2] : vector<4x8x8xf32> to vector<4x8xf32>
    %317 = vector.shape_cast %316 : vector<4x8xf32> to vector<4x8x1xf32>
    %318 = vector.broadcast %317 : vector<4x8x1xf32> to vector<4x8x8xf32>
    %319 = arith.subf %315, %318 : vector<4x8x8xf32>
    %320 = math.exp %319 : vector<4x8x8xf32>
    %cst_120 = arith.constant dense<0.000000e+00> : vector<4x8xf32>
    %321 = vector.multi_reduction <add>, %320, %cst_120 [2] : vector<4x8x8xf32> to vector<4x8xf32>
    %322 = vector.shape_cast %321 : vector<4x8xf32> to vector<4x8x1xf32>
    %323 = vector.broadcast %322 : vector<4x8x1xf32> to vector<4x8x8xf32>
    %324 = arith.divf %320, %323 : vector<4x8x8xf32>
    "tpu.trace_start"() <{level = 10 : i32, message = "hbc,hcd->hbd"}> : () -> ()
    %cst_121 = arith.constant dense<0.000000e+00> : vector<4x8x32xf32>
    %325 = tpu.matmul %324, %312, %cst_121 {dimension_numbers = #tpu.dot_dimension_numbers<[2], [1], [1], [2], [0, 0, 0, 1, 1, 2], [0], [0]>} : vector<4x8x8xf32>, vector<4x8x32xf32>, vector<4x8x32xf32> -> vector<4x8x32xf32>
    "tpu.trace_stop"() : () -> ()
    %326 = vector.extract_strided_slice %325 {offsets = [0, 0, 0], sizes = [1, 8, 32], strides = [1, 1, 1]} : vector<4x8x32xf32> to vector<1x8x32xf32>
    %327 = vector.shape_cast %326 : vector<1x8x32xf32> to vector<8x32xf32>
    %328 = vector.extract_strided_slice %325 {offsets = [1, 0, 0], sizes = [1, 8, 32], strides = [1, 1, 1]} : vector<4x8x32xf32> to vector<1x8x32xf32>
    %329 = vector.shape_cast %328 : vector<1x8x32xf32> to vector<8x32xf32>
    %330 = vector.extract_strided_slice %325 {offsets = [2, 0, 0], sizes = [1, 8, 32], strides = [1, 1, 1]} : vector<4x8x32xf32> to vector<1x8x32xf32>
    %331 = vector.shape_cast %330 : vector<1x8x32xf32> to vector<8x32xf32>
    %332 = vector.extract_strided_slice %325 {offsets = [3, 0, 0], sizes = [1, 8, 32], strides = [1, 1, 1]} : vector<4x8x32xf32> to vector<1x8x32xf32>
    %333 = vector.shape_cast %332 : vector<1x8x32xf32> to vector<8x32xf32>
    %334 = tpu.concatenate %327, %329, %331, %333 in 1 : vector<8x32xf32>, vector<8x32xf32>, vector<8x32xf32>, vector<8x32xf32> -> vector<8x128xf32>
    %c2_122 = arith.constant 2 : index
    %c0_123 = arith.constant 0 : index
    %c0_124 = arith.constant 0 : index
    %335 = vector.load %arg3[%c2_122, %c0_123, %c0_124] : memref<3x128x128xf32, #tpu.memory_space<vmem>>, vector<1x128x128xf32>
    %336 = vector.shape_cast %335 : vector<1x128x128xf32> to vector<128x128xf32>
    %cst_125 = arith.constant dense<0.000000e+00> : vector<8x128xf32>
    %337 = tpu.matmul %334, %336, %cst_125 {dimension_numbers = #tpu.dot_dimension_numbers<[1], [0], [0], [1], [0, 0, 1, 1], [], []>} : vector<8x128xf32>, vector<128x128xf32>, vector<8x128xf32> -> vector<8x128xf32>
    %c2_126 = arith.constant 2 : index
    %c0_127 = arith.constant 0 : index
    %c0_128 = arith.constant 0 : index
    %338 = vector.load %arg4[%c2_126, %c0_127, %c0_128] : memref<3x1x128xf32, #tpu.memory_space<vmem>>, vector<1x1x128xf32>
    %339 = vector.shape_cast %338 : vector<1x1x128xf32> to vector<1x128xf32>
    %340 = vector.broadcast %339 : vector<1x128xf32> to vector<8x128xf32>
    %341 = arith.addf %337, %340 : vector<8x128xf32>
    %342 = arith.addf %275, %341 : vector<8x128xf32>
    %c2_129 = arith.constant 2 : index
    %c0_130 = arith.constant 0 : index
    %c0_131 = arith.constant 0 : index
    %343 = vector.load %arg9[%c2_129, %c0_130, %c0_131] : memref<3x1x128xf32, #tpu.memory_space<vmem>>, vector<1x1x128xf32>
    %344 = vector.shape_cast %343 : vector<1x1x128xf32> to vector<1x128xf32>
    %c2_132 = arith.constant 2 : index
    %c0_133 = arith.constant 0 : index
    %c0_134 = arith.constant 0 : index
    %345 = vector.load %arg10[%c2_132, %c0_133, %c0_134] : memref<3x1x128xf32, #tpu.memory_space<vmem>>, vector<1x1x128xf32>
    %346 = vector.shape_cast %345 : vector<1x1x128xf32> to vector<1x128xf32>
    %cst_135 = arith.constant dense<0.000000e+00> : vector<8xf32>
    %347 = vector.multi_reduction <add>, %342, %cst_135 [1] : vector<8x128xf32> to vector<8xf32>
    %348 = vector.shape_cast %347 : vector<8xf32> to vector<8x1xf32>
    %cst_136 = arith.constant 1.280000e+02 : f32
    %349 = vector.broadcast %cst_136 : f32 to vector<8x1xf32>
    %350 = arith.divf %348, %349 : vector<8x1xf32>
    %351 = arith.mulf %342, %342 : vector<8x128xf32>
    %cst_137 = arith.constant dense<0.000000e+00> : vector<8xf32>
    %352 = vector.multi_reduction <add>, %351, %cst_137 [1] : vector<8x128xf32> to vector<8xf32>
    %353 = vector.shape_cast %352 : vector<8xf32> to vector<8x1xf32>
    %cst_138 = arith.constant 1.280000e+02 : f32
    %354 = vector.broadcast %cst_138 : f32 to vector<8x1xf32>
    %355 = arith.divf %353, %354 : vector<8x1xf32>
    %356 = arith.mulf %350, %350 : vector<8x1xf32>
    %357 = arith.subf %355, %356 : vector<8x1xf32>
    %358 = vector.broadcast %350 : vector<8x1xf32> to vector<8x128xf32>
    %359 = arith.subf %342, %358 : vector<8x128xf32>
    %cst_139 = arith.constant 9.99999974E-6 : f32
    %360 = vector.broadcast %cst_139 : f32 to vector<8x1xf32>
    %361 = arith.addf %357, %360 : vector<8x1xf32>
    %362 = math.rsqrt %361 : vector<8x1xf32>
    %363 = vector.broadcast %362 : vector<8x1xf32> to vector<8x128xf32>
    %364 = arith.mulf %359, %363 : vector<8x128xf32>
    %365 = vector.broadcast %344 : vector<1x128xf32> to vector<8x128xf32>
    %366 = arith.mulf %364, %365 : vector<8x128xf32>
    %367 = vector.broadcast %346 : vector<1x128xf32> to vector<8x128xf32>
    %368 = arith.addf %366, %367 : vector<8x128xf32>
    %c2_140 = arith.constant 2 : index
    %c0_141 = arith.constant 0 : index
    %c0_142 = arith.constant 0 : index
    %369 = vector.load %arg5[%c2_140, %c0_141, %c0_142] : memref<3x128x512xf32, #tpu.memory_space<vmem>>, vector<1x128x512xf32>
    %370 = vector.shape_cast %369 : vector<1x128x512xf32> to vector<128x512xf32>
    %cst_143 = arith.constant dense<0.000000e+00> : vector<8x512xf32>
    %371 = tpu.matmul %368, %370, %cst_143 {dimension_numbers = #tpu.dot_dimension_numbers<[1], [0], [0], [1], [0, 0, 1, 1], [], []>} : vector<8x128xf32>, vector<128x512xf32>, vector<8x512xf32> -> vector<8x512xf32>
    %c2_144 = arith.constant 2 : index
    %c0_145 = arith.constant 0 : index
    %c0_146 = arith.constant 0 : index
    %372 = vector.load %arg6[%c2_144, %c0_145, %c0_146] : memref<3x1x512xf32, #tpu.memory_space<vmem>>, vector<1x1x512xf32>
    %373 = vector.shape_cast %372 : vector<1x1x512xf32> to vector<1x512xf32>
    %374 = vector.broadcast %373 : vector<1x512xf32> to vector<8x512xf32>
    %375 = arith.addf %371, %374 : vector<8x512xf32>
    %cst_147 = arith.constant 0.000000e+00 : f32
    %376 = vector.broadcast %cst_147 : f32 to vector<8x512xf32>
    %377 = arith.maximumf %375, %376 : vector<8x512xf32>
    %c2_148 = arith.constant 2 : index
    %c0_149 = arith.constant 0 : index
    %c0_150 = arith.constant 0 : index
    %378 = vector.load %arg7[%c2_148, %c0_149, %c0_150] : memref<3x512x128xf32, #tpu.memory_space<vmem>>, vector<1x512x128xf32>
    %379 = vector.shape_cast %378 : vector<1x512x128xf32> to vector<512x128xf32>
    %cst_151 = arith.constant dense<0.000000e+00> : vector<8x128xf32>
    %380 = tpu.matmul %377, %379, %cst_151 {dimension_numbers = #tpu.dot_dimension_numbers<[1], [0], [0], [1], [0, 0, 1, 1], [], []>} : vector<8x512xf32>, vector<512x128xf32>, vector<8x128xf32> -> vector<8x128xf32>
    %c2_152 = arith.constant 2 : index
    %c0_153 = arith.constant 0 : index
    %c0_154 = arith.constant 0 : index
    %381 = vector.load %arg8[%c2_152, %c0_153, %c0_154] : memref<3x1x128xf32, #tpu.memory_space<vmem>>, vector<1x1x128xf32>
    %382 = vector.shape_cast %381 : vector<1x1x128xf32> to vector<1x128xf32>
    %383 = vector.broadcast %382 : vector<1x128xf32> to vector<8x128xf32>
    %384 = arith.addf %380, %383 : vector<8x128xf32>
    %385 = arith.addf %368, %384 : vector<8x128xf32>
    %c2_155 = arith.constant 2 : index
    %c0_156 = arith.constant 0 : index
    %c0_157 = arith.constant 0 : index
    %386 = vector.load %arg11[%c2_155, %c0_156, %c0_157] : memref<3x1x128xf32, #tpu.memory_space<vmem>>, vector<1x1x128xf32>
    %387 = vector.shape_cast %386 : vector<1x1x128xf32> to vector<1x128xf32>
    %c2_158 = arith.constant 2 : index
    %c0_159 = arith.constant 0 : index
    %c0_160 = arith.constant 0 : index
    %388 = vector.load %arg12[%c2_158, %c0_159, %c0_160] : memref<3x1x128xf32, #tpu.memory_space<vmem>>, vector<1x1x128xf32>
    %389 = vector.shape_cast %388 : vector<1x1x128xf32> to vector<1x128xf32>
    %cst_161 = arith.constant dense<0.000000e+00> : vector<8xf32>
    %390 = vector.multi_reduction <add>, %385, %cst_161 [1] : vector<8x128xf32> to vector<8xf32>
    %391 = vector.shape_cast %390 : vector<8xf32> to vector<8x1xf32>
    %cst_162 = arith.constant 1.280000e+02 : f32
    %392 = vector.broadcast %cst_162 : f32 to vector<8x1xf32>
    %393 = arith.divf %391, %392 : vector<8x1xf32>
    %394 = arith.mulf %385, %385 : vector<8x128xf32>
    %cst_163 = arith.constant dense<0.000000e+00> : vector<8xf32>
    %395 = vector.multi_reduction <add>, %394, %cst_163 [1] : vector<8x128xf32> to vector<8xf32>
    %396 = vector.shape_cast %395 : vector<8xf32> to vector<8x1xf32>
    %cst_164 = arith.constant 1.280000e+02 : f32
    %397 = vector.broadcast %cst_164 : f32 to vector<8x1xf32>
    %398 = arith.divf %396, %397 : vector<8x1xf32>
    %399 = arith.mulf %393, %393 : vector<8x1xf32>
    %400 = arith.subf %398, %399 : vector<8x1xf32>
    %401 = vector.broadcast %393 : vector<8x1xf32> to vector<8x128xf32>
    %402 = arith.subf %385, %401 : vector<8x128xf32>
    %cst_165 = arith.constant 9.99999974E-6 : f32
    %403 = vector.broadcast %cst_165 : f32 to vector<8x1xf32>
    %404 = arith.addf %400, %403 : vector<8x1xf32>
    %405 = math.rsqrt %404 : vector<8x1xf32>
    %406 = vector.broadcast %405 : vector<8x1xf32> to vector<8x128xf32>
    %407 = arith.mulf %402, %406 : vector<8x128xf32>
    %408 = vector.broadcast %387 : vector<1x128xf32> to vector<8x128xf32>
    %409 = arith.mulf %407, %408 : vector<8x128xf32>
    %410 = vector.broadcast %389 : vector<1x128xf32> to vector<8x128xf32>
    %411 = arith.addf %409, %410 : vector<8x128xf32>
    %c0_166 = arith.constant 0 : index
    %c0_167 = arith.constant 0 : index
    %412 = vector.load %arg13[%c0_166, %c0_167] : memref<8x128xf32, #tpu.memory_space<vmem>>, vector<8x128xf32>
    tpu.vector_store %arg13[%c0_166, %c0_167], %411 {strides = array<i32>} : memref<8x128xf32, #tpu.memory_space<vmem>>, vector<8x128xf32>,
    return
  }
}

</mosaic_0001>

<bundles_post_ra>
// kernel: tpu_custom_call.1
= control target key start
LH: loop header
LB: loop body
LE: loop exit
PB: predicated region body
PF: predicated region fallthrough
CT: control target
= control target key end

     0   :  { %18 = vsyncpa [#allocation3], 0  ;;  %s3716_s0 = inlined_call_operand.hbm [shape: f32[8,128], index: 0, kind: input, shape index: {}]   ;;  %s3717_s1 = inlined_call_operand.hbm [shape: f32[3,128,384], index: 1, kind: input, shape index: {}]   ;;  %s3718_s2 = inlined_call_operand.hbm [shape: f32[3,1,384], index: 2, kind: input, shape index: {}]   ;;  %s3719_s3 = inlined_call_operand.hbm [shape: f32[3,128,128], index: 3, kind: input, shape index: {}]   ;;  %s3720_s4 = inlined_call_operand.vmem [shape: f32[3,1,128], index: 4, kind: input, shape index: {}]   ;;  %s3721_s5 = inlined_call_operand.hbm [shape: f32[3,128,512], index: 5, kind: input, shape index: {}]   ;;  %s3722_s6 = inlined_call_operand.hbm [shape: f32[3,1,512], index: 6, kind: input, shape index: {}]   ;;  %s3723_s7 = inlined_call_operand.hbm [shape: f32[3,512,128], index: 7, kind: input, shape index: {}]   ;;  %s3724_s8 = inlined_call_operand.vmem [shape: f32[3,1,128], index: 8, kind: input, shape index: {}]   ;;  %s3725_s9 = inlined_call_operand.hbm [shape: f32[3,1,128], index: 9, kind: input, shape index: {}]   ;;  %s3726_s10 = inlined_call_operand.vmem [shape: f32[3,1,128], index: 10, kind: input, shape index: {}]   ;;  %s3727_s11 = inlined_call_operand.hbm [shape: f32[3,1,128], index: 11, kind: input, shape index: {}]   ;;  %s3728_s12 = inlined_call_operand.hbm [shape: f32[3,1,128], index: 12, kind: input, shape index: {}]   ;;  %s3729_s13 = inlined_call_operand.hbm [shape: f32[8,128], index: 13, kind: output, shape index: {}]  }
   0x1   :  { %19 = vsyncpa [#allocation6], 0 }
   0x2   :  { %20 = vsyncpa [#allocation9], 0 }
   0x3   :  { %21 = vsyncpa [#allocation12], 0 }
   0x4   :  { %22 = vsyncpa [#allocation15], 0 }
   0x5   :  { %23 = vsyncpa [#allocation18], 0  ;;  %s40_s27 = sshll.u32 %s3717_s1, 4  ;;  %s41_s27 = int_to_ptr.hbm [resolvable:$true] %s40_s27 }
   0x6   :  { %24 = vsyncpa [#allocation4], 0  ;;  %s3251_s28 = smov [#allocation5]   ;;  %s66_s15 = sshll.u32 %s3719_s3, 4  ;;  %s67_s15 = int_to_ptr.hbm [resolvable:$true] %s66_s15 }
   0x7   :  { %s42_s29 = sshll.u32 %s3251_s28, 4  ;;  %s3252_s16 = smov 384   ;;  %s43_s29 = int_to_ptr.vmem [resolvable:$true] %s42_s29 }
   0x8   :  { %s3253_s17 = smov 24   ;;  %s3254_s18 = smov [#allocation8]  }
   0x9   :  { %48 = dma.hbm_to_vmem [thread:$0]  %s41_s27, 18432, %s43_s29, [#allocation6], %s3252_s16, %s3252_s16, %s3253_s17  }
   0xa   :  { %s68_s19 = sshll.u32 %s3254_s18, 4  ;;  %s3255_s20 = smov 128   ;;  %s69_s19 = int_to_ptr.vmem [resolvable:$true] %s68_s19 }
   0xb   :  { %s3256_s21 = smov 8   ;;  %s94_s23 = sshll.u32 %s3722_s6, 4  ;;  %s95_s23 = int_to_ptr.hbm [resolvable:$true] %s94_s23 }
   0xc   :  { %74 = dma.hbm_to_vmem [thread:$0]  %s67_s15, 6144, %s69_s19, [#allocation9], %s3255_s20, %s3255_s20, %s3256_s21  }
   0xd   :  { %s3257_s24 = smov [#allocation11]   ;;  %s122_s27 = sshll.u32 %s3725_s9, 4  ;;  %s123_s27 = int_to_ptr.hbm [resolvable:$true] %s122_s27 }
   0xe   :  { %s96_s3 = sshll.u32 %s3257_s24, 4  ;;  %s3258_s28 = smov 64   ;;  %s97_s3 = int_to_ptr.vmem [resolvable:$true] %s96_s3 }
   0xf   :  { %s3259_s29 = smov 4   ;;  %s3260_s30 = smov [#allocation14]  }
  0x10   :  { %102 = dma.hbm_to_vmem [thread:$0]  %s95_s23, 192, %s97_s3, [#allocation12], %s3258_s28, %s3258_s28, %s3259_s29  }
  0x11   :  { %s124_s14 = sshll.u32 %s3260_s30, 4  ;;  %s3261_s15 = smov 16   ;;  %s125_s14 = int_to_ptr.vmem [resolvable:$true] %s124_s14 }
  0x12   :  { %s3262_s16 = smov 1   ;;  %s30_s18 = sshll.u32 %s3716_s0, 4  ;;  %s31_s18 = int_to_ptr.hbm [resolvable:$true] %s30_s18 }
  0x13   :  { %130 = dma.hbm_to_vmem [thread:$0]  %s123_s27, 48, %s125_s14, [#allocation15], %s3261_s15, %s3261_s15, %s3262_s16  }
  0x14   :  { %s3263_s9 = smov [#allocation2]   ;;  %s53_s23 = sshll.u32 %s3718_s2, 4  ;;  %s54_s23 = int_to_ptr.hbm [resolvable:$true] %s53_s23 }
  0x15   :  { %s32_s19 = sshll.u32 %s3263_s9, 4  ;;  %s3264_s24 = smov [#allocation7]   ;;  %s33_s19 = int_to_ptr.vmem [resolvable:$true] %s32_s19 }
  0x16   :  { %35 = dma.hbm_to_vmem [thread:$0]  %s31_s18, 128, %s33_s19, [#allocation3]  }
  0x17   :  { %s55_s3 = sshll.u32 %s3264_s24, 4  ;;  %s3265_s25 = smov 48   ;;  %s56_s3 = int_to_ptr.vmem [resolvable:$true] %s55_s3 }
  0x18   :  { %s3266_s26 = smov 3   ;;  %s81_s0 = sshll.u32 %s3721_s5, 4  ;;  %s82_s0 = int_to_ptr.hbm [resolvable:$true] %s81_s0 }
  0x19   :  { %61 = dma.hbm_to_vmem [thread:$0]  %s54_s23, 144, %s56_s3, [#allocation6], %s3265_s25, %s3265_s25, %s3266_s26  }
  0x1a   :  { %s3267_s30 = smov [#allocation10]   ;;  %s107_s2 = sshll.u32 %s3723_s7, 4  ;;  %s108_s2 = int_to_ptr.hbm [resolvable:$true] %s107_s2 }
  0x1b   :  { %s83_s14 = sshll.u32 %s3267_s30, 4  ;;  %s3268_s18 = smov 512   ;;  %s84_s14 = int_to_ptr.vmem [resolvable:$true] %s83_s14 }
  0x1c   :  { %s3269_s9 = smov 32   ;;  %s3270_s19 = smov [#allocation13]  }
  0x1d   :  { %89 = dma.hbm_to_vmem [thread:$0]  %s82_s0, 24576, %s84_s14, [#allocation9], %s3268_s18, %s3268_s18, %s3269_s9  }
  0x1e   :  { %s109_s1 = sshll.u32 %s3270_s19, 4  ;;  %s137_s24 = sshll.u32 %s3727_s11, 4  ;;  %s110_s1 = int_to_ptr.vmem [resolvable:$true] %s109_s1  ;;  %s138_s24 = int_to_ptr.hbm [resolvable:$true] %s137_s24 }
  0x1f   :  { %115 = dma.hbm_to_vmem [thread:$0]  %s108_s2, 24576, %s110_s1, [#allocation12], %s3255_s20, %s3255_s20, %s3256_s21  }
  0x20   :  { %s150_s7 = sshll.u32 %s3728_s12, 4  ;;  %s3271_s25 = smov [#allocation16]   ;;  %s151_s7 = int_to_ptr.hbm [resolvable:$true] %s150_s7 }
  0x21   :  { %s139_s26 = sshll.u32 %s3271_s25, 4  ;;  %s3272_s27 = smov [#allocation17]   ;;  %s140_s26 = int_to_ptr.vmem [resolvable:$true] %s139_s26 }
  0x22   :  { %145 = dma.hbm_to_vmem [thread:$0]  %s138_s24, 48, %s140_s26, [#allocation15], %s3261_s15, %s3261_s15, %s3262_s16  }
  0x23   :  { %s152_s11 = sshll.u32 %s3272_s27, 4  ;;  %s153_s11 = int_to_ptr.vmem [resolvable:$true] %s152_s11 }
  0x24   :  { %158 = dma.hbm_to_vmem [thread:$0]  %s151_s7, 48, %s153_s11, [#allocation18], %s3261_s15, %s3261_s15, %s3262_s16  }
  0x25   :  { %3237 = dma.done.wait [#allocation3], 128  }
  0x26   :  { %3238 = vsyncadd [#allocation3], 4294967168 }
  0x27   :  { %3239 = dma.done.wait [#allocation6], 18576  }
  0x28   :  { %3240 = vsyncadd [#allocation6], 4294948720 }
  0x29   :  { %3241 = dma.done.wait [#allocation9], 30720  }
  0x2a   :  { %3242 = vsyncadd [#allocation9], 4294936576 }
  0x2b   :  { %3243 = dma.done.wait [#allocation12], 24768  }
  0x2c   :  { %3244 = vsyncadd [#allocation12], 4294942528 }
  0x2d   :  { %3245 = dma.done.wait [#allocation15], 96  }
  0x2e   :  { %3246 = vsyncadd [#allocation15], 4294967200 }
  0x2f   :  { %3247 = dma.done.wait [#allocation18], 48  }
  0x30   :  { %3248 = vsyncadd [#allocation18], 4294967248  ;;  %v249_v0 = vld [vmem:[#allocation5 + $0x170] sm:$0xff]  ;;  %v246_v1 = vld [vmem:[#allocation5 + $0x158] sm:$0xff]  ;;  %vm343_vm0 = vcmask 261120   ;;  %s3273_s12 = smov 96  }
  0x31   :  { %279 = vmatpush.msra.mxu1 %v249_v0  ;;  %v248_v2 = vld [vmem:[#allocation5 + $0x168] sm:$0xff]  ;;  %v243_v3 = vld [vmem:[#allocation5 + $0x140] sm:$0xff]  ;;  %v245_v4 = vld [vmem:[#allocation5 + $0x150] sm:$0xff]  ;;  %vm444_vm2 = vcmask 64512   ;;  %s2811_s5 = sshll.u32 %s3729_s13, 4  ;;  %s2812_s5 = int_to_ptr.hbm [resolvable:$true] %s2811_s5 }
  0x32   :  { %259 = vmatpush.msra.mxu0 %v248_v2  ;;  %v242_v5 = vld [vmem:[#allocation5 + $0x138] sm:$0xff]  ;;  %v240_v6 = vld [vmem:[#allocation5 + $0x128] sm:$0xff]  ;;  %v239_v7 = vld [vmem:[#allocation5 + $0x120] sm:$0xff] }
  0x33   :  { %280 = vmatpush.msra.mxu1 %v246_v1  ;;  %v237_v8 = vld [vmem:[#allocation5 + $0x110] sm:$0xff]  ;;  %v236_v9 = vld [vmem:[#allocation5 + $0x108] sm:$0xff]  ;;  %v234_v10 = vld [vmem:[#allocation5 + $0xf8] sm:$0xff]  ;;  %v200_v1 = vlaneseq }
  0x34   :  { %260 = vmatpush.msra.mxu0 %v245_v4  ;;  %v233_v11 = vld [vmem:[#allocation5 + $0xf0] sm:$0xff]  ;;  %v231_v12 = vld [vmem:[#allocation5 + $0xe0] sm:$0xff]  ;;  %v228_v13 = vld [vmem:[#allocation5 + $0xc8] sm:$0xff] }
  0x35   :  { %281 = vmatpush.msra.mxu1 %v243_v3  ;;  %v230_v14 = vld [vmem:[#allocation5 + $0xd8] sm:$0xff]  ;;  %v225_v15 = vld [vmem:[#allocation5 + $0xb0] sm:$0xff]  ;;  %v227_v16 = vld [vmem:[#allocation5 + $0xc0] sm:$0xff]  ;;  %v3413_v2 = vand.u32 127, %v200_v1 }
  0x36   :  { %261 = vmatpush.msra.mxu0 %v242_v5  ;;  %v224_v17 = vld [vmem:[#allocation5 + $0xa8] sm:$0xff]  ;;  %v222_v18 = vld [vmem:[#allocation5 + $0x98] sm:$0xff]  ;;  %v221_v19 = vld [vmem:[#allocation5 + $0x90] sm:$0xff] }
  0x37   :  { %282 = vmatpush.msra.mxu1 %v240_v6  ;;  %v219_v20 = vld [vmem:[#allocation5 + $0x80] sm:$0xff]  ;;  %v218_v21 = vld [vmem:[#allocation5 + $0x78] sm:$0xff]  ;;  %v216_v22 = vld [vmem:[#allocation5 + $0x68] sm:$0xff]  ;;  %vm202_vm1 = vcmp.lt.s32.totalorder %v3413_v2, 2 }
  0x38   :  { %262 = vmatpush.msra.mxu0 %v239_v7  ;;  %v215_v23 = vld [vmem:[#allocation5 + $0x60] sm:$0xff]  ;;  %v213_v24 = vld [vmem:[#allocation5 + $0x50] sm:$0xff]  ;;  %v212_v25 = vld [vmem:[#allocation5 + $0x48] sm:$0xff] }
  0x39   :  { %283 = vmatpush.msra.mxu1 %v237_v8  ;;  %v210_v26 = vld [vmem:[#allocation5 + $0x38] sm:$0xff]  ;;  %v209_v27 = vld [vmem:[#allocation5 + $0x30] sm:$0xff]  ;;  %v207_v28 = vld [vmem:[#allocation5 + $0x20] sm:$0xff] }
  0x3a   :  { %263 = vmatpush.msra.mxu0 %v236_v9  ;;  %v206_v29 = vld [vmem:[#allocation5 + $0x18] sm:$0xff]  ;;  %v204_v30 = vld [vmem:[#allocation5 + $0x8] sm:$0xff]  ;;  %v203_v32 = vld [vmem:[#allocation5] sm:$0xff] }
  0x3b   :  { %284 = vmatpush.msra.mxu1 %v234_v10  ;;  %v3394_v31 = vld [vmem:[#allocation2] sm:$0xff]  ;;  %v247_v34 = vld [vmem:[#allocation5 + $0x160] sm:$0xff]  ;;  %v244_v35 = vld [vmem:[#allocation5 + $0x148] sm:$0xff] }
  0x3c   :  { %264 = vmatpush.msra.mxu0 %v233_v11  ;;  %v250_v33 = vld [vmem:[#allocation5 + $0x178] sm:$0xff]  ;;  %v241_v36 = vld [vmem:[#allocation5 + $0x130] sm:$0xff]  ;;  %v251_v37 = vld [vmem:[#allocation7] sm:$0x7] }
  0x3d   :  { %285 = vmatpush.msra.mxu1 %v231_v12  ;;  %299 = vmatpush.msra.mxu2 %v250_v33  ;;  %v254_v38 = vperm.slane %v251_v37, 1  ;;  %v253_v39 = vperm.slane %v251_v37, 0  ;;  %v238_v44 = vld [vmem:[#allocation5 + $0x118] sm:$0xff]  ;;  %v235_v45 = vld [vmem:[#allocation5 + $0x100] sm:$0xff]  ;;  %v232_v46 = vld [vmem:[#allocation5 + $0xe8] sm:$0xff]  ;;  %v255_v62 = vperm.slane %v251_v37, 2 }
  0x3e   :  { %265 = vmatpush.msra.mxu0 %v230_v14  ;;  %v229_v47 = vld [vmem:[#allocation5 + $0xd0] sm:$0xff]  ;;  %v226_v48 = vld [vmem:[#allocation5 + $0xb8] sm:$0xff]  ;;  %v223_v49 = vld [vmem:[#allocation5 + $0xa0] sm:$0xff] }
  0x3f   :  { %286 = vmatpush.msra.mxu1 %v228_v13  ;;  %300 = vmatpush.msra.mxu2 %v247_v34  ;;  %v220_v50 = vld [vmem:[#allocation5 + $0x88] sm:$0xff]  ;;  %v217_v51 = vld [vmem:[#allocation5 + $0x70] sm:$0xff]  ;;  %v214_v52 = vld [vmem:[#allocation5 + $0x58] sm:$0xff] }
  0x40   :  { %266 = vmatpush.msra.mxu0 %v227_v16  ;;  %v211_v53 = vld [vmem:[#allocation5 + $0x40] sm:$0xff]  ;;  %v208_v54 = vld [vmem:[#allocation5 + $0x28] sm:$0xff]  ;;  %v205_v55 = vld [vmem:[#allocation5 + $0x10] sm:$0xff] }
  0x41   :  { %287 = vmatpush.msra.mxu1 %v225_v15  ;;  %301 = vmatpush.msra.mxu2 %v244_v35 }
  0x42   :  { %267 = vmatpush.msra.mxu0 %v224_v17 }
  0x43   :  { %288 = vmatpush.msra.mxu1 %v222_v18  ;;  %302 = vmatpush.msra.mxu2 %v241_v36 }
  0x44   :  { %268 = vmatpush.msra.mxu0 %v221_v19 }
  0x45   :  { %289 = vmatpush.msra.mxu1 %v219_v20  ;;  %303 = vmatpush.msra.mxu2 %v238_v44 }
  0x46   :  { %269 = vmatpush.msra.mxu0 %v218_v21 }
  0x47   :  { %290 = vmatpush.msra.mxu1 %v216_v22  ;;  %304 = vmatpush.msra.mxu2 %v235_v45 }
  0x48   :  { %270 = vmatpush.msra.mxu0 %v215_v23 }
  0x49   :  { %291 = vmatpush.msra.mxu1 %v213_v24  ;;  %305 = vmatpush.msra.mxu2 %v232_v46 }
  0x4a   :  { %271 = vmatpush.msra.mxu0 %v212_v25 }
  0x4b   :  { %292 = vmatpush.msra.mxu1 %v210_v26  ;;  %306 = vmatpush.msra.mxu2 %v229_v47 }
  0x4c   :  { %272 = vmatpush.msra.mxu0 %v209_v27 }
  0x4d   :  { %293 = vmatpush.msra.mxu1 %v207_v28  ;;  %307 = vmatpush.msra.mxu2 %v226_v48 }
  0x4e   :  { %273 = vmatpush.msra.mxu0 %v206_v29 }
  0x4f   :  { %294 = vmatpush.msra.mxu1 %v204_v30  ;;  %308 = vmatpush.msra.mxu2 %v223_v49 }
  0x50   :  { %295 = vmatmul.f32.vlgmr.msra.gmra.mxu1 %v3394_v31  ;;  %274 = vmatpush.msra.mxu0 %v203_v32 }
  0x51   :  { %275 = vmatmul.f32.vlgmr.msra.gmra.mxu0 %v3394_v31  ;;  %309 = vmatpush.msra.mxu2 %v220_v50 }
  0x53   :  { %310 = vmatpush.msra.mxu2 %v217_v51 }
  0x55   :  { %311 = vmatpush.msra.mxu2 %v214_v52 }
  0x57   :  { %312 = vmatpush.msra.mxu2 %v211_v53 }
  0x59   :  { %313 = vmatpush.msra.mxu2 %v208_v54 }
  0x5b   :  { %314 = vmatpush.msra.mxu2 %v205_v55 }
  0x5c   :  { %315 = vmatmul.f32.vlgmr.msra.gmra.mxu2 %v3394_v31 }
  0xcd   :  { %v296_v40 = vpop.f32.mrf.mxu1 }
  0xce   :  { %v297_v41 = vadd.f32 %v296_v40, %v254_v38  ;;  %v276_v42 = vpop.f32.mrf.mxu0 }
  0xcf   :  { %v277_v43 = vadd.f32 %v276_v42, %v253_v39 }
  0xd0   :  { %327 = vrot.lane.b32.xlu2 %v297_v41, %s3273_s12  ;;  %329 = vrot.lane.b32.xlu1 %v297_v41, %s3258_s28 }
  0xd1   :  { %331 = vrot.lane.b32.xlu0 %v297_v41, %s3269_s9  ;;  %2826 = vmatpush.xpose.msk.msrb.mxu0 %vm343_vm0, %v297_v41 }
  0xd4   :  { %2827 = vmatmul.msk.f32.vlgmr.msrb.gmra.mxu0 %vm343_vm0, %v277_v43 }
  0xd8   :  { %320 = vrot.lane.b32.xlu2 %v277_v43, %s3273_s12  ;;  %322 = vrot.lane.b32.xlu1 %v277_v43, %s3258_s28 }
  0xd9   :  { %324 = vrot.lane.b32.xlu0 %v277_v43, %s3269_s9 }
  0xdf   :  { %v316_v63 = vpop.f32.mrf.mxu2 }
  0xe0   :  { %v317_v0 = vadd.f32 %v316_v63, %v255_v62 }
 0x12a   :  { %v328_v56 = vpop.permute.xlu2 %327 }
 0x12b   :  { %2828 = vmatpush.xpose.msk.msrb.mxu1 %vm343_vm0, %v328_v56 }
 0x132   :  { %v321_v57 = vpop.permute.xlu2 %320 }
 0x133   :  { %2829 = vmatmul.msk.f32.vlgmr.msrb.gmra.mxu1 %vm343_vm0, %v321_v57 }
 0x142   :  { %v330_v58 = vpop.permute.xlu1 %329 }
 0x143   :  { %v332_v59 = vpop.permute.xlu0 %331  ;;  %2830 = vmatpush.xpose.msk.msrb.mxu2 %vm343_vm0, %v330_v58 }
 0x144   :  { %2832 = vmatpush.xpose.msk.msra.mxu3 %vm343_vm0, %v332_v59 }
 0x148   :  { %559 = vmatpush.msrb.mxu3 %v317_v0 }
 0x14a   :  { %v323_v60 = vpop.permute.xlu1 %322 }
 0x14b   :  { %v325_v61 = vpop.permute.xlu0 %324  ;;  %2831 = vmatmul.msk.f32.vlgmr.msrb.gmra.mxu2 %vm343_vm0, %v323_v60 }
 0x14c   :  { %2833 = vmatmul.msk.f32.vlgmr.msra.gmra.mxu3 %vm343_vm0, %v325_v61 }
 0x151   :  { %v365_v12 = vpop.f32.mrf.mxu0 }
 0x152   :  { %v440_v13 = vsel %vm202_vm1, %v365_v12, -1e+30 }
 0x153   :  { %v445_v14 = vsel %vm444_vm2, %v440_v13, -inf }
 0x1b0   :  { %v389_v3 = vpop.f32.mrf.mxu1 }
 0x1b1   :  { %v441_v4 = vsel %vm202_vm1, %v389_v3, -1e+30 }
 0x1b2   :  { %v448_v5 = vsel %vm444_vm2, %v441_v4, -inf }
 0x1b3   :  { %449 = vmax.xlane.f32.xlu1 %v448_v5 }
 0x1ce   :  { %v413_v6 = vpop.f32.mrf.mxu2 }
 0x1cf   :  { %v442_v7 = vsel %vm202_vm1, %v413_v6, -1e+30  ;;  %v437_v8 = vpop.f32.mrf.mxu3 }
 0x1d0   :  { %v443_v9 = vsel %vm202_vm1, %v437_v8, -1e+30  ;;  %v451_v10 = vsel %vm444_vm2, %v442_v7, -inf }
 0x1d1   :  { %452 = vmax.xlane.f32.xlu2 %v451_v10  ;;  %v454_v11 = vsel %vm444_vm2, %v443_v9, -inf }
 0x1d2   :  { %455 = vmax.xlane.f32.xlu0 %v454_v11 }
 0x1d9   :  { %446 = vmax.xlane.f32.xlu2 %v445_v14 }
 0x226   :  { %v450_v15 = vpop.xlane.xlu1 %449 }
 0x227   :  { %v458_v16 = vsub.f32 %v441_v4, %v450_v15 }
 0x229   :  { %v463_v17 = vmul.f32 1.442695, %v458_v16 }
 0x22b   :  { %2911 = vpow2.f32 %v463_v17 }
 0x231   :  { %v2912_v18 = vpop.eup %2911 }
 0x232   :  { %v472_v19 = vsel %vm444_vm2, %v2912_v18, 0.0 }
 0x233   :  { %473 = vadd.xlane.f32.xlu1 %v472_v19 }
 0x244   :  { %v453_v20 = vpop.xlane.xlu2 %452 }
 0x245   :  { %v459_v21 = vsub.f32 %v442_v7, %v453_v20  ;;  %v456_v22 = vpop.xlane.xlu0 %455 }
 0x246   :  { %v460_v23 = vsub.f32 %v443_v9, %v456_v22 }
 0x247   :  { %v465_v24 = vmul.f32 1.442695, %v459_v21 }
 0x248   :  { %v467_v25 = vmul.f32 1.442695, %v460_v23 }
 0x249   :  { %2913 = vpow2.f32 %v465_v24 }
 0x24a   :  { %2915 = vpow2.f32 %v467_v25 }
 0x24c   :  { %334 = vrot.lane.b32.xlu1 %v317_v0, %s3273_s12  ;;  %v447_v30 = vpop.xlane.xlu2 %446 }
 0x24d   :  { %v457_v32 = vsub.f32 %v440_v13, %v447_v30  ;;  %v662_v30 = vld [vmem:[#allocation8 + $0x60] sm:$0xff] }
 0x24f   :  { %v3430_v26 = vpop.eup %2913  ;;  %v461_v33 = vmul.f32 1.442695, %v457_v32  ;;  %v661_v32 = vld [vmem:[#allocation8 + $0x58] sm:$0xff] }
 0x250   :  { %v3432_v27 = vpop.eup %2915  ;;  %v475_v28 = vsel %vm444_vm2, %v3430_v26, 0.0 }
 0x251   :  { %v478_v29 = vsel %vm444_vm2, %v3432_v27, 0.0  ;;  %476 = vadd.xlane.f32.xlu2 %v475_v28  ;;  %2917 = vpow2.f32 %v461_v33  ;;  %v664_v28 = vld [vmem:[#allocation8 + $0x70] sm:$0xff] }
 0x252   :  { %479 = vadd.xlane.f32.xlu0 %v478_v29  ;;  %v663_v29 = vld [vmem:[#allocation8 + $0x68] sm:$0xff]  ;;  %v660_v33 = vld [vmem:[#allocation8 + $0x50] sm:$0xff] }
 0x257   :  { %v3440_v34 = vpop.eup %2917 }
 0x258   :  { %v469_v35 = vsel %vm444_vm2, %v3440_v34, 0.0 }
 0x266   :  { %340 = vrot.lane.b32.xlu0 %v317_v0, %s3269_s9 }
 0x269   :  { %337 = vrot.lane.b32.xlu2 %v317_v0, %s3258_s28 }
 0x290   :  { %470 = vadd.xlane.f32.xlu0 %v469_v35  ;;  %v658_v35 = vld [vmem:[#allocation8 + $0x40] sm:$0xff] }
 0x2a6   :  { %v474_v36 = vpop.xlane.xlu1 %473 }
 0x2a7   :  { %2919 = vrcp.f32 %v474_v36  ;;  %v507_v42 = vand.u32 2147483648, %v474_v36  ;;  %vm501_vm4 = vweird.f32 %v474_v36  ;;  %v505_v43 = vand.u32 2147483647, %v474_v36 }
 0x2a9   :  { %v508_v45 = vor.u32 1.1754944e-38, %v507_v42  ;;  %vm506_vm6 = vcmp.eq.f32.partialorder %v505_v43, 8.507059e+37  ;;  %v651_v42 = vld [vmem:[#allocation8 + $0x8] sm:$0xff]  ;;  %v650_v43 = vld [vmem:[#allocation8] sm:$0xff] }
 0x2ad   :  { %v2920_v37 = vpop.eup %2919 }
 0x2ae   :  { %v497_v38 = vmul.f32 %v2920_v37, %v474_v36  ;;  %vm502_vm3 = vweird.f32 %v2920_v37  ;;  %v657_v36 = vld [vmem:[#allocation8 + $0x38] sm:$0xff] }
 0x2af   :  { %vm503_vm5 = vmor %vm501_vm4, %vm502_vm3 }
 0x2b0   :  { %v498_v39 = vsub.f32 1.0, %v497_v38  ;;  %v655_v38 = vld [vmem:[#allocation8 + $0x28] sm:$0xff] }
 0x2b2   :  { %v499_v40 = vmul.f32 %v2920_v37, %v498_v39  ;;  %v654_v39 = vld [vmem:[#allocation8 + $0x20] sm:$0xff] }
 0x2b4   :  { %v500_v41 = vadd.f32 %v2920_v37, %v499_v40  ;;  %v653_v40 = vld [vmem:[#allocation8 + $0x18] sm:$0xff] }
 0x2b6   :  { %v504_v44 = vsel %vm503_vm5, %v2920_v37, %v500_v41  ;;  %v656_v37 = vld [vmem:[#allocation8 + $0x30] sm:$0xff] }
 0x2b7   :  { %v509_v46 = vsel %vm506_vm6, %v508_v45, %v504_v44  ;;  %v652_v41 = vld [vmem:[#allocation8 + $0x10] sm:$0xff]  ;;  %vm646_vm6 = vcmask 523264  }
 0x2b8   :  { %v510_v48 = vmul.f32 %v2912_v18, %v509_v46 }
 0x2be   :  { %v335_v47 = vpop.permute.xlu1 %334 }
 0x2bf   :  { %582 = vmatpush.msra.mxu0 %v335_v47 }
 0x2c0   :  { %2835 = vmatmul.msk.f32.vlgmr.msra.gmra.mxu0 %vm444_vm2, %v510_v48 }
 0x2c4   :  { %v477_v49 = vpop.xlane.xlu2 %476 }
 0x2c5   :  { %v480_v50 = vpop.xlane.xlu0 %479  ;;  %2921 = vrcp.f32 %v477_v49  ;;  %v522_v58 = vand.u32 2147483648, %v477_v49  ;;  %v520_v61 = vand.u32 2147483647, %v477_v49  ;;  %vm516_vm9 = vweird.f32 %v477_v49 }
 0x2c6   :  { %2923 = vrcp.f32 %v480_v50  ;;  %v537_v59 = vand.u32 2147483648, %v480_v50  ;;  %v535_v63 = vand.u32 2147483647, %v480_v50  ;;  %vm531_vm10 = vweird.f32 %v480_v50 }
 0x2c7   :  { %v523_v3 = vor.u32 1.1754944e-38, %v522_v58  ;;  %vm521_vm13 = vcmp.eq.f32.partialorder %v520_v61, 8.507059e+37  ;;  %v792_v58 = vld [vmem:[#allocation10 + $0x1f0] sm:$0xff]  ;;  %v787_v61 = vld [vmem:[#allocation10 + $0x1c8] sm:$0xff] }
 0x2c8   :  { %v538_v4 = vor.u32 1.1754944e-38, %v537_v59  ;;  %vm536_vm14 = vcmp.eq.f32.partialorder %v535_v63, 8.507059e+37  ;;  %v793_v59 = vld [vmem:[#allocation10 + $0x1f8] sm:$0xff]  ;;  %v3274_v63 = vmov 128.0  }
 0x2cb   :  { %v2922_v51 = vpop.eup %2921 }
 0x2cc   :  { %v2924_v52 = vpop.eup %2923  ;;  %v512_v53 = vmul.f32 %v2922_v51, %v477_v49  ;;  %v338_v54 = vpop.permute.xlu2 %337  ;;  %vm517_vm7 = vweird.f32 %v2922_v51 }
 0x2cd   :  { %v527_v55 = vmul.f32 %v2924_v52, %v480_v50  ;;  %605 = vmatpush.msra.mxu1 %v338_v54  ;;  %vm532_vm8 = vweird.f32 %v2924_v52  ;;  %vm518_vm11 = vmor %vm516_vm9, %vm517_vm7  ;;  %vm648_vm7 = vcmask 785408  }
 0x2ce   :  { %v513_v56 = vsub.f32 1.0, %v512_v53  ;;  %vm533_vm12 = vmor %vm531_vm10, %vm532_vm8 }
 0x2cf   :  { %v528_v57 = vsub.f32 1.0, %v527_v55 }
 0x2d0   :  { %v514_v60 = vmul.f32 %v2922_v51, %v513_v56  ;;  %v790_v56 = vld [vmem:[#allocation10 + $0x1e0] sm:$0xff] }
 0x2d1   :  { %v529_v62 = vmul.f32 %v2924_v52, %v528_v57  ;;  %v791_v57 = vld [vmem:[#allocation10 + $0x1e8] sm:$0xff]  ;;  %804 = vmatpush.msrb.mxu0 %v790_v56  ;;  %v734_v56 = vld [vmem:[#allocation10 + $0x20] sm:$0xff] }
 0x2d2   :  { %v515_v0 = vadd.f32 %v2922_v51, %v514_v60  ;;  %824 = vmatpush.msrb.mxu1 %v791_v57  ;;  %v786_v60 = vld [vmem:[#allocation10 + $0x1c0] sm:$0xff]  ;;  %v735_v57 = vld [vmem:[#allocation10 + $0x28] sm:$0xff] }
 0x2d3   :  { %v530_v1 = vadd.f32 %v2924_v52, %v529_v62  ;;  %805 = vmatpush.msrb.mxu0 %v786_v60  ;;  %v789_v62 = vld [vmem:[#allocation10 + $0x1d8] sm:$0xff] }
 0x2d4   :  { %v519_v5 = vsel %vm518_vm11, %v2922_v51, %v515_v0  ;;  %v2893_v51 = vld [vmem:[%s3720_s4] ss:$0 sm:$0xff]  ;;  %825 = vmatpush.msrb.mxu1 %v787_v61  ;;  %v782_v0 = vld [vmem:[#allocation10 + $0x1a0] sm:$0xff]  ;;  %v737_v60 = vld [vmem:[#allocation10 + $0x38] sm:$0xff] }
 0x2d5   :  { %v534_v6 = vsel %vm533_vm12, %v2924_v52, %v530_v1  ;;  %v524_v7 = vsel %vm521_vm13, %v523_v3, %v519_v5  ;;  %v783_v1 = vld [vmem:[#allocation10 + $0x1a8] sm:$0xff]  ;;  %v784_v3 = vld [vmem:[#allocation10 + $0x1b0] sm:$0xff]  ;;  %806 = vmatpush.msrb.mxu0 %v782_v0  ;;  %v778_v5 = vld [vmem:[#allocation10 + $0x180] sm:$0xff] }
 0x2d6   :  { %v539_v8 = vsel %vm536_vm14, %v538_v4, %v534_v6  ;;  %v525_v9 = vmul.f32 %v3430_v26, %v524_v7  ;;  %826 = vmatpush.msrb.mxu1 %v783_v1  ;;  %v785_v4 = vld [vmem:[#allocation10 + $0x1b8] sm:$0xff]  ;;  %v779_v6 = vld [vmem:[#allocation10 + $0x188] sm:$0xff]  ;;  %v780_v7 = vld [vmem:[#allocation10 + $0x190] sm:$0xff] }
 0x2d7   :  { %v540_v10 = vmul.f32 %v3432_v27, %v539_v8  ;;  %v665_v27 = vld [vmem:[#allocation8 + $0x78] sm:$0xff]  ;;  %807 = vmatpush.msrb.mxu0 %v778_v5  ;;  %v730_v61 = vld [vmem:[#allocation10] sm:$0xff] }
 0x2d8   :  { %v341_v11 = vpop.permute.xlu0 %340  ;;  %2836 = vmatmul.msk.f32.vlgmr.msra.gmra.mxu1 %vm444_vm2, %v525_v9  ;;  %670 = vmatpush.msra.mxu3 %v665_v27  ;;  %v781_v8 = vld [vmem:[#allocation10 + $0x198] sm:$0xff]  ;;  %v774_v9 = vld [vmem:[#allocation10 + $0x160] sm:$0xff] }
 0x2d9   :  { %628 = vmatpush.msra.mxu2 %v341_v11  ;;  %827 = vmatpush.msrb.mxu1 %v779_v6  ;;  %v776_v11 = vld [vmem:[#allocation10 + $0x170] sm:$0xff]  ;;  %v758_v27 = vld [vmem:[#allocation10 + $0xe0] sm:$0xff] }
 0x2da   :  { %2837 = vmatmul.msk.f32.vlgmr.msra.gmra.mxu2 %vm444_vm2, %v540_v10  ;;  %671 = vmatpush.msra.mxu3 %v664_v28  ;;  %v775_v10 = vld [vmem:[#allocation10 + $0x168] sm:$0xff]  ;;  %v902_v6 = vld [vmem:[#allocation13 + $0x70] sm:$0xff] }
 0x2db   :  { %844 = vmatpush.msrb.mxu2 %v792_v58  ;;  %808 = vmatpush.msrb.mxu0 %v774_v9  ;;  %v759_v28 = vld [vmem:[#allocation10 + $0xe8] sm:$0xff]  ;;  %v736_v58 = vld [vmem:[#allocation10 + $0x30] sm:$0xff]  ;;  %v918_v9 = vld [vmem:[#allocation13 + $0xf0] sm:$0xff] }
 0x2dc   :  { %672 = vmatpush.msra.mxu3 %v663_v29  ;;  %828 = vmatpush.msrb.mxu1 %v775_v10  ;;  %v760_v29 = vld [vmem:[#allocation10 + $0xf0] sm:$0xff]  ;;  %v919_v5 = vld [vmem:[#allocation13 + $0xf8] sm:$0xff] }
 0x2dd   :  { %v901_v10 = vld [vmem:[#allocation13 + $0x68] sm:$0xff] }
 0x2de   :  { %673 = vmatpush.msra.mxu3 %v662_v30 }
 0x2e0   :  { %674 = vmatpush.msra.mxu3 %v661_v32  ;;  %v761_v32 = vld [vmem:[#allocation10 + $0xf8] sm:$0xff] }
 0x2e2   :  { %675 = vmatpush.msra.mxu3 %v660_v33  ;;  %v754_v33 = vld [vmem:[#allocation10 + $0xc0] sm:$0xff] }
 0x303   :  { %v471_v12 = vpop.xlane.xlu0 %470 }
 0x304   :  { %2925 = vrcp.f32 %v471_v12  ;;  %v492_v16 = vand.u32 2147483648, %v471_v12  ;;  %v490_v18 = vand.u32 2147483647, %v471_v12  ;;  %vm486_vm3 = vweird.f32 %v471_v12 }
 0x305   :  { %2927 = vrcp.f32 %v3274_v63  ;;  %v733_v63 = vld [vmem:[#allocation10 + $0x18] sm:$0xff] }
 0x306   :  { %v493_v20 = vor.u32 1.1754944e-38, %v492_v16  ;;  %vm491_vm5 = vcmp.eq.f32.partialorder %v490_v18, 8.507059e+37  ;;  %v772_v16 = vld [vmem:[#allocation10 + $0x150] sm:$0xff]  ;;  %v766_v18 = vld [vmem:[#allocation10 + $0x120] sm:$0xff] }
 0x30a   :  { %v2926_v13 = vpop.eup %2925 }
 0x30b   :  { %v482_v14 = vmul.f32 %v2926_v13, %v471_v12  ;;  %vm487_vm15 = vweird.f32 %v2926_v13  ;;  %v777_v12 = vld [vmem:[#allocation10 + $0x178] sm:$0xff] }
 0x30c   :  { %vm488_vm4 = vmor %vm486_vm3, %vm487_vm15 }
 0x30d   :  { %v483_v15 = vsub.f32 1.0, %v482_v14  ;;  %v770_v14 = vld [vmem:[#allocation10 + $0x140] sm:$0xff] }
 0x30e   :  { %809 = vmatpush.msrb.mxu0 %v770_v14  ;;  %v900_v14 = vld [vmem:[#allocation13 + $0x60] sm:$0xff] }
 0x30f   :  { %v484_v17 = vmul.f32 %v2926_v13, %v483_v15  ;;  %v771_v15 = vld [vmem:[#allocation10 + $0x148] sm:$0xff] }
 0x310   :  { %829 = vmatpush.msrb.mxu1 %v771_v15  ;;  %810 = vmatpush.msrb.mxu0 %v766_v18  ;;  %v951_v15 = vld [vmem:[#allocation13 + $0x1f8] sm:$0xff]  ;;  %v950_v18 = vld [vmem:[#allocation13 + $0x1f0] sm:$0xff] }
 0x311   :  { %v485_v19 = vadd.f32 %v2926_v13, %v484_v17  ;;  %v773_v17 = vld [vmem:[#allocation10 + $0x158] sm:$0xff] }
 0x313   :  { %v489_v21 = vsel %vm488_vm4, %v2926_v13, %v485_v19  ;;  %v3466_v13 = vpop.eup %2927  ;;  %v767_v19 = vld [vmem:[#allocation10 + $0x128] sm:$0xff] }
 0x314   :  { %v494_v22 = vsel %vm491_vm5, %v493_v20, %v489_v21  ;;  %v768_v20 = vld [vmem:[#allocation10 + $0x130] sm:$0xff]  ;;  %v696_v21 = vmul.f32 128.0, %v3466_v13  ;;  %830 = vmatpush.msrb.mxu1 %v767_v19  ;;  %vm700_vm8 = vweird.f32 %v3466_v13 }
 0x315   :  { %v495_v23 = vmul.f32 %v3440_v34, %v494_v22  ;;  %v659_v34 = vld [vmem:[#allocation8 + $0x48] sm:$0xff]  ;;  %v769_v22 = vld [vmem:[#allocation10 + $0x138] sm:$0xff] }
 0x316   :  { %676 = vmatpush.msra.mxu3 %v659_v34  ;;  %v697_v30 = vsub.f32 1.0, %v696_v21  ;;  %v755_v34 = vld [vmem:[#allocation10 + $0xc8] sm:$0xff]  ;;  %v949_v21 = vld [vmem:[#allocation13 + $0x1e8] sm:$0xff] }
 0x317   :  { %2834 = vmatmul.msk.f32.vlgmr.msrb.gmra.mxu3 %vm444_vm2, %v495_v23  ;;  %v762_v23 = vld [vmem:[#allocation10 + $0x100] sm:$0xff] }
 0x318   :  { %677 = vmatpush.msra.mxu3 %v658_v35  ;;  %811 = vmatpush.msrb.mxu0 %v762_v23  ;;  %v756_v35 = vld [vmem:[#allocation10 + $0xd0] sm:$0xff]  ;;  %v915_v23 = vld [vmem:[#allocation13 + $0xd8] sm:$0xff] }
 0x31a   :  { %678 = vmatpush.msra.mxu3 %v657_v36  ;;  %812 = vmatpush.msrb.mxu0 %v758_v27  ;;  %v757_v36 = vld [vmem:[#allocation10 + $0xd8] sm:$0xff] }
 0x31b   :  { %v914_v27 = vld [vmem:[#allocation13 + $0xd0] sm:$0xff] }
 0x31c   :  { %679 = vmatpush.msra.mxu3 %v656_v37  ;;  %813 = vmatpush.msrb.mxu0 %v754_v33  ;;  %v750_v37 = vld [vmem:[#allocation10 + $0xa0] sm:$0xff] }
 0x31d   :  { %v930_v33 = vld [vmem:[#allocation13 + $0x150] sm:$0xff] }
 0x31e   :  { %680 = vmatpush.msra.mxu3 %v655_v38  ;;  %v751_v38 = vld [vmem:[#allocation10 + $0xa8] sm:$0xff]  ;;  %814 = vmatpush.msrb.mxu0 %v750_v37 }
 0x320   :  { %681 = vmatpush.msra.mxu3 %v654_v39  ;;  %v752_v39 = vld [vmem:[#allocation10 + $0xb0] sm:$0xff] }
 0x322   :  { %682 = vmatpush.msra.mxu3 %v653_v40  ;;  %v698_v40 = vmul.f32 %v3466_v13, %v697_v30  ;;  %v897_v30 = vld [vmem:[#allocation13 + $0x48] sm:$0xff] }
 0x324   :  { %683 = vmatpush.msra.mxu3 %v652_v41  ;;  %v753_v41 = vld [vmem:[#allocation10 + $0xb8] sm:$0xff] }
 0x326   :  { %684 = vmatpush.msra.mxu3 %v651_v42  ;;  %v746_v42 = vld [vmem:[#allocation10 + $0x80] sm:$0xff] }
 0x327   :  { %815 = vmatpush.msrb.mxu0 %v746_v42  ;;  %v911_v42 = vld [vmem:[#allocation13 + $0xb8] sm:$0xff] }
 0x328   :  { %685 = vmatpush.msra.mxu3 %v650_v43  ;;  %v747_v43 = vld [vmem:[#allocation10 + $0x88] sm:$0xff] }
 0x32a   :  { %864 = vmatpush.msrb.mxu3 %v793_v59 }
 0x32c   :  { %865 = vmatpush.msrb.mxu3 %v789_v62  ;;  %v732_v62 = vld [vmem:[#allocation10 + $0x10] sm:$0xff] }
 0x32e   :  { %866 = vmatpush.msrb.mxu3 %v785_v4  ;;  %v903_v4 = vld [vmem:[#allocation13 + $0x78] sm:$0xff] }
 0x330   :  { %867 = vmatpush.msrb.mxu3 %v781_v8 }
 0x332   :  { %868 = vmatpush.msrb.mxu3 %v777_v12  ;;  %v935_v12 = vld [vmem:[#allocation13 + $0x178] sm:$0xff] }
 0x334   :  { %869 = vmatpush.msrb.mxu3 %v773_v17  ;;  %v934_v17 = vld [vmem:[#allocation13 + $0x170] sm:$0xff] }
 0x336   :  { %870 = vmatpush.msrb.mxu3 %v769_v22  ;;  %v899_v22 = vld [vmem:[#allocation13 + $0x58] sm:$0xff] }
 0x33d   :  { %v584_v24 = vpop.f32.mrf.mxu0 }
 0x33e   :  { %634 = vrot.lane.b32.xlu1 %v584_v24, %s3269_s9  ;;  %v763_v24 = vld [vmem:[#allocation10 + $0x108] sm:$0xff] }
 0x33f   :  { %831 = vmatpush.msrb.mxu1 %v763_v24  ;;  %v932_v24 = vld [vmem:[#allocation13 + $0x160] sm:$0xff] }
 0x341   :  { %832 = vmatpush.msrb.mxu1 %v759_v28  ;;  %v931_v28 = vld [vmem:[#allocation13 + $0x158] sm:$0xff] }
 0x343   :  { %833 = vmatpush.msrb.mxu1 %v755_v34  ;;  %v946_v34 = vld [vmem:[#allocation13 + $0x1d0] sm:$0xff] }
 0x345   :  { %834 = vmatpush.msrb.mxu1 %v751_v38  ;;  %v929_v38 = vld [vmem:[#allocation13 + $0x148] sm:$0xff] }
 0x347   :  { %835 = vmatpush.msrb.mxu1 %v747_v43  ;;  %v928_v43 = vld [vmem:[#allocation13 + $0x140] sm:$0xff] }
 0x355   :  { %v607_v25 = vpop.f32.mrf.mxu1 }
 0x356   :  { %638 = vrot.lane.b32.xlu2 %v607_v25, %s3258_s28  ;;  %v764_v25 = vld [vmem:[#allocation10 + $0x110] sm:$0xff] }
 0x35d   :  { %v630_v26 = vpop.f32.mrf.mxu2 }
 0x35e   :  { %642 = vrot.lane.b32.xlu1 %v630_v26, %s3273_s12  ;;  %v765_v26 = vld [vmem:[#allocation10 + $0x118] sm:$0xff] }
 0x35f   :  { %871 = vmatpush.msrb.mxu3 %v765_v26  ;;  %v898_v26 = vld [vmem:[#allocation13 + $0x50] sm:$0xff] }
 0x361   :  { %872 = vmatpush.msrb.mxu3 %v761_v32  ;;  %v913_v32 = vld [vmem:[#allocation13 + $0xc8] sm:$0xff] }
 0x363   :  { %873 = vmatpush.msrb.mxu3 %v757_v36  ;;  %v912_v36 = vld [vmem:[#allocation13 + $0xc0] sm:$0xff] }
 0x365   :  { %874 = vmatpush.msrb.mxu3 %v753_v41  ;;  %v895_v41 = vld [vmem:[#allocation13 + $0x38] sm:$0xff] }
 0x39a   :  { %v561_v45 = vpop.f32.mrf.mxu3 }
 0x3b0   :  { %v635_v44 = vpop.permute.xlu1 %634  ;;  %v639_v47 = vpop.permute.xlu2 %638 }
 0x3b1   :  { %v645_v46 = vsel %vm343_vm0, %v561_v45, %v635_v44  ;;  %v748_v44 = vld [vmem:[#allocation10 + $0x90] sm:$0xff]  ;;  %v749_v45 = vld [vmem:[#allocation10 + $0x98] sm:$0xff] }
 0x3b2   :  { %v647_v48 = vsel %vm646_vm6, %v645_v46, %v639_v47  ;;  %875 = vmatpush.msrb.mxu3 %v749_v45  ;;  %v742_v46 = vld [vmem:[#allocation10 + $0x60] sm:$0xff]  ;;  %v743_v47 = vld [vmem:[#allocation10 + $0x68] sm:$0xff] }
 0x3b3   :  { %816 = vmatpush.msrb.mxu0 %v742_v46  ;;  %836 = vmatpush.msrb.mxu1 %v743_v47  ;;  %v894_v46 = vld [vmem:[#allocation13 + $0x30] sm:$0xff] }
 0x3b4   :  { %v910_v47 = vld [vmem:[#allocation13 + $0xb0] sm:$0xff] }
 0x3d0   :  { %v643_v49 = vpop.permute.xlu1 %642 }
 0x3d1   :  { %v649_v50 = vsel %vm648_vm7, %v647_v48, %v643_v49  ;;  %v744_v48 = vld [vmem:[#allocation10 + $0x70] sm:$0xff]  ;;  %v699_v49 = vadd.f32 %v3466_v13, %v698_v40 }
 0x3d2   :  { %686 = vmatmul.f32.vlgmr.msra.gmra.mxu3 %v649_v50  ;;  %v745_v50 = vld [vmem:[#allocation10 + $0x78] sm:$0xff] }
 0x3d3   :  { %876 = vmatpush.msrb.mxu3 %v745_v50  ;;  %v3473_v59 = vsel %vm700_vm8, %v3466_v13, %v699_v49  ;;  %v943_v49 = vld [vmem:[#allocation13 + $0x1b8] sm:$0xff] }
 0x455   :  { %v687_v52 = vpop.f32.mrf.mxu3 }
 0x456   :  { %v688_v53 = vadd.f32 %v2893_v51, %v687_v52  ;;  %v738_v51 = vld [vmem:[#allocation10 + $0x40] sm:$0xff]  ;;  %v739_v52 = vld [vmem:[#allocation10 + $0x48] sm:$0xff] }
 0x457   :  { %817 = vmatpush.msrb.mxu0 %v738_v51  ;;  %837 = vmatpush.msrb.mxu1 %v739_v52  ;;  %v893_v51 = vld [vmem:[#allocation13 + $0x28] sm:$0xff] }
 0x458   :  { %v3461_v54 = vadd.f32 %v688_v53, %v3394_v31  ;;  %v788_v31 = vld [vmem:[#allocation10 + $0x1d0] sm:$0xff] }
 0x459   :  { %845 = vmatpush.msrb.mxu2 %v788_v31  ;;  %v740_v53 = vld [vmem:[#allocation10 + $0x50] sm:$0xff]  ;;  %818 = vmatpush.msrb.mxu0 %v734_v56  ;;  %v731_v31 = vld [vmem:[#allocation10 + $0x8] sm:$0xff] }
 0x45a   :  { %693 = vadd.xlane.f32.xlu2 %v3461_v54  ;;  %v703_v55 = vmul.f32 %v3461_v54, %v3461_v54  ;;  %838 = vmatpush.msrb.mxu1 %v735_v57  ;;  %v909_v52 = vld [vmem:[#allocation13 + $0xa8] sm:$0xff]  ;;  %v892_v57 = vld [vmem:[#allocation13 + $0x20] sm:$0xff] }
 0x45b   :  { %846 = vmatpush.msrb.mxu2 %v784_v3  ;;  %819 = vmatpush.msrb.mxu0 %v730_v61  ;;  %v891_v61 = vld [vmem:[#allocation13 + $0x18] sm:$0xff] }
 0x45c   :  { %704 = vadd.xlane.f32.xlu1 %v703_v55  ;;  %v741_v55 = vld [vmem:[#allocation10 + $0x58] sm:$0xff]  ;;  %839 = vmatpush.msrb.mxu1 %v731_v31  ;;  %v907_v31 = vld [vmem:[#allocation13 + $0x98] sm:$0xff] }
 0x45d   :  { %847 = vmatpush.msrb.mxu2 %v780_v7  ;;  %877 = vmatpush.msrb.mxu3 %v741_v55  ;;  %v942_v55 = vld [vmem:[#allocation13 + $0x1b0] sm:$0xff] }
 0x45e   :  { %956 = vmatpush.msra.mxu0 %v903_v4  ;;  %976 = vmatpush.msra.mxu1 %v919_v5  ;;  %v2895_v4 = vld [vmem:[%s3726_s10] ss:$0 sm:$0xff] }
 0x45f   :  { %848 = vmatpush.msrb.mxu2 %v776_v11  ;;  %878 = vmatpush.msrb.mxu3 %v737_v60  ;;  %v917_v11 = vld [vmem:[#allocation13 + $0xe8] sm:$0xff] }
 0x460   :  { %957 = vmatpush.msra.mxu0 %v902_v6  ;;  %977 = vmatpush.msra.mxu1 %v918_v9  ;;  %v889_v9 = vld [vmem:[#allocation13 + $0x8] sm:$0xff] }
 0x461   :  { %849 = vmatpush.msrb.mxu2 %v772_v16  ;;  %879 = vmatpush.msrb.mxu3 %v733_v63  ;;  %v916_v16 = vld [vmem:[#allocation13 + $0xe0] sm:$0xff] }
 0x462   :  { %958 = vmatpush.msra.mxu0 %v901_v10  ;;  %978 = vmatpush.msra.mxu1 %v917_v11  ;;  %v2894_v63 = vld [vmem:[#allocation14] ss:$0 sm:$0xff]  ;;  %v905_v10 = vld [vmem:[#allocation13 + $0x88] sm:$0xff] }
 0x463   :  { %850 = vmatpush.msrb.mxu2 %v768_v20  ;;  %1016 = vmatpush.msra.mxu3 %v951_v15  ;;  %v933_v20 = vld [vmem:[#allocation13 + $0x168] sm:$0xff]  ;;  %v924_v11 = vld [vmem:[#allocation13 + $0x120] sm:$0xff]  ;;  %v923_v15 = vld [vmem:[#allocation13 + $0x118] sm:$0xff] }
 0x464   :  { %959 = vmatpush.msra.mxu0 %v900_v14  ;;  %979 = vmatpush.msra.mxu1 %v916_v16  ;;  %v904_v14 = vld [vmem:[#allocation13 + $0x80] sm:$0xff]  ;;  %v939_v16 = vld [vmem:[#allocation13 + $0x198] sm:$0xff] }
 0x465   :  { %851 = vmatpush.msrb.mxu2 %v764_v25  ;;  %1017 = vmatpush.msra.mxu3 %v950_v18  ;;  %v948_v25 = vld [vmem:[#allocation13 + $0x1e0] sm:$0xff]  ;;  %v938_v18 = vld [vmem:[#allocation13 + $0x190] sm:$0xff] }
 0x466   :  { %960 = vmatpush.msra.mxu0 %v899_v22  ;;  %980 = vmatpush.msra.mxu1 %v915_v23  ;;  %v936_v22 = vld [vmem:[#allocation13 + $0x180] sm:$0xff]  ;;  %v794_v23 = vld [vmem:[#allocation11] sm:$0xf] }
 0x467   :  { %852 = vmatpush.msrb.mxu2 %v760_v29  ;;  %1018 = vmatpush.msra.mxu3 %v949_v21  ;;  %v947_v29 = vld [vmem:[#allocation13 + $0x1d8] sm:$0xff]  ;;  %v920_v21 = vld [vmem:[#allocation13 + $0x100] sm:$0xff] }
 0x468   :  { %961 = vmatpush.msra.mxu0 %v898_v26  ;;  %981 = vmatpush.msra.mxu1 %v914_v27 }
 0x469   :  { %853 = vmatpush.msrb.mxu2 %v756_v35  ;;  %1019 = vmatpush.msra.mxu3 %v948_v25  ;;  %v896_v35 = vld [vmem:[#allocation13 + $0x40] sm:$0xff]  ;;  %v797_v25 = vperm.slane %v794_v23, 1 }
 0x46a   :  { %962 = vmatpush.msra.mxu0 %v897_v30  ;;  %982 = vmatpush.msra.mxu1 %v913_v32 }
 0x46b   :  { %854 = vmatpush.msrb.mxu2 %v752_v39  ;;  %1020 = vmatpush.msra.mxu3 %v947_v29  ;;  %v945_v39 = vld [vmem:[#allocation13 + $0x1c8] sm:$0xff] }
 0x46c   :  { %963 = vmatpush.msra.mxu0 %v896_v35  ;;  %983 = vmatpush.msra.mxu1 %v912_v36 }
 0x46d   :  { %855 = vmatpush.msrb.mxu2 %v748_v44  ;;  %1021 = vmatpush.msra.mxu3 %v946_v34  ;;  %v944_v44 = vld [vmem:[#allocation13 + $0x1c0] sm:$0xff]  ;;  %v799_v34 = vperm.slane %v794_v23, 3 }
 0x46e   :  { %964 = vmatpush.msra.mxu0 %v895_v41  ;;  %984 = vmatpush.msra.mxu1 %v911_v42  ;;  %v2896_v41 = vld [vmem:[%s3724_s8] ss:$0 sm:$0xff] }
 0x46f   :  { %856 = vmatpush.msrb.mxu2 %v744_v48  ;;  %1022 = vmatpush.msra.mxu3 %v945_v39  ;;  %v927_v48 = vld [vmem:[#allocation13 + $0x138] sm:$0xff] }
 0x470   :  { %965 = vmatpush.msra.mxu0 %v894_v46  ;;  %985 = vmatpush.msra.mxu1 %v910_v47 }
 0x471   :  { %857 = vmatpush.msrb.mxu2 %v740_v53  ;;  %1023 = vmatpush.msra.mxu3 %v944_v44  ;;  %v926_v53 = vld [vmem:[#allocation13 + $0x130] sm:$0xff] }
 0x472   :  { %966 = vmatpush.msra.mxu0 %v893_v51  ;;  %986 = vmatpush.msra.mxu1 %v909_v52  ;;  %v1115_v52 = vld [vmem:[#allocation5 + $0x2e8] sm:$0xff] }
 0x473   :  { %858 = vmatpush.msrb.mxu2 %v736_v58  ;;  %v908_v58 = vld [vmem:[#allocation13 + $0xa0] sm:$0xff]  ;;  %1024 = vmatpush.msra.mxu3 %v943_v49 }
 0x474   :  { %967 = vmatpush.msra.mxu0 %v892_v57  ;;  %987 = vmatpush.msra.mxu1 %v908_v58  ;;  %v1113_v57 = vld [vmem:[#allocation5 + $0x2d8] sm:$0xff]  ;;  %v1114_v58 = vld [vmem:[#allocation5 + $0x2e0] sm:$0xff] }
 0x475   :  { %859 = vmatpush.msrb.mxu2 %v732_v62  ;;  %1025 = vmatpush.msra.mxu3 %v942_v55  ;;  %v1117_v55 = vld [vmem:[#allocation5 + $0x2f8] sm:$0xff] }
 0x476   :  { %968 = vmatpush.msra.mxu0 %v891_v61  ;;  %988 = vmatpush.msra.mxu1 %v907_v31  ;;  %v1110_v61 = vld [vmem:[#allocation5 + $0x2c0] sm:$0xff]  ;;  %v1111_v31 = vld [vmem:[#allocation5 + $0x2c8] sm:$0xff] }
 0x477   :  { %996 = vmatpush.msra.mxu2 %v935_v12  ;;  %v940_v12 = vld [vmem:[#allocation13 + $0x1a0] sm:$0xff] }
 0x479   :  { %997 = vmatpush.msra.mxu2 %v934_v17  ;;  %v922_v17 = vld [vmem:[#allocation13 + $0x110] sm:$0xff] }
 0x47b   :  { %998 = vmatpush.msra.mxu2 %v933_v20  ;;  %v937_v20 = vld [vmem:[#allocation13 + $0x188] sm:$0xff] }
 0x47d   :  { %999 = vmatpush.msra.mxu2 %v932_v24  ;;  %v796_v24 = vperm.slane %v794_v23, 0 }
 0x47f   :  { %1000 = vmatpush.msra.mxu2 %v931_v28 }
 0x481   :  { %1001 = vmatpush.msra.mxu2 %v930_v33  ;;  %v798_v33 = vperm.slane %v794_v23, 2  ;;  %v1083_v23 = vld [vmem:[#allocation5 + $0x1e8] sm:$0xff] }
 0x483   :  { %1002 = vmatpush.msra.mxu2 %v929_v38 }
 0x485   :  { %1003 = vmatpush.msra.mxu2 %v928_v43 }
 0x487   :  { %1004 = vmatpush.msra.mxu2 %v927_v48 }
 0x489   :  { %1005 = vmatpush.msra.mxu2 %v926_v53  ;;  %v1116_v53 = vld [vmem:[#allocation5 + $0x2f0] sm:$0xff] }
 0x4cd   :  { %v694_v0 = vpop.xlane.xlu2 %693 }
 0x4ce   :  { %v3476_v1 = vmul.f32 %v3473_v59, %v694_v0 }
 0x4cf   :  { %v705_v3 = vpop.xlane.xlu1 %704 }
 0x4d0   :  { %v707_v7 = vmul.f32 %v3476_v1, %v3476_v1  ;;  %v706_v8 = vmul.f32 %v705_v3, %v3473_v59  ;;  %v709_v62 = vsub.f32 %v3461_v54, %v3476_v1  ;;  %v890_v54 = vld [vmem:[#allocation13 + $0x10] sm:$0xff] }
 0x4d1   :  { %v906_v1 = vld [vmem:[#allocation13 + $0x90] sm:$0xff]  ;;  %969 = vmatpush.msra.mxu0 %v890_v54  ;;  %v1101_v54 = vld [vmem:[#allocation5 + $0x278] sm:$0xff] }
 0x4d2   :  { %v708_v13 = vsub.f32 %v706_v8, %v707_v7  ;;  %v925_v7 = vld [vmem:[#allocation13 + $0x128] sm:$0xff]  ;;  %989 = vmatpush.msra.mxu1 %v906_v1 }
 0x4d3   :  { %v941_v8 = vld [vmem:[#allocation13 + $0x1a8] sm:$0xff]  ;;  %1006 = vmatpush.msra.mxu2 %v925_v7  ;;  %970 = vmatpush.msra.mxu0 %v889_v9  ;;  %v1099_v9 = vld [vmem:[#allocation5 + $0x268] sm:$0xff] }
 0x4d4   :  { %v3481_v19 = vadd.f32 1e-05, %v708_v13  ;;  %1026 = vmatpush.msra.mxu3 %v941_v8  ;;  %990 = vmatpush.msra.mxu1 %v905_v10  ;;  %v888_v13 = vld [vmem:[#allocation13] sm:$0xff]  ;;  %v1102_v1 = vld [vmem:[#allocation5 + $0x280] sm:$0xff] }
 0x4d5   :  { %1007 = vmatpush.msra.mxu2 %v924_v11  ;;  %971 = vmatpush.msra.mxu0 %v888_v13  ;;  %v1097_v7 = vld [vmem:[#allocation5 + $0x258] sm:$0xff]  ;;  %v1098_v8 = vld [vmem:[#allocation5 + $0x260] sm:$0xff]  ;;  %v1095_v11 = vld [vmem:[#allocation5 + $0x248] sm:$0xff] }
 0x4d6   :  { %2929 = vrsqrt.f32 %v3481_v19  ;;  %vm717_vm10 = vweird.f32 %v3481_v19  ;;  %1027 = vmatpush.msra.mxu3 %v940_v12  ;;  %991 = vmatpush.msra.mxu1 %v904_v14  ;;  %v1094_v10 = vld [vmem:[#allocation5 + $0x240] sm:$0xff]  ;;  %v1096_v12 = vld [vmem:[#allocation5 + $0x250] sm:$0xff]  ;;  %v1091_v13 = vld [vmem:[#allocation5 + $0x228] sm:$0xff] }
 0x4d7   :  { %1008 = vmatpush.msra.mxu2 %v923_v15  ;;  %v1092_v14 = vld [vmem:[#allocation5 + $0x230] sm:$0xff]  ;;  %v1093_v15 = vld [vmem:[#allocation5 + $0x238] sm:$0xff] }
 0x4d8   :  { %1028 = vmatpush.msra.mxu3 %v939_v16  ;;  %v1088_v16 = vld [vmem:[#allocation5 + $0x210] sm:$0xff] }
 0x4d9   :  { %1009 = vmatpush.msra.mxu2 %v922_v17  ;;  %v1089_v17 = vld [vmem:[#allocation5 + $0x218] sm:$0xff] }
 0x4da   :  { %1029 = vmatpush.msra.mxu3 %v938_v18  ;;  %v1090_v18 = vld [vmem:[#allocation5 + $0x220] sm:$0xff] }
 0x4dc   :  { %v2930_v37 = vpop.eup %2929  ;;  %1030 = vmatpush.msra.mxu3 %v937_v20  ;;  %v1086_v20 = vld [vmem:[#allocation5 + $0x200] sm:$0xff] }
 0x4dd   :  { %v712_v40 = vmul.f32 %v2930_v37, %v3481_v19  ;;  %vm718_vm9 = vweird.f32 %v2930_v37  ;;  %v921_v19 = vld [vmem:[#allocation13 + $0x108] sm:$0xff] }
 0x4de   :  { %vm719_vm11 = vmor %vm717_vm10, %vm718_vm9  ;;  %1010 = vmatpush.msra.mxu2 %v921_v19  ;;  %1031 = vmatpush.msra.mxu3 %v936_v22  ;;  %v1085_v19 = vld [vmem:[#allocation5 + $0x1f8] sm:$0xff]  ;;  %v1082_v22 = vld [vmem:[#allocation5 + $0x1e0] sm:$0xff] }
 0x4df   :  { %v713_v45 = vmul.f32 %v2930_v37, %v712_v40 }
 0x4e0   :  { %1011 = vmatpush.msra.mxu2 %v920_v21  ;;  %v1087_v21 = vld [vmem:[#allocation5 + $0x208] sm:$0xff] }
 0x4e1   :  { %v714_v50 = vmul.f32 0.5, %v713_v45 }
 0x4e3   :  { %v715_v56 = vsub.f32 1.5, %v714_v50 }
 0x4e5   :  { %v716_v60 = vmul.f32 %v2930_v37, %v715_v56  ;;  %v1112_v56 = vld [vmem:[#allocation5 + $0x2d0] sm:$0xff] }
 0x4e7   :  { %v720_v0 = vsel %vm719_vm11, %v2930_v37, %v716_v60  ;;  %v1109_v60 = vld [vmem:[#allocation5 + $0x2b8] sm:$0xff] }
 0x4e8   :  { %v721_v3 = vmul.f32 %v720_v0, %v709_v62  ;;  %v1106_v62 = vld [vmem:[#allocation5 + $0x2a0] sm:$0xff]  ;;  %v1108_v0 = vld [vmem:[#allocation5 + $0x2b0] sm:$0xff] }
 0x4ea   :  { %v725_v5 = vmul.f32 %v2894_v63, %v721_v3  ;;  %v1107_v63 = vld [vmem:[#allocation5 + $0x2a8] sm:$0xff] }
 0x4eb   :  { %v1103_v3 = vld [vmem:[#allocation5 + $0x288] sm:$0xff] }
 0x4ec   :  { %v3492_v6 = vadd.f32 %v2895_v4, %v725_v5  ;;  %v1104_v4 = vld [vmem:[#allocation5 + $0x290] sm:$0xff]  ;;  %v1105_v5 = vld [vmem:[#allocation5 + $0x298] sm:$0xff] }
 0x4ee   :  { %820 = vmatmul.f32.vlgmr.msrb.gmra.mxu0 %v3492_v6  ;;  %840 = vmatmul.f32.vlgmr.msrb.gmra.mxu1 %v3492_v6 }
 0x4ef   :  { %860 = vmatmul.f32.vlgmr.msrb.gmra.mxu2 %v3492_v6  ;;  %880 = vmatmul.f32.vlgmr.msrb.gmra.mxu3 %v3492_v6 }
 0x4f0   :  { %1127 = vmatpush.msrb.mxu0 %v1115_v52  ;;  %1147 = vmatpush.msrb.mxu1 %v1116_v53  ;;  %v2897_v53 = vld [vmem:[#allocation16] ss:$0 sm:$0xff] }
 0x4f1   :  { %1167 = vmatpush.msrb.mxu2 %v1117_v55 }
 0x4f2   :  { %1128 = vmatpush.msrb.mxu0 %v1112_v56  ;;  %1148 = vmatpush.msrb.mxu1 %v1113_v57  ;;  %v2898_v57 = vld [vmem:[#allocation17] ss:$0 sm:$0xff] }
 0x4f3   :  { %1168 = vmatpush.msrb.mxu2 %v1114_v58 }
 0x4f4   :  { %1129 = vmatpush.msrb.mxu0 %v1109_v60  ;;  %1149 = vmatpush.msrb.mxu1 %v1110_v61  ;;  %v1119_v61 = vld [vmem:[#allocation7 + $0x3] sm:$0x7] }
 0x4f5   :  { %1169 = vmatpush.msrb.mxu2 %v1111_v31  ;;  %v1121_v31 = vperm.slane %v1119_v61, 0 }
 0x4f6   :  { %1130 = vmatpush.msrb.mxu0 %v1106_v62  ;;  %1150 = vmatpush.msrb.mxu1 %v1107_v63  ;;  %v1122_v62 = vperm.slane %v1119_v61, 1 }
 0x4f7   :  { %1170 = vmatpush.msrb.mxu2 %v1108_v0 }
 0x4f8   :  { %1131 = vmatpush.msrb.mxu0 %v1103_v3  ;;  %1151 = vmatpush.msrb.mxu1 %v1104_v4  ;;  %v1123_v4 = vperm.slane %v1119_v61, 2 }
 0x4f9   :  { %1171 = vmatpush.msrb.mxu2 %v1105_v5 }
 0x4fa   :  { %1152 = vmatpush.msrb.mxu1 %v1101_v54 }
 0x4fb   :  { %1172 = vmatpush.msrb.mxu2 %v1102_v1 }
 0x4fc   :  { %1153 = vmatpush.msrb.mxu1 %v1098_v8 }
 0x4fd   :  { %1173 = vmatpush.msrb.mxu2 %v1099_v9 }
 0x4fe   :  { %1154 = vmatpush.msrb.mxu1 %v1095_v11 }
 0x4ff   :  { %1174 = vmatpush.msrb.mxu2 %v1096_v12 }
 0x500   :  { %1155 = vmatpush.msrb.mxu1 %v1092_v14 }
 0x501   :  { %1175 = vmatpush.msrb.mxu2 %v1093_v15 }
 0x502   :  { %1156 = vmatpush.msrb.mxu1 %v1089_v17 }
 0x503   :  { %1176 = vmatpush.msrb.mxu2 %v1090_v18 }
 0x504   :  { %1157 = vmatpush.msrb.mxu1 %v1086_v20 }
 0x505   :  { %1177 = vmatpush.msrb.mxu2 %v1087_v21 }
 0x506   :  { %1158 = vmatpush.msrb.mxu1 %v1083_v23 }
 0x56b   :  { %v821_v26 = vpop.f32.mrf.mxu0  ;;  %v841_v27 = vpop.f32.mrf.mxu1 }
 0x56c   :  { %v822_v28 = vadd.f32 %v821_v26, %v796_v24  ;;  %v842_v29 = vadd.f32 %v841_v27, %v797_v25  ;;  %v1084_v24 = vld [vmem:[#allocation5 + $0x1f0] sm:$0xff]  ;;  %v1079_v25 = vld [vmem:[#allocation5 + $0x1c8] sm:$0xff]  ;;  %v1081_v27 = vld [vmem:[#allocation5 + $0x1d8] sm:$0xff] }
 0x56d   :  { %1178 = vmatpush.msrb.mxu2 %v1084_v24  ;;  %v1080_v26 = vld [vmem:[#allocation5 + $0x1d0] sm:$0xff] }
 0x56e   :  { %v884_v30 = vmax.f32 %v822_v28, 0.0  ;;  %v885_v32 = vmax.f32 %v842_v29, 0.0  ;;  %1159 = vmatpush.msrb.mxu1 %v1080_v26  ;;  %v1076_v29 = vld [vmem:[#allocation5 + $0x1b0] sm:$0xff] }
 0x56f   :  { %1179 = vmatpush.msrb.mxu2 %v1081_v27 }
 0x570   :  { %972 = vmatmul.f32.vlgmr.msra.gmra.mxu0 %v884_v30  ;;  %992 = vmatmul.f32.vlgmr.msra.gmra.mxu1 %v885_v32  ;;  %v1077_v30 = vld [vmem:[#allocation5 + $0x1b8] sm:$0xff]  ;;  %v1078_v32 = vld [vmem:[#allocation5 + $0x1c0] sm:$0xff] }
 0x571   :  { %1160 = vmatpush.msrb.mxu1 %v1077_v30  ;;  %1180 = vmatpush.msrb.mxu2 %v1078_v32 }
 0x572   :  { %v861_v35 = vpop.f32.mrf.mxu2  ;;  %v881_v36 = vpop.f32.mrf.mxu3 }
 0x573   :  { %v862_v37 = vadd.f32 %v861_v35, %v798_v33  ;;  %v882_v38 = vadd.f32 %v881_v36, %v799_v34  ;;  %v1073_v33 = vld [vmem:[#allocation5 + $0x198] sm:$0xff]  ;;  %v1074_v34 = vld [vmem:[#allocation5 + $0x1a0] sm:$0xff]  ;;  %v1075_v35 = vld [vmem:[#allocation5 + $0x1a8] sm:$0xff] }
 0x574   :  { %v1070_v36 = vld [vmem:[#allocation5 + $0x180] sm:$0xff]  ;;  %1161 = vmatpush.msrb.mxu1 %v1074_v34  ;;  %1181 = vmatpush.msrb.mxu2 %v1075_v35 }
 0x575   :  { %v886_v39 = vmax.f32 %v862_v37, 0.0  ;;  %v887_v40 = vmax.f32 %v882_v38, 0.0  ;;  %v1071_v37 = vld [vmem:[#allocation5 + $0x188] sm:$0xff]  ;;  %v1072_v38 = vld [vmem:[#allocation5 + $0x190] sm:$0xff] }
 0x576   :  { %1162 = vmatpush.msrb.mxu1 %v1071_v37  ;;  %1182 = vmatpush.msrb.mxu2 %v1072_v38 }
 0x577   :  { %1012 = vmatmul.f32.vlgmr.msra.gmra.mxu2 %v886_v39  ;;  %1032 = vmatmul.f32.vlgmr.msra.gmra.mxu3 %v887_v40 }
 0x5ed   :  { %v973_v42 = vpop.f32.mrf.mxu0  ;;  %v993_v44 = vpop.f32.mrf.mxu1 }
 0x5ee   :  { %v974_v43 = vadd.f32 %v2896_v41, %v973_v42 }
 0x5f0   :  { %v994_v45 = vadd.f32 %v993_v44, %v974_v43 }
 0x5fa   :  { %v1013_v46 = vpop.f32.mrf.mxu2  ;;  %v1033_v48 = vpop.f32.mrf.mxu3 }
 0x5fb   :  { %v1014_v47 = vadd.f32 %v1013_v46, %v994_v45 }
 0x5fd   :  { %v1034_v49 = vadd.f32 %v1033_v48, %v1014_v47 }
 0x5ff   :  { %v3502_v50 = vadd.f32 %v1034_v49, %v3492_v6  ;;  %v1100_v6 = vld [vmem:[#allocation5 + $0x270] sm:$0xff] }
 0x600   :  { %1132 = vmatpush.msrb.mxu0 %v1100_v6 }
 0x601   :  { %1039 = vadd.xlane.f32.xlu0 %v3502_v50  ;;  %v1042_v51 = vmul.f32 %v3502_v50, %v3502_v50 }
 0x602   :  { %1133 = vmatpush.msrb.mxu0 %v1097_v7 }
 0x604   :  { %1134 = vmatpush.msrb.mxu0 %v1094_v10 }
 0x606   :  { %1135 = vmatpush.msrb.mxu0 %v1091_v13 }
 0x608   :  { %1136 = vmatpush.msrb.mxu0 %v1088_v16 }
 0x609   :  { %1043 = vadd.xlane.f32.xlu0 %v1042_v51 }
 0x60a   :  { %1137 = vmatpush.msrb.mxu0 %v1085_v19 }
 0x60c   :  { %1138 = vmatpush.msrb.mxu0 %v1082_v22 }
 0x60e   :  { %1139 = vmatpush.msrb.mxu0 %v1079_v25 }
 0x610   :  { %1140 = vmatpush.msrb.mxu0 %v1076_v29 }
 0x612   :  { %1141 = vmatpush.msrb.mxu0 %v1073_v33 }
 0x614   :  { %1142 = vmatpush.msrb.mxu0 %v1070_v36 }
 0x674   :  { %v1040_v28 = vpop.xlane.xlu0 %1039 }
 0x675   :  { %v1041_v39 = vmul.f32 %v1040_v28, %v3473_v59 }
 0x677   :  { %v1046_v41 = vmul.f32 %v1041_v39, %v1041_v39  ;;  %v1048_v52 = vsub.f32 %v3502_v50, %v1041_v39 }
 0x67c   :  { %v1044_v40 = vpop.xlane.xlu0 %1043 }
 0x67d   :  { %v1045_v42 = vmul.f32 %v1044_v40, %v3473_v59 }
 0x67f   :  { %v1047_v43 = vsub.f32 %v1045_v42, %v1046_v41 }
 0x681   :  { %v1049_v44 = vadd.f32 1e-05, %v1047_v43 }
 0x683   :  { %2931 = vrsqrt.f32 %v1049_v44  ;;  %vm1056_vm13 = vweird.f32 %v1049_v44 }
 0x689   :  { %v2932_v45 = vpop.eup %2931 }
 0x68a   :  { %v1051_v46 = vmul.f32 %v2932_v45, %v1049_v44  ;;  %vm1057_vm12 = vweird.f32 %v2932_v45 }
 0x68b   :  { %vm1058_vm14 = vmor %vm1056_vm13, %vm1057_vm12 }
 0x68c   :  { %v1052_v47 = vmul.f32 %v2932_v45, %v1051_v46 }
 0x68e   :  { %v1053_v48 = vmul.f32 0.5, %v1052_v47 }
 0x690   :  { %v1054_v49 = vsub.f32 1.5, %v1053_v48 }
 0x692   :  { %v1055_v51 = vmul.f32 %v2932_v45, %v1054_v49 }
 0x694   :  { %v1059_v55 = vsel %vm1058_vm14, %v2932_v45, %v1055_v51 }
 0x695   :  { %v1060_v56 = vmul.f32 %v1059_v55, %v1048_v52 }
 0x697   :  { %v1064_v58 = vmul.f32 %v2897_v53, %v1060_v56 }
 0x699   :  { %v3510_v60 = vadd.f32 %v2898_v57, %v1064_v58 }
 0x69b   :  { %1143 = vmatmul.f32.vlgmr.msrb.gmra.mxu0 %v3510_v60  ;;  %1163 = vmatmul.f32.vlgmr.msrb.gmra.mxu1 %v3510_v60 }
 0x69c   :  { %1183 = vmatmul.f32.vlgmr.msrb.gmra.mxu2 %v3510_v60 }
 0x718   :  { %v1144_v63 = vpop.f32.mrf.mxu0  ;;  %v1164_v0 = vpop.f32.mrf.mxu1 }
 0x719   :  { %v1145_v50 = vadd.f32 %v1144_v63, %v1121_v31  ;;  %v1165_v3 = vadd.f32 %v1164_v0, %v1122_v62 }
 0x71b   :  { %1195 = vrot.lane.b32.xlu1 %v1165_v3, %s3273_s12  ;;  %1199 = vrot.lane.b32.xlu0 %v1165_v3, %s3269_s9 }
 0x71c   :  { %2838 = vmatpush.xpose.msk.msrb.mxu3 %vm343_vm0, %v1165_v3  ;;  %1192 = vrot.lane.b32.xlu2 %v1145_v50, %s3269_s9 }
 0x71f   :  { %v1184_v5 = vpop.f32.mrf.mxu2  ;;  %2839 = vmatmul.msk.f32.vlgmr.msrb.gmra.mxu3 %vm343_vm0, %v1145_v50 }
 0x720   :  { %v1185_v6 = vadd.f32 %v1184_v5, %v1123_v4 }
 0x722   :  { %1425 = vmatpush.msra.mxu3 %v1185_v6 }
 0x723   :  { %1197 = vrot.lane.b32.xlu0 %v1165_v3, %s3258_s28 }
 0x724   :  { %1188 = vrot.lane.b32.xlu2 %v1145_v50, %s3273_s12 }
 0x72b   :  { %1190 = vrot.lane.b32.xlu0 %v1145_v50, %s3258_s28 }
 0x776   :  { %v1193_v54 = vpop.permute.xlu2 %1192 }
 0x77e   :  { %v1189_v8 = vpop.permute.xlu2 %1188 }
 0x78d   :  { %v1196_v1 = vpop.permute.xlu1 %1195  ;;  %v1200_v7 = vpop.permute.xlu0 %1199 }
 0x78e   :  { %2840 = vmatpush.xpose.msk.msra.mxu0 %vm343_vm0, %v1196_v1  ;;  %2844 = vmatpush.xpose.msk.msra.mxu2 %vm343_vm0, %v1200_v7 }
 0x791   :  { %2841 = vmatmul.msk.f32.vlgmr.msra.gmra.mxu0 %vm343_vm0, %v1189_v8  ;;  %2845 = vmatmul.msk.f32.vlgmr.msra.gmra.mxu2 %vm343_vm0, %v1193_v54 }
 0x795   :  { %v1198_v9 = vpop.permute.xlu0 %1197 }
 0x796   :  { %2842 = vmatpush.xpose.msk.msra.mxu1 %vm343_vm0, %v1198_v9 }
 0x79d   :  { %v1191_v10 = vpop.permute.xlu0 %1190 }
 0x79e   :  { %2843 = vmatmul.msk.f32.vlgmr.msra.gmra.mxu1 %vm343_vm0, %v1191_v10 }
 0x7a2   :  { %v1232_v17 = vpop.f32.mrf.mxu3 }
 0x7a3   :  { %v1307_v18 = vsel %vm202_vm1, %v1232_v17, -1e+30 }
 0x7a4   :  { %v1311_v22 = vsel %vm444_vm2, %v1307_v18, -inf }
 0x80e   :  { %v1256_v11 = vpop.f32.mrf.mxu0 }
 0x80f   :  { %v1308_v12 = vsel %vm202_vm1, %v1256_v11, -1e+30 }
 0x810   :  { %v1314_v13 = vsel %vm444_vm2, %v1308_v12, -inf }
 0x811   :  { %1315 = vmax.xlane.f32.xlu2 %v1314_v13 }
 0x814   :  { %v1304_v14 = vpop.f32.mrf.mxu2 }
 0x815   :  { %v1310_v15 = vsel %vm202_vm1, %v1304_v14, -1e+30 }
 0x816   :  { %v1320_v16 = vsel %vm444_vm2, %v1310_v15, -inf }
 0x817   :  { %1321 = vmax.xlane.f32.xlu1 %v1320_v16 }
 0x81b   :  { %v1280_v19 = vpop.f32.mrf.mxu1 }
 0x81c   :  { %v1309_v20 = vsel %vm202_vm1, %v1280_v19, -1e+30 }
 0x81d   :  { %v1317_v21 = vsel %vm444_vm2, %v1309_v20, -inf }
 0x81e   :  { %1318 = vmax.xlane.f32.xlu0 %v1317_v21 }
 0x81f   :  { %1312 = vmax.xlane.f32.xlu1 %v1311_v22 }
 0x884   :  { %v1316_v23 = vpop.xlane.xlu2 %1315 }
 0x885   :  { %v1324_v24 = vsub.f32 %v1308_v12, %v1316_v23 }
 0x887   :  { %v1329_v25 = vmul.f32 1.442695, %v1324_v24 }
 0x889   :  { %2933 = vpow2.f32 %v1329_v25 }
 0x88a   :  { %v1322_v26 = vpop.xlane.xlu1 %1321 }
 0x88b   :  { %v1326_v27 = vsub.f32 %v1310_v15, %v1322_v26 }
 0x88d   :  { %v1333_v28 = vmul.f32 1.442695, %v1326_v27 }
 0x88f   :  { %v2934_v29 = vpop.eup %2933  ;;  %2935 = vpow2.f32 %v1333_v28 }
 0x890   :  { %v1338_v30 = vsel %vm444_vm2, %v2934_v29, 0.0 }
 0x891   :  { %v1319_v32 = vpop.xlane.xlu0 %1318  ;;  %1339 = vadd.xlane.f32.xlu0 %v1338_v30 }
 0x892   :  { %v1325_v33 = vsub.f32 %v1309_v20, %v1319_v32  ;;  %v1313_v39 = vpop.xlane.xlu1 %1312 }
 0x893   :  { %v1323_v40 = vsub.f32 %v1307_v18, %v1313_v39  ;;  %v1528_v39 = vld [vmem:[#allocation8 + $0xe8] sm:$0xff] }
 0x894   :  { %v1331_v34 = vmul.f32 1.442695, %v1325_v33 }
 0x895   :  { %v2936_v35 = vpop.eup %2935  ;;  %v1327_v41 = vmul.f32 1.442695, %v1323_v40  ;;  %v1527_v40 = vld [vmem:[#allocation8 + $0xe0] sm:$0xff] }
 0x896   :  { %2937 = vpow2.f32 %v1331_v34  ;;  %v1344_v36 = vsel %vm444_vm2, %v2936_v35, 0.0 }
 0x897   :  { %1345 = vadd.xlane.f32.xlu2 %v1344_v36  ;;  %2939 = vpow2.f32 %v1327_v41  ;;  %v1526_v41 = vld [vmem:[#allocation8 + $0xd8] sm:$0xff] }
 0x89c   :  { %v3543_v37 = vpop.eup %2937 }
 0x89d   :  { %v1341_v38 = vsel %vm444_vm2, %v3543_v37, 0.0  ;;  %v3550_v42 = vpop.eup %2939 }
 0x89e   :  { %1342 = vadd.xlane.f32.xlu1 %v1341_v38  ;;  %v1335_v43 = vsel %vm444_vm2, %v3550_v42, 0.0  ;;  %v1529_v38 = vld [vmem:[#allocation8 + $0xf0] sm:$0xff] }
 0x8a5   :  { %1202 = vrot.lane.b32.xlu0 %v1185_v6, %s3273_s12 }
 0x8af   :  { %1208 = vrot.lane.b32.xlu2 %v1185_v6, %s3269_s9 }
 0x8b7   :  { %1205 = vrot.lane.b32.xlu1 %v1185_v6, %s3258_s28 }
 0x8cf   :  { %1336 = vadd.xlane.f32.xlu0 %v1335_v43  ;;  %v1524_v43 = vld [vmem:[#allocation8 + $0xc8] sm:$0xff] }
 0x904   :  { %v1340_v44 = vpop.xlane.xlu0 %1339 }
 0x905   :  { %2941 = vrcp.f32 %v1340_v44  ;;  %v1373_v49 = vand.u32 2147483648, %v1340_v44  ;;  %v1371_v52 = vand.u32 2147483647, %v1340_v44  ;;  %vm1367_vm3 = vweird.f32 %v1340_v44 }
 0x907   :  { %v1374_v61 = vor.u32 1.1754944e-38, %v1373_v49  ;;  %vm1372_vm5 = vcmp.eq.f32.partialorder %v1371_v52, 8.507059e+37  ;;  %v1518_v49 = vld [vmem:[#allocation8 + $0x98] sm:$0xff]  ;;  %v1516_v52 = vld [vmem:[#allocation8 + $0x88] sm:$0xff] }
 0x90a   :  { %v1346_v45 = vpop.xlane.xlu2 %1345 }
 0x90b   :  { %v2942_v46 = vpop.eup %2941  ;;  %2943 = vrcp.f32 %v1346_v45  ;;  %v1403_v0 = vand.u32 2147483648, %v1346_v45  ;;  %v1401_v3 = vand.u32 2147483647, %v1346_v45  ;;  %vm1397_vm9 = vweird.f32 %v1346_v45 }
 0x90c   :  { %v1363_v47 = vmul.f32 %v2942_v46, %v1340_v44  ;;  %vm1368_vm15 = vweird.f32 %v2942_v46  ;;  %v1523_v44 = vld [vmem:[#allocation8 + $0xc0] sm:$0xff] }
 0x90d   :  { %vm1369_vm4 = vmor %vm1367_vm3, %vm1368_vm15  ;;  %v1404_v1 = vor.u32 1.1754944e-38, %v1403_v0  ;;  %vm1402_vm11 = vcmp.eq.f32.partialorder %v1401_v3, 8.507059e+37 }
 0x90e   :  { %v1364_v48 = vsub.f32 1.0, %v1363_v47  ;;  %v1520_v47 = vld [vmem:[#allocation8 + $0xa8] sm:$0xff] }
 0x910   :  { %v1365_v51 = vmul.f32 %v2942_v46, %v1364_v48  ;;  %v1519_v48 = vld [vmem:[#allocation8 + $0xa0] sm:$0xff] }
 0x911   :  { %v2944_v53 = vpop.eup %2943  ;;  %v1343_v55 = vpop.xlane.xlu1 %1342 }
 0x912   :  { %v1366_v56 = vadd.f32 %v2942_v46, %v1365_v51  ;;  %v1393_v57 = vmul.f32 %v2944_v53, %v1346_v45  ;;  %2945 = vrcp.f32 %v1343_v55  ;;  %v1209_v58 = vpop.permute.xlu2 %1208  ;;  %vm1398_vm8 = vweird.f32 %v2944_v53  ;;  %v1522_v45 = vld [vmem:[#allocation8 + $0xb8] sm:$0xff]  ;;  %v1517_v51 = vld [vmem:[#allocation8 + $0x90] sm:$0xff] }
 0x913   :  { %1494 = vmatpush.msrb.mxu2 %v1209_v58  ;;  %vm1399_vm10 = vmor %vm1397_vm9, %vm1398_vm8  ;;  %v1388_v14 = vand.u32 2147483648, %v1343_v55  ;;  %vm1382_vm13 = vweird.f32 %v1343_v55  ;;  %v1386_v15 = vand.u32 2147483647, %v1343_v55 }
 0x914   :  { %v1370_v31 = vsel %vm1369_vm4, %v2942_v46, %v1366_v56  ;;  %v1394_v62 = vsub.f32 1.0, %v1393_v57  ;;  %v1521_v46 = vld [vmem:[#allocation8 + $0xb0] sm:$0xff] }
 0x915   :  { %v1375_v63 = vsel %vm1372_vm5, %v1374_v61, %v1370_v31  ;;  %v1389_v17 = vor.u32 1.1754944e-38, %v1388_v14  ;;  %vm1387_vm15 = vcmp.eq.f32.partialorder %v1386_v15, 8.507059e+37  ;;  %v1640_v14 = vld [vmem:[#allocation10 + $0x380] sm:$0xff]  ;;  %v1641_v15 = vld [vmem:[#allocation10 + $0x388] sm:$0xff] }
 0x916   :  { %v1395_v50 = vmul.f32 %v2944_v53, %v1394_v62  ;;  %v1376_v4 = vmul.f32 %v2934_v29, %v1375_v63  ;;  %v2899_v63 = vld [vmem:[%s3720_s4 + $0x1] ss:$0 sm:$0xff] }
 0x917   :  { %v1203_v5 = vpop.permute.xlu0 %1202 }
 0x918   :  { %v2946_v6 = vpop.eup %2945  ;;  %v1396_v54 = vadd.f32 %v2944_v53, %v1395_v50  ;;  %1448 = vmatpush.msrb.mxu0 %v1203_v5  ;;  %v1652_v5 = vld [vmem:[#allocation10 + $0x3e0] sm:$0xff] }
 0x919   :  { %v1378_v7 = vmul.f32 %v2946_v6, %v1343_v55  ;;  %2847 = vmatmul.msk.f32.vlgmr.msrb.gmra.mxu0 %vm444_vm2, %v1376_v4  ;;  %vm1383_vm12 = vweird.f32 %v2946_v6 }
 0x91a   :  { %v1400_v8 = vsel %vm1399_vm10, %v2944_v53, %v1396_v54  ;;  %vm1384_vm14 = vmor %vm1382_vm13, %vm1383_vm12  ;;  %v1515_v53 = vld [vmem:[#allocation8 + $0x80] sm:$0xff]  ;;  %v1654_v54 = vld [vmem:[#allocation10 + $0x3f0] sm:$0xff]  ;;  %1667 = vmatpush.msra.mxu0 %v1652_v5 }
 0x91b   :  { %v1405_v9 = vsel %vm1402_vm11, %v1404_v1, %v1400_v8  ;;  %v1379_v10 = vsub.f32 1.0, %v1378_v7  ;;  %v1655_v1 = vld [vmem:[#allocation10 + $0x3f8] sm:$0xff]  ;;  %1707 = vmatpush.msra.mxu2 %v1654_v54  ;;  %v1648_v7 = vld [vmem:[#allocation10 + $0x3c0] sm:$0xff]  ;;  %v1649_v8 = vld [vmem:[#allocation10 + $0x3c8] sm:$0xff] }
 0x91c   :  { %v1406_v11 = vmul.f32 %v2936_v35, %v1405_v9  ;;  %v1650_v9 = vld [vmem:[#allocation10 + $0x3d0] sm:$0xff]  ;;  %1668 = vmatpush.msra.mxu0 %v1648_v7  ;;  %v1593_v5 = vld [vmem:[#allocation10 + $0x208] sm:$0xff]  ;;  %v1595_v54 = vld [vmem:[#allocation10 + $0x218] sm:$0xff] }
 0x91d   :  { %v1380_v12 = vmul.f32 %v2946_v6, %v1379_v10  ;;  %1708 = vmatpush.msra.mxu2 %v1650_v9  ;;  %v1644_v10 = vld [vmem:[#allocation10 + $0x3a0] sm:$0xff] }
 0x91e   :  { %2849 = vmatmul.msk.f32.vlgmr.msrb.gmra.mxu2 %vm444_vm2, %v1406_v11  ;;  %v1645_v11 = vld [vmem:[#allocation10 + $0x3a8] sm:$0xff]  ;;  %1669 = vmatpush.msra.mxu0 %v1644_v10  ;;  %v1766_v10 = vld [vmem:[#allocation13 + $0x270] sm:$0xff] }
 0x91f   :  { %v1381_v13 = vadd.f32 %v2946_v6, %v1380_v12  ;;  %v1646_v12 = vld [vmem:[#allocation10 + $0x3b0] sm:$0xff]  ;;  %v1767_v9 = vld [vmem:[#allocation13 + $0x278] sm:$0xff] }
 0x920   :  { %1709 = vmatpush.msra.mxu2 %v1646_v12  ;;  %1670 = vmatpush.msra.mxu0 %v1640_v14  ;;  %v1765_v14 = vld [vmem:[#allocation13 + $0x268] sm:$0xff] }
 0x921   :  { %v1385_v16 = vsel %vm1384_vm14, %v2946_v6, %v1381_v13  ;;  %v1653_v6 = vld [vmem:[#allocation10 + $0x3e8] sm:$0xff]  ;;  %v1647_v13 = vld [vmem:[#allocation10 + $0x3b8] sm:$0xff] }
 0x922   :  { %v1390_v18 = vsel %vm1387_vm15, %v1389_v17, %v1385_v16  ;;  %v1642_v16 = vld [vmem:[#allocation10 + $0x390] sm:$0xff]  ;;  %v1643_v17 = vld [vmem:[#allocation10 + $0x398] sm:$0xff] }
 0x923   :  { %v1391_v20 = vmul.f32 %v3543_v37, %v1390_v18  ;;  %v1530_v37 = vld [vmem:[#allocation8 + $0xf8] sm:$0xff]  ;;  %1710 = vmatpush.msra.mxu2 %v1642_v16  ;;  %v1636_v18 = vld [vmem:[#allocation10 + $0x360] sm:$0xff] }
 0x924   :  { %1536 = vmatpush.msrb.mxu3 %v1530_v37  ;;  %1671 = vmatpush.msra.mxu0 %v1636_v18  ;;  %v1622_v37 = vld [vmem:[#allocation10 + $0x2f0] sm:$0xff]  ;;  %v1799_v16 = vld [vmem:[#allocation13 + $0x378] sm:$0xff] }
 0x925   :  { %v1764_v18 = vld [vmem:[#allocation13 + $0x260] sm:$0xff] }
 0x926   :  { %1537 = vmatpush.msrb.mxu3 %v1529_v38  ;;  %v1623_v38 = vld [vmem:[#allocation10 + $0x2f8] sm:$0xff] }
 0x928   :  { %1538 = vmatpush.msrb.mxu3 %v1528_v39  ;;  %v1616_v39 = vld [vmem:[#allocation10 + $0x2c0] sm:$0xff] }
 0x929   :  { %v1206_v19 = vpop.permute.xlu1 %1205 }
 0x92a   :  { %1471 = vmatpush.msrb.mxu1 %v1206_v19  ;;  %1539 = vmatpush.msrb.mxu3 %v1527_v40  ;;  %v1637_v19 = vld [vmem:[#allocation10 + $0x368] sm:$0xff] }
 0x92b   :  { %2848 = vmatmul.msk.f32.vlgmr.msrb.gmra.mxu1 %vm444_vm2, %v1391_v20  ;;  %v1638_v20 = vld [vmem:[#allocation10 + $0x370] sm:$0xff]  ;;  %v1617_v40 = vld [vmem:[#allocation10 + $0x2c8] sm:$0xff] }
 0x92c   :  { %1540 = vmatpush.msrb.mxu3 %v1526_v41  ;;  %1687 = vmatpush.msra.mxu1 %v1653_v6  ;;  %v1618_v41 = vld [vmem:[#allocation10 + $0x2d0] sm:$0xff] }
 0x92d   :  { %1711 = vmatpush.msra.mxu2 %v1638_v20  ;;  %v1594_v6 = vld [vmem:[#allocation10 + $0x210] sm:$0xff] }
 0x92e   :  { %1688 = vmatpush.msra.mxu1 %v1649_v8  ;;  %v1780_v20 = vld [vmem:[#allocation13 + $0x2e0] sm:$0xff] }
 0x930   :  { %1689 = vmatpush.msra.mxu1 %v1645_v11 }
 0x932   :  { %1690 = vmatpush.msra.mxu1 %v1641_v15  ;;  %v1781_v15 = vld [vmem:[#allocation13 + $0x2e8] sm:$0xff] }
 0x934   :  { %1691 = vmatpush.msra.mxu1 %v1637_v19  ;;  %v1815_v19 = vld [vmem:[#allocation13 + $0x3f8] sm:$0xff] }
 0x942   :  { %v1337_v21 = vpop.xlane.xlu0 %1336 }
 0x943   :  { %2947 = vrcp.f32 %v1337_v21  ;;  %v1358_v25 = vand.u32 2147483648, %v1337_v21  ;;  %v1356_v27 = vand.u32 2147483647, %v1337_v21  ;;  %vm1352_vm4 = vweird.f32 %v1337_v21 }
 0x945   :  { %v1359_v29 = vor.u32 1.1754944e-38, %v1358_v25  ;;  %vm1357_vm8 = vcmp.eq.f32.partialorder %v1356_v27, 8.507059e+37  ;;  %v1635_v25 = vld [vmem:[#allocation10 + $0x358] sm:$0xff]  ;;  %v1629_v27 = vld [vmem:[#allocation10 + $0x328] sm:$0xff] }
 0x949   :  { %v2948_v22 = vpop.eup %2947 }
 0x94a   :  { %v1348_v23 = vmul.f32 %v2948_v22, %v1337_v21  ;;  %vm1353_vm3 = vweird.f32 %v2948_v22  ;;  %v1639_v21 = vld [vmem:[#allocation10 + $0x378] sm:$0xff] }
 0x94b   :  { %vm1354_vm5 = vmor %vm1352_vm4, %vm1353_vm3 }
 0x94c   :  { %v1349_v24 = vsub.f32 1.0, %v1348_v23  ;;  %v1633_v23 = vld [vmem:[#allocation10 + $0x348] sm:$0xff] }
 0x94d   :  { %1692 = vmatpush.msra.mxu1 %v1633_v23 }
 0x94e   :  { %v1350_v26 = vmul.f32 %v2948_v22, %v1349_v24  ;;  %v1634_v24 = vld [vmem:[#allocation10 + $0x350] sm:$0xff] }
 0x94f   :  { %1712 = vmatpush.msra.mxu2 %v1634_v24  ;;  %1693 = vmatpush.msra.mxu1 %v1629_v27  ;;  %v1797_v24 = vld [vmem:[#allocation13 + $0x368] sm:$0xff]  ;;  %v1779_v27 = vld [vmem:[#allocation13 + $0x2d8] sm:$0xff] }
 0x950   :  { %v1351_v28 = vadd.f32 %v2948_v22, %v1350_v26  ;;  %v1628_v26 = vld [vmem:[#allocation10 + $0x320] sm:$0xff] }
 0x952   :  { %v1355_v30 = vsel %vm1354_vm5, %v2948_v22, %v1351_v28  ;;  %v1632_v22 = vld [vmem:[#allocation10 + $0x340] sm:$0xff]  ;;  %v1630_v28 = vld [vmem:[#allocation10 + $0x330] sm:$0xff] }
 0x953   :  { %v1360_v32 = vsel %vm1357_vm8, %v1359_v29, %v1355_v30  ;;  %1672 = vmatpush.msra.mxu0 %v1632_v22  ;;  %v1631_v29 = vld [vmem:[#allocation10 + $0x338] sm:$0xff]  ;;  %1713 = vmatpush.msra.mxu2 %v1630_v28  ;;  %v1624_v30 = vld [vmem:[#allocation10 + $0x300] sm:$0xff]  ;;  %v1796_v28 = vld [vmem:[#allocation13 + $0x360] sm:$0xff] }
 0x954   :  { %v1361_v33 = vmul.f32 %v3550_v42, %v1360_v32  ;;  %v1525_v42 = vld [vmem:[#allocation8 + $0xd0] sm:$0xff]  ;;  %v1625_v32 = vld [vmem:[#allocation10 + $0x308] sm:$0xff]  ;;  %v1814_v22 = vld [vmem:[#allocation13 + $0x3f0] sm:$0xff] }
 0x955   :  { %1541 = vmatpush.msrb.mxu3 %v1525_v42  ;;  %1673 = vmatpush.msra.mxu0 %v1628_v26  ;;  %v1619_v42 = vld [vmem:[#allocation10 + $0x2d8] sm:$0xff]  ;;  %v1763_v26 = vld [vmem:[#allocation13 + $0x258] sm:$0xff] }
 0x956   :  { %2846 = vmatmul.msk.f32.vlgmr.msra.gmra.mxu3 %vm444_vm2, %v1361_v33  ;;  %v1626_v33 = vld [vmem:[#allocation10 + $0x310] sm:$0xff]  ;;  %1694 = vmatpush.msra.mxu1 %v1625_v32  ;;  %v1778_v32 = vld [vmem:[#allocation13 + $0x2d0] sm:$0xff] }
 0x957   :  { %1542 = vmatpush.msrb.mxu3 %v1524_v43  ;;  %1674 = vmatpush.msra.mxu0 %v1624_v30  ;;  %v1612_v43 = vld [vmem:[#allocation10 + $0x2a0] sm:$0xff] }
 0x958   :  { %1714 = vmatpush.msra.mxu2 %v1626_v33  ;;  %v1762_v30 = vld [vmem:[#allocation13 + $0x250] sm:$0xff]  ;;  %v1795_v33 = vld [vmem:[#allocation13 + $0x358] sm:$0xff] }
 0x959   :  { %1543 = vmatpush.msrb.mxu3 %v1523_v44  ;;  %v1613_v44 = vld [vmem:[#allocation10 + $0x2a8] sm:$0xff] }
 0x95a   :  { %1715 = vmatpush.msra.mxu2 %v1622_v37  ;;  %v1794_v37 = vld [vmem:[#allocation13 + $0x350] sm:$0xff] }
 0x95b   :  { %1544 = vmatpush.msrb.mxu3 %v1522_v45  ;;  %v1614_v45 = vld [vmem:[#allocation10 + $0x2b0] sm:$0xff] }
 0x95c   :  { %1716 = vmatpush.msra.mxu2 %v1618_v41 }
 0x95d   :  { %1545 = vmatpush.msrb.mxu3 %v1521_v46  ;;  %v1615_v46 = vld [vmem:[#allocation10 + $0x2b8] sm:$0xff] }
 0x95e   :  { %1717 = vmatpush.msra.mxu2 %v1614_v45  ;;  %v1759_v45 = vld [vmem:[#allocation13 + $0x238] sm:$0xff] }
 0x95f   :  { %1546 = vmatpush.msrb.mxu3 %v1520_v47  ;;  %v1608_v47 = vld [vmem:[#allocation10 + $0x280] sm:$0xff] }
 0x961   :  { %1547 = vmatpush.msrb.mxu3 %v1519_v48  ;;  %v1609_v48 = vld [vmem:[#allocation10 + $0x288] sm:$0xff] }
 0x963   :  { %1548 = vmatpush.msrb.mxu3 %v1518_v49  ;;  %v1610_v49 = vld [vmem:[#allocation10 + $0x290] sm:$0xff] }
 0x964   :  { %1718 = vmatpush.msra.mxu2 %v1610_v49 }
 0x965   :  { %1549 = vmatpush.msrb.mxu3 %v1517_v51  ;;  %v1611_v51 = vld [vmem:[#allocation10 + $0x298] sm:$0xff] }
 0x967   :  { %1550 = vmatpush.msrb.mxu3 %v1516_v52  ;;  %v1604_v52 = vld [vmem:[#allocation10 + $0x260] sm:$0xff] }
 0x969   :  { %1551 = vmatpush.msrb.mxu3 %v1515_v53  ;;  %v1605_v53 = vld [vmem:[#allocation10 + $0x268] sm:$0xff] }
 0x96b   :  { %1727 = vmatpush.msra.mxu3 %v1655_v1 }
 0x996   :  { %v1450_v34 = vpop.f32.mrf.mxu0 }
 0x997   :  { %1500 = vrot.lane.b32.xlu2 %v1450_v34, %s3269_s9  ;;  %v1627_v34 = vld [vmem:[#allocation10 + $0x318] sm:$0xff] }
 0x9a1   :  { %v1496_v35 = vpop.f32.mrf.mxu2 }
 0x9a2   :  { %1508 = vrot.lane.b32.xlu2 %v1496_v35, %s3273_s12  ;;  %v1620_v35 = vld [vmem:[#allocation10 + $0x2e0] sm:$0xff] }
 0x9a3   :  { %1675 = vmatpush.msra.mxu0 %v1620_v35  ;;  %v1761_v35 = vld [vmem:[#allocation13 + $0x248] sm:$0xff] }
 0x9a5   :  { %1676 = vmatpush.msra.mxu0 %v1616_v39  ;;  %v1760_v39 = vld [vmem:[#allocation13 + $0x240] sm:$0xff] }
 0x9a7   :  { %1677 = vmatpush.msra.mxu0 %v1612_v43  ;;  %v1809_v43 = vld [vmem:[#allocation13 + $0x3c8] sm:$0xff] }
 0x9a8   :  { %v1473_v36 = vpop.f32.mrf.mxu1 }
 0x9a9   :  { %1504 = vrot.lane.b32.xlu1 %v1473_v36, %s3258_s28  ;;  %v1621_v36 = vld [vmem:[#allocation10 + $0x2e8] sm:$0xff]  ;;  %1678 = vmatpush.msra.mxu0 %v1608_v47 }
 0x9aa   :  { %1695 = vmatpush.msra.mxu1 %v1621_v36  ;;  %v1777_v36 = vld [vmem:[#allocation13 + $0x2c8] sm:$0xff]  ;;  %v1792_v47 = vld [vmem:[#allocation13 + $0x340] sm:$0xff] }
 0x9ab   :  { %1679 = vmatpush.msra.mxu0 %v1604_v52  ;;  %v1774_v52 = vld [vmem:[#allocation13 + $0x2b0] sm:$0xff] }
 0x9ac   :  { %1696 = vmatpush.msra.mxu1 %v1617_v40  ;;  %v1776_v40 = vld [vmem:[#allocation13 + $0x2c0] sm:$0xff] }
 0x9ae   :  { %1697 = vmatpush.msra.mxu1 %v1613_v44 }
 0x9b0   :  { %1698 = vmatpush.msra.mxu1 %v1609_v48  ;;  %v1808_v48 = vld [vmem:[#allocation13 + $0x3c0] sm:$0xff] }
 0x9b2   :  { %1699 = vmatpush.msra.mxu1 %v1605_v53  ;;  %v1791_v53 = vld [vmem:[#allocation13 + $0x338] sm:$0xff] }
 0x9d9   :  { %v1427_v56 = vpop.f32.mrf.mxu3 }
 0x9f1   :  { %v1501_v55 = vpop.permute.xlu2 %1500 }
 0x9f2   :  { %v1511_v57 = vsel %vm343_vm0, %v1427_v56, %v1501_v55  ;;  %v1606_v55 = vld [vmem:[#allocation10 + $0x270] sm:$0xff]  ;;  %v1607_v56 = vld [vmem:[#allocation10 + $0x278] sm:$0xff] }
 0x9f3   :  { %1719 = vmatpush.msra.mxu2 %v1606_v55  ;;  %v1807_v55 = vld [vmem:[#allocation13 + $0x3b8] sm:$0xff] }
 0x9fc   :  { %v1509_v61 = vpop.permute.xlu2 %1508 }
 0xa1b   :  { %v1505_v58 = vpop.permute.xlu1 %1504 }
 0xa1c   :  { %v1512_v31 = vsel %vm646_vm6, %v1511_v57, %v1505_v58  ;;  %v1600_v57 = vld [vmem:[#allocation10 + $0x240] sm:$0xff]  ;;  %v1601_v58 = vld [vmem:[#allocation10 + $0x248] sm:$0xff] }
 0xa1d   :  { %v1513_v62 = vsel %vm648_vm7, %v1512_v31, %v1509_v61  ;;  %v1602_v61 = vld [vmem:[#allocation10 + $0x250] sm:$0xff]  ;;  %1680 = vmatpush.msra.mxu0 %v1600_v57  ;;  %1700 = vmatpush.msra.mxu1 %v1601_v58  ;;  %v1603_v31 = vld [vmem:[#allocation10 + $0x258] sm:$0xff] }
 0xa1e   :  { %1552 = vmatmul.f32.vlgmr.msrb.gmra.mxu3 %v1513_v62  ;;  %v1596_v62 = vld [vmem:[#allocation10 + $0x220] sm:$0xff]  ;;  %1720 = vmatpush.msra.mxu2 %v1602_v61  ;;  %v1757_v57 = vld [vmem:[#allocation13 + $0x228] sm:$0xff] }
 0xa1f   :  { %1681 = vmatpush.msra.mxu0 %v1596_v62  ;;  %v1773_v58 = vld [vmem:[#allocation13 + $0x2a8] sm:$0xff]  ;;  %v1790_v61 = vld [vmem:[#allocation13 + $0x330] sm:$0xff] }
 0xaa1   :  { %v1553_v0 = vpop.f32.mrf.mxu3 }
 0xaa2   :  { %v1554_v50 = vadd.f32 %v2899_v63, %v1553_v0  ;;  %v1597_v63 = vld [vmem:[#allocation10 + $0x228] sm:$0xff]  ;;  %v1598_v0 = vld [vmem:[#allocation10 + $0x230] sm:$0xff] }
 0xaa3   :  { %1701 = vmatpush.msra.mxu1 %v1597_v63  ;;  %1721 = vmatpush.msra.mxu2 %v1598_v0  ;;  %v1756_v63 = vld [vmem:[#allocation13 + $0x220] sm:$0xff] }
 0xaa4   :  { %v3570_v3 = vadd.f32 %v1554_v50, %v3510_v60  ;;  %v1651_v60 = vld [vmem:[#allocation10 + $0x3d8] sm:$0xff]  ;;  %v1772_v0 = vld [vmem:[#allocation13 + $0x2a0] sm:$0xff] }
 0xaa5   :  { %1728 = vmatpush.msra.mxu3 %v1651_v60  ;;  %v1599_v50 = vld [vmem:[#allocation10 + $0x238] sm:$0xff]  ;;  %1702 = vmatpush.msra.mxu1 %v1593_v5  ;;  %v1783_v60 = vld [vmem:[#allocation13 + $0x2f8] sm:$0xff] }
 0xaa6   :  { %1561 = vadd.xlane.f32.xlu1 %v3570_v3  ;;  %v1564_v4 = vmul.f32 %v3570_v3, %v3570_v3  ;;  %1722 = vmatpush.msra.mxu2 %v1594_v6  ;;  %v1771_v5 = vld [vmem:[#allocation13 + $0x298] sm:$0xff] }
 0xaa7   :  { %1729 = vmatpush.msra.mxu3 %v1647_v13  ;;  %1841 = vmatpush.msrb.mxu1 %v1783_v60  ;;  %v1782_v13 = vld [vmem:[#allocation13 + $0x2f0] sm:$0xff] }
 0xaa8   :  { %1565 = vadd.xlane.f32.xlu2 %v1564_v4  ;;  %v1592_v4 = vld [vmem:[#allocation10 + $0x200] sm:$0xff]  ;;  %1861 = vmatpush.msrb.mxu2 %v1799_v16  ;;  %v1804_v16 = vld [vmem:[#allocation13 + $0x3a0] sm:$0xff] }
 0xaa9   :  { %1730 = vmatpush.msra.mxu3 %v1643_v17  ;;  %1682 = vmatpush.msra.mxu0 %v1592_v4  ;;  %v1755_v4 = vld [vmem:[#allocation13 + $0x218] sm:$0xff] }
 0xaaa   :  { %1842 = vmatpush.msrb.mxu1 %v1782_v13  ;;  %v1753_v13 = vld [vmem:[#allocation13 + $0x208] sm:$0xff] }
 0xaab   :  { %1731 = vmatpush.msra.mxu3 %v1639_v21  ;;  %1821 = vmatpush.msrb.mxu0 %v1767_v9  ;;  %v1798_v21 = vld [vmem:[#allocation13 + $0x370] sm:$0xff]  ;;  %v2901_v9 = vld [vmem:[%s3726_s10 + $0x1] ss:$0 sm:$0xff] }
 0xaac   :  { %1843 = vmatpush.msrb.mxu1 %v1781_v15  ;;  %1862 = vmatpush.msrb.mxu2 %v1798_v21  ;;  %v1788_v15 = vld [vmem:[#allocation13 + $0x320] sm:$0xff]  ;;  %v1786_v21 = vld [vmem:[#allocation13 + $0x310] sm:$0xff] }
 0xaad   :  { %1732 = vmatpush.msra.mxu3 %v1635_v25  ;;  %1822 = vmatpush.msrb.mxu0 %v1766_v10  ;;  %v1813_v25 = vld [vmem:[#allocation13 + $0x3e8] sm:$0xff] }
 0xaae   :  { %1844 = vmatpush.msrb.mxu1 %v1780_v20  ;;  %1863 = vmatpush.msrb.mxu2 %v1797_v24  ;;  %v1803_v20 = vld [vmem:[#allocation13 + $0x398] sm:$0xff]  ;;  %v1801_v24 = vld [vmem:[#allocation13 + $0x388] sm:$0xff] }
 0xaaf   :  { %1733 = vmatpush.msra.mxu3 %v1631_v29  ;;  %1823 = vmatpush.msrb.mxu0 %v1765_v14  ;;  %v1812_v29 = vld [vmem:[#allocation13 + $0x3e0] sm:$0xff]  ;;  %v1769_v14 = vld [vmem:[#allocation13 + $0x288] sm:$0xff] }
 0xab0   :  { %1845 = vmatpush.msrb.mxu1 %v1779_v27  ;;  %1864 = vmatpush.msrb.mxu2 %v1796_v28  ;;  %v1657_v27 = vld [vmem:[#allocation11 + $0x4] sm:$0xf] }
 0xab1   :  { %1734 = vmatpush.msra.mxu3 %v1627_v34  ;;  %1824 = vmatpush.msrb.mxu0 %v1764_v18  ;;  %v1811_v34 = vld [vmem:[#allocation13 + $0x3d8] sm:$0xff]  ;;  %v1768_v18 = vld [vmem:[#allocation13 + $0x280] sm:$0xff]  ;;  %v1659_v28 = vperm.slane %v1657_v27, 0 }
 0xab2   :  { %1846 = vmatpush.msrb.mxu1 %v1778_v32  ;;  %1865 = vmatpush.msrb.mxu2 %v1795_v33 }
 0xab3   :  { %1735 = vmatpush.msra.mxu3 %v1623_v38  ;;  %1825 = vmatpush.msrb.mxu0 %v1763_v26  ;;  %v1810_v38 = vld [vmem:[#allocation13 + $0x3d0] sm:$0xff]  ;;  %v1800_v26 = vld [vmem:[#allocation13 + $0x380] sm:$0xff] }
 0xab4   :  { %1847 = vmatpush.msrb.mxu1 %v1777_v36  ;;  %1866 = vmatpush.msrb.mxu2 %v1794_v37  ;;  %v1661_v37 = vperm.slane %v1657_v27, 2 }
 0xab5   :  { %1736 = vmatpush.msra.mxu3 %v1619_v42  ;;  %1826 = vmatpush.msrb.mxu0 %v1762_v30  ;;  %v1793_v42 = vld [vmem:[#allocation13 + $0x348] sm:$0xff] }
 0xab6   :  { %1848 = vmatpush.msrb.mxu1 %v1776_v40  ;;  %1867 = vmatpush.msrb.mxu2 %v1793_v42 }
 0xab7   :  { %1737 = vmatpush.msra.mxu3 %v1615_v46  ;;  %1827 = vmatpush.msrb.mxu0 %v1761_v35  ;;  %v1775_v46 = vld [vmem:[#allocation13 + $0x2b8] sm:$0xff] }
 0xab8   :  { %1849 = vmatpush.msrb.mxu1 %v1775_v46  ;;  %1868 = vmatpush.msrb.mxu2 %v1792_v47 }
 0xab9   :  { %1738 = vmatpush.msra.mxu3 %v1611_v51  ;;  %1828 = vmatpush.msrb.mxu0 %v1760_v39  ;;  %v1758_v51 = vld [vmem:[#allocation13 + $0x230] sm:$0xff] }
 0xaba   :  { %1850 = vmatpush.msrb.mxu1 %v1774_v52  ;;  %1869 = vmatpush.msrb.mxu2 %v1791_v53 }
 0xabb   :  { %1739 = vmatpush.msra.mxu3 %v1607_v56  ;;  %1829 = vmatpush.msrb.mxu0 %v1759_v45  ;;  %v2902_v45 = vld [vmem:[%s3724_s8 + $0x1] ss:$0 sm:$0xff] }
 0xabc   :  { %1851 = vmatpush.msrb.mxu1 %v1773_v58  ;;  %1870 = vmatpush.msrb.mxu2 %v1790_v61  ;;  %v1982_v58 = vld [vmem:[#allocation5 + $0x468] sm:$0xff]  ;;  %v1983_v61 = vld [vmem:[#allocation5 + $0x470] sm:$0xff] }
 0xabd   :  { %1740 = vmatpush.msra.mxu3 %v1603_v31  ;;  %1830 = vmatpush.msrb.mxu0 %v1758_v51  ;;  %v1806_v31 = vld [vmem:[#allocation13 + $0x3b0] sm:$0xff] }
 0xabe   :  { %1852 = vmatpush.msrb.mxu1 %v1772_v0  ;;  %v1981_v0 = vld [vmem:[#allocation5 + $0x460] sm:$0xff] }
 0xabf   :  { %1741 = vmatpush.msra.mxu3 %v1599_v50  ;;  %1831 = vmatpush.msrb.mxu0 %v1757_v57 }
 0xac0   :  { %1853 = vmatpush.msrb.mxu1 %v1771_v5  ;;  %v1978_v5 = vld [vmem:[#allocation5 + $0x448] sm:$0xff] }
 0xac1   :  { %1742 = vmatpush.msra.mxu3 %v1595_v54  ;;  %v2900_v54 = vld [vmem:[#allocation14 + $0x1] ss:$0 sm:$0xff]  ;;  %1832 = vmatpush.msrb.mxu0 %v1756_v63  ;;  %v1980_v63 = vld [vmem:[#allocation5 + $0x458] sm:$0xff] }
 0xac3   :  { %1881 = vmatpush.msrb.mxu3 %v1815_v19  ;;  %1833 = vmatpush.msrb.mxu0 %v1755_v4  ;;  %v1787_v19 = vld [vmem:[#allocation13 + $0x318] sm:$0xff]  ;;  %v1977_v4 = vld [vmem:[#allocation5 + $0x440] sm:$0xff] }
 0xac5   :  { %1882 = vmatpush.msrb.mxu3 %v1814_v22  ;;  %v1802_v22 = vld [vmem:[#allocation13 + $0x390] sm:$0xff] }
 0xac7   :  { %1883 = vmatpush.msrb.mxu3 %v1813_v25  ;;  %v1784_v25 = vld [vmem:[#allocation13 + $0x300] sm:$0xff] }
 0xac9   :  { %1884 = vmatpush.msrb.mxu3 %v1812_v29  ;;  %v1660_v29 = vperm.slane %v1657_v27, 1 }
 0xacb   :  { %1885 = vmatpush.msrb.mxu3 %v1811_v34 }
 0xacd   :  { %1886 = vmatpush.msrb.mxu3 %v1810_v38  ;;  %v1662_v38 = vperm.slane %v1657_v27, 3  ;;  %v1950_v27 = vld [vmem:[#allocation5 + $0x368] sm:$0xff] }
 0xacf   :  { %1887 = vmatpush.msrb.mxu3 %v1809_v43 }
 0xad1   :  { %1888 = vmatpush.msrb.mxu3 %v1808_v48 }
 0xad3   :  { %1889 = vmatpush.msrb.mxu3 %v1807_v55 }
 0xad5   :  { %1890 = vmatpush.msrb.mxu3 %v1806_v31  ;;  %v1984_v31 = vld [vmem:[#allocation5 + $0x478] sm:$0xff] }
 0xb19   :  { %v1562_v1 = vpop.xlane.xlu1 %1561 }
 0xb1a   :  { %v3576_v7 = vmul.f32 %v1562_v1, %v3473_v59 }
 0xb1b   :  { %v1566_v8 = vpop.xlane.xlu2 %1565 }
 0xb1c   :  { %v1568_v11 = vmul.f32 %v3576_v7, %v3576_v7  ;;  %v1567_v12 = vmul.f32 %v1566_v8, %v3473_v59  ;;  %v1570_v6 = vsub.f32 %v3570_v3, %v3576_v7  ;;  %v1754_v3 = vld [vmem:[#allocation13 + $0x210] sm:$0xff] }
 0xb1d   :  { %v1770_v7 = vld [vmem:[#allocation13 + $0x290] sm:$0xff]  ;;  %1834 = vmatpush.msrb.mxu0 %v1754_v3  ;;  %v1968_v3 = vld [vmem:[#allocation5 + $0x3f8] sm:$0xff] }
 0xb1e   :  { %v1569_v17 = vsub.f32 %v1567_v12, %v1568_v11  ;;  %v1789_v11 = vld [vmem:[#allocation13 + $0x328] sm:$0xff]  ;;  %1854 = vmatpush.msrb.mxu1 %v1770_v7 }
 0xb1f   :  { %v1805_v12 = vld [vmem:[#allocation13 + $0x3a8] sm:$0xff]  ;;  %1871 = vmatpush.msrb.mxu2 %v1789_v11  ;;  %1835 = vmatpush.msrb.mxu0 %v1753_v13  ;;  %v1966_v13 = vld [vmem:[#allocation5 + $0x3e8] sm:$0xff] }
 0xb20   :  { %v3581_v23 = vadd.f32 1e-05, %v1569_v17  ;;  %1891 = vmatpush.msrb.mxu3 %v1805_v12  ;;  %1855 = vmatpush.msrb.mxu1 %v1769_v14  ;;  %v1752_v17 = vld [vmem:[#allocation13 + $0x200] sm:$0xff]  ;;  %v1969_v7 = vld [vmem:[#allocation5 + $0x400] sm:$0xff] }
 0xb21   :  { %1872 = vmatpush.msrb.mxu2 %v1788_v15  ;;  %1836 = vmatpush.msrb.mxu0 %v1752_v17  ;;  %v1964_v11 = vld [vmem:[#allocation5 + $0x3d8] sm:$0xff]  ;;  %v1965_v12 = vld [vmem:[#allocation5 + $0x3e0] sm:$0xff]  ;;  %v1962_v15 = vld [vmem:[#allocation5 + $0x3c8] sm:$0xff] }
 0xb22   :  { %2949 = vrsqrt.f32 %v3581_v23  ;;  %vm1578_vm10 = vweird.f32 %v3581_v23  ;;  %1892 = vmatpush.msrb.mxu3 %v1804_v16  ;;  %1856 = vmatpush.msrb.mxu1 %v1768_v18  ;;  %v1961_v14 = vld [vmem:[#allocation5 + $0x3c0] sm:$0xff]  ;;  %v1963_v16 = vld [vmem:[#allocation5 + $0x3d0] sm:$0xff]  ;;  %v1958_v17 = vld [vmem:[#allocation5 + $0x3a8] sm:$0xff] }
 0xb23   :  { %1873 = vmatpush.msrb.mxu2 %v1787_v19  ;;  %v1959_v18 = vld [vmem:[#allocation5 + $0x3b0] sm:$0xff]  ;;  %v1960_v19 = vld [vmem:[#allocation5 + $0x3b8] sm:$0xff] }
 0xb24   :  { %1893 = vmatpush.msrb.mxu3 %v1803_v20  ;;  %v1955_v20 = vld [vmem:[#allocation5 + $0x390] sm:$0xff] }
 0xb25   :  { %1874 = vmatpush.msrb.mxu2 %v1786_v21  ;;  %v1956_v21 = vld [vmem:[#allocation5 + $0x398] sm:$0xff] }
 0xb26   :  { %1894 = vmatpush.msrb.mxu3 %v1802_v22  ;;  %v1957_v22 = vld [vmem:[#allocation5 + $0x3a0] sm:$0xff] }
 0xb28   :  { %v2950_v41 = vpop.eup %2949  ;;  %1895 = vmatpush.msrb.mxu3 %v1801_v24  ;;  %v1953_v24 = vld [vmem:[#allocation5 + $0x380] sm:$0xff] }
 0xb29   :  { %v1573_v44 = vmul.f32 %v2950_v41, %v3581_v23  ;;  %vm1579_vm9 = vweird.f32 %v2950_v41  ;;  %v1785_v23 = vld [vmem:[#allocation13 + $0x308] sm:$0xff] }
 0xb2a   :  { %vm1580_vm11 = vmor %vm1578_vm10, %vm1579_vm9  ;;  %1875 = vmatpush.msrb.mxu2 %v1785_v23  ;;  %1896 = vmatpush.msrb.mxu3 %v1800_v26  ;;  %v1952_v23 = vld [vmem:[#allocation5 + $0x378] sm:$0xff]  ;;  %v1949_v26 = vld [vmem:[#allocation5 + $0x360] sm:$0xff] }
 0xb2b   :  { %v1574_v49 = vmul.f32 %v2950_v41, %v1573_v44 }
 0xb2c   :  { %1876 = vmatpush.msrb.mxu2 %v1784_v25  ;;  %v1954_v25 = vld [vmem:[#allocation5 + $0x388] sm:$0xff] }
 0xb2d   :  { %v1575_v56 = vmul.f32 0.5, %v1574_v49 }
 0xb2f   :  { %v1576_v62 = vsub.f32 1.5, %v1575_v56 }
 0xb31   :  { %v1577_v50 = vmul.f32 %v2950_v41, %v1576_v62  ;;  %v1979_v62 = vld [vmem:[#allocation5 + $0x450] sm:$0xff] }
 0xb33   :  { %v1581_v1 = vsel %vm1580_vm11, %v2950_v41, %v1577_v50  ;;  %v1976_v50 = vld [vmem:[#allocation5 + $0x438] sm:$0xff] }
 0xb34   :  { %v1582_v8 = vmul.f32 %v1581_v1, %v1570_v6  ;;  %v1973_v6 = vld [vmem:[#allocation5 + $0x420] sm:$0xff]  ;;  %v1975_v1 = vld [vmem:[#allocation5 + $0x430] sm:$0xff] }
 0xb36   :  { %v1586_v60 = vmul.f32 %v2900_v54, %v1582_v8  ;;  %v1974_v54 = vld [vmem:[#allocation5 + $0x428] sm:$0xff] }
 0xb37   :  { %v1970_v8 = vld [vmem:[#allocation5 + $0x408] sm:$0xff] }
 0xb38   :  { %v3592_v10 = vadd.f32 %v2901_v9, %v1586_v60  ;;  %v1971_v9 = vld [vmem:[#allocation5 + $0x410] sm:$0xff]  ;;  %v1972_v60 = vld [vmem:[#allocation5 + $0x418] sm:$0xff] }
 0xb3a   :  { %1683 = vmatmul.f32.vlgmr.msra.gmra.mxu0 %v3592_v10  ;;  %1703 = vmatmul.f32.vlgmr.msra.gmra.mxu1 %v3592_v10 }
 0xb3b   :  { %1723 = vmatmul.f32.vlgmr.msra.gmra.mxu2 %v3592_v10  ;;  %1743 = vmatmul.f32.vlgmr.msra.gmra.mxu3 %v3592_v10 }
 0xb3c   :  { %1994 = vmatpush.msra.mxu0 %v1982_v58  ;;  %2014 = vmatpush.msra.mxu1 %v1983_v61  ;;  %v2903_v61 = vld [vmem:[#allocation16 + $0x1] ss:$0 sm:$0xff] }
 0xb3d   :  { %2034 = vmatpush.msra.mxu2 %v1984_v31 }
 0xb3e   :  { %1995 = vmatpush.msra.mxu0 %v1979_v62  ;;  %2015 = vmatpush.msra.mxu1 %v1980_v63  ;;  %v2904_v63 = vld [vmem:[#allocation17 + $0x1] ss:$0 sm:$0xff] }
 0xb3f   :  { %2035 = vmatpush.msra.mxu2 %v1981_v0 }
 0xb40   :  { %1996 = vmatpush.msra.mxu0 %v1976_v50  ;;  %2016 = vmatpush.msra.mxu1 %v1977_v4  ;;  %v1986_v4 = vld [vmem:[#allocation7 + $0x6] sm:$0x7] }
 0xb41   :  { %2036 = vmatpush.msra.mxu2 %v1978_v5  ;;  %v1988_v5 = vperm.slane %v1986_v4, 0 }
 0xb42   :  { %1997 = vmatpush.msra.mxu0 %v1973_v6  ;;  %2017 = vmatpush.msra.mxu1 %v1974_v54  ;;  %v1989_v6 = vperm.slane %v1986_v4, 1 }
 0xb43   :  { %2037 = vmatpush.msra.mxu2 %v1975_v1 }
 0xb44   :  { %1998 = vmatpush.msra.mxu0 %v1970_v8  ;;  %2018 = vmatpush.msra.mxu1 %v1971_v9  ;;  %v1990_v9 = vperm.slane %v1986_v4, 2 }
 0xb45   :  { %2038 = vmatpush.msra.mxu2 %v1972_v60 }
 0xb46   :  { %2019 = vmatpush.msra.mxu1 %v1968_v3 }
 0xb47   :  { %2039 = vmatpush.msra.mxu2 %v1969_v7 }
 0xb48   :  { %2020 = vmatpush.msra.mxu1 %v1965_v12 }
 0xb49   :  { %2040 = vmatpush.msra.mxu2 %v1966_v13 }
 0xb4a   :  { %2021 = vmatpush.msra.mxu1 %v1962_v15 }
 0xb4b   :  { %2041 = vmatpush.msra.mxu2 %v1963_v16 }
 0xb4c   :  { %2022 = vmatpush.msra.mxu1 %v1959_v18 }
 0xb4d   :  { %2042 = vmatpush.msra.mxu2 %v1960_v19 }
 0xb4e   :  { %2023 = vmatpush.msra.mxu1 %v1956_v21 }
 0xb4f   :  { %2043 = vmatpush.msra.mxu2 %v1957_v22 }
 0xb50   :  { %2024 = vmatpush.msra.mxu1 %v1953_v24 }
 0xb51   :  { %2044 = vmatpush.msra.mxu2 %v1954_v25 }
 0xb52   :  { %2025 = vmatpush.msra.mxu1 %v1950_v27 }
 0xbb7   :  { %v1684_v30 = vpop.f32.mrf.mxu0  ;;  %v1704_v32 = vpop.f32.mrf.mxu1 }
 0xbb8   :  { %v1685_v33 = vadd.f32 %v1684_v30, %v1659_v28  ;;  %v1705_v34 = vadd.f32 %v1704_v32, %v1660_v29  ;;  %v1951_v28 = vld [vmem:[#allocation5 + $0x370] sm:$0xff]  ;;  %v1946_v29 = vld [vmem:[#allocation5 + $0x348] sm:$0xff]  ;;  %v1948_v32 = vld [vmem:[#allocation5 + $0x358] sm:$0xff] }
 0xbb9   :  { %2045 = vmatpush.msra.mxu2 %v1951_v28  ;;  %v1947_v30 = vld [vmem:[#allocation5 + $0x350] sm:$0xff] }
 0xbba   :  { %v1747_v35 = vmax.f32 %v1685_v33, 0.0  ;;  %v1748_v36 = vmax.f32 %v1705_v34, 0.0  ;;  %2026 = vmatpush.msra.mxu1 %v1947_v30  ;;  %v1943_v34 = vld [vmem:[#allocation5 + $0x330] sm:$0xff] }
 0xbbb   :  { %2046 = vmatpush.msra.mxu2 %v1948_v32 }
 0xbbc   :  { %1837 = vmatmul.f32.vlgmr.msrb.gmra.mxu0 %v1747_v35  ;;  %1857 = vmatmul.f32.vlgmr.msrb.gmra.mxu1 %v1748_v36  ;;  %v1944_v35 = vld [vmem:[#allocation5 + $0x338] sm:$0xff]  ;;  %v1945_v36 = vld [vmem:[#allocation5 + $0x340] sm:$0xff] }
 0xbbd   :  { %2027 = vmatpush.msra.mxu1 %v1944_v35  ;;  %2047 = vmatpush.msra.mxu2 %v1945_v36 }
 0xbbe   :  { %v1724_v39 = vpop.f32.mrf.mxu2  ;;  %v1744_v40 = vpop.f32.mrf.mxu3 }
 0xbbf   :  { %v1725_v41 = vadd.f32 %v1724_v39, %v1661_v37  ;;  %v1745_v42 = vadd.f32 %v1744_v40, %v1662_v38  ;;  %v1940_v37 = vld [vmem:[#allocation5 + $0x318] sm:$0xff]  ;;  %v1941_v38 = vld [vmem:[#allocation5 + $0x320] sm:$0xff]  ;;  %v1942_v39 = vld [vmem:[#allocation5 + $0x328] sm:$0xff] }
 0xbc0   :  { %v1937_v40 = vld [vmem:[#allocation5 + $0x300] sm:$0xff]  ;;  %2028 = vmatpush.msra.mxu1 %v1941_v38  ;;  %2048 = vmatpush.msra.mxu2 %v1942_v39 }
 0xbc1   :  { %v1749_v43 = vmax.f32 %v1725_v41, 0.0  ;;  %v1750_v44 = vmax.f32 %v1745_v42, 0.0  ;;  %v1938_v41 = vld [vmem:[#allocation5 + $0x308] sm:$0xff]  ;;  %v1939_v42 = vld [vmem:[#allocation5 + $0x310] sm:$0xff] }
 0xbc2   :  { %2029 = vmatpush.msra.mxu1 %v1938_v41  ;;  %2049 = vmatpush.msra.mxu2 %v1939_v42 }
 0xbc3   :  { %1877 = vmatmul.f32.vlgmr.msrb.gmra.mxu2 %v1749_v43  ;;  %1897 = vmatmul.f32.vlgmr.msrb.gmra.mxu3 %v1750_v44 }
 0xc39   :  { %v1838_v46 = vpop.f32.mrf.mxu0  ;;  %v1858_v48 = vpop.f32.mrf.mxu1 }
 0xc3a   :  { %v1839_v47 = vadd.f32 %v2902_v45, %v1838_v46 }
 0xc3c   :  { %v1859_v49 = vadd.f32 %v1858_v48, %v1839_v47 }
 0xc46   :  { %v1878_v51 = vpop.f32.mrf.mxu2  ;;  %v1898_v53 = vpop.f32.mrf.mxu3 }
 0xc47   :  { %v1879_v52 = vadd.f32 %v1878_v51, %v1859_v49 }
 0xc49   :  { %v1899_v55 = vadd.f32 %v1898_v53, %v1879_v52 }
 0xc4b   :  { %v3602_v56 = vadd.f32 %v1899_v55, %v3592_v10  ;;  %v1967_v10 = vld [vmem:[#allocation5 + $0x3f0] sm:$0xff] }
 0xc4c   :  { %1999 = vmatpush.msra.mxu0 %v1967_v10 }
 0xc4d   :  { %1906 = vadd.xlane.f32.xlu0 %v3602_v56  ;;  %v1909_v57 = vmul.f32 %v3602_v56, %v3602_v56 }
 0xc4e   :  { %2000 = vmatpush.msra.mxu0 %v1964_v11 }
 0xc50   :  { %2001 = vmatpush.msra.mxu0 %v1961_v14 }
 0xc52   :  { %2002 = vmatpush.msra.mxu0 %v1958_v17 }
 0xc54   :  { %2003 = vmatpush.msra.mxu0 %v1955_v20 }
 0xc55   :  { %1910 = vadd.xlane.f32.xlu0 %v1909_v57 }
 0xc56   :  { %2004 = vmatpush.msra.mxu0 %v1952_v23 }
 0xc58   :  { %2005 = vmatpush.msra.mxu0 %v1949_v26 }
 0xc5a   :  { %2006 = vmatpush.msra.mxu0 %v1946_v29 }
 0xc5c   :  { %2007 = vmatpush.msra.mxu0 %v1943_v34 }
 0xc5e   :  { %2008 = vmatpush.msra.mxu0 %v1940_v37 }
 0xc60   :  { %2009 = vmatpush.msra.mxu0 %v1937_v40 }
 0xcc0   :  { %v1907_v33 = vpop.xlane.xlu0 %1906 }
 0xcc1   :  { %v1908_v43 = vmul.f32 %v1907_v33, %v3473_v59 }
 0xcc3   :  { %v1913_v45 = vmul.f32 %v1908_v43, %v1908_v43  ;;  %v1915_v58 = vsub.f32 %v3602_v56, %v1908_v43 }
 0xcc8   :  { %v1911_v44 = vpop.xlane.xlu0 %1910 }
 0xcc9   :  { %v1912_v46 = vmul.f32 %v1911_v44, %v3473_v59 }
 0xccb   :  { %v1914_v47 = vsub.f32 %v1912_v46, %v1913_v45 }
 0xccd   :  { %v1916_v48 = vadd.f32 1e-05, %v1914_v47 }
 0xccf   :  { %2951 = vrsqrt.f32 %v1916_v48  ;;  %vm1923_vm13 = vweird.f32 %v1916_v48 }
 0xcd5   :  { %v2952_v49 = vpop.eup %2951 }
 0xcd6   :  { %v1918_v51 = vmul.f32 %v2952_v49, %v1916_v48  ;;  %vm1924_vm12 = vweird.f32 %v2952_v49 }
 0xcd7   :  { %vm1925_vm14 = vmor %vm1923_vm13, %vm1924_vm12 }
 0xcd8   :  { %v1919_v52 = vmul.f32 %v2952_v49, %v1918_v51 }
 0xcda   :  { %v1920_v53 = vmul.f32 0.5, %v1919_v52 }
 0xcdc   :  { %v1921_v55 = vsub.f32 1.5, %v1920_v53 }
 0xcde   :  { %v1922_v57 = vmul.f32 %v2952_v49, %v1921_v55 }
 0xce0   :  { %v1926_v31 = vsel %vm1925_vm14, %v2952_v49, %v1922_v57 }
 0xce1   :  { %v1927_v62 = vmul.f32 %v1926_v31, %v1915_v58 }
 0xce3   :  { %v1931_v0 = vmul.f32 %v2903_v61, %v1927_v62 }
 0xce5   :  { %v3610_v50 = vadd.f32 %v2904_v63, %v1931_v0 }
 0xce7   :  { %2010 = vmatmul.f32.vlgmr.msra.gmra.mxu0 %v3610_v50  ;;  %2030 = vmatmul.f32.vlgmr.msra.gmra.mxu1 %v3610_v50 }
 0xce8   :  { %2050 = vmatmul.f32.vlgmr.msra.gmra.mxu2 %v3610_v50 }
 0xd64   :  { %v2011_v54 = vpop.f32.mrf.mxu0  ;;  %v2031_v1 = vpop.f32.mrf.mxu1 }
 0xd65   :  { %v2012_v56 = vadd.f32 %v2011_v54, %v1988_v5  ;;  %v2032_v8 = vadd.f32 %v2031_v1, %v1989_v6 }
 0xd67   :  { %2062 = vrot.lane.b32.xlu2 %v2032_v8, %s3273_s12  ;;  %2066 = vrot.lane.b32.xlu1 %v2032_v8, %s3269_s9 }
 0xd68   :  { %2853 = vmatpush.xpose.msk.msra.mxu3 %vm343_vm0, %v2032_v8  ;;  %2059 = vrot.lane.b32.xlu0 %v2012_v56, %s3269_s9 }
 0xd6b   :  { %v2051_v60 = vpop.f32.mrf.mxu2  ;;  %2854 = vmatmul.msk.f32.vlgmr.msra.gmra.mxu3 %vm343_vm0, %v2012_v56 }
 0xd6c   :  { %v2052_v10 = vadd.f32 %v2051_v60, %v1990_v9 }
 0xd6e   :  { %2292 = vmatpush.msrb.mxu3 %v2052_v10 }
 0xd6f   :  { %2057 = vrot.lane.b32.xlu2 %v2012_v56, %s3258_s28  ;;  %2055 = vrot.lane.b32.xlu1 %v2012_v56, %s3273_s12 }
 0xd70   :  { %2064 = vrot.lane.b32.xlu0 %v2032_v8, %s3258_s28 }
 0xdc1   :  { %v2063_v3 = vpop.permute.xlu2 %2062 }
 0xdc2   :  { %2855 = vmatpush.xpose.msk.msrb.mxu0 %vm343_vm0, %v2063_v3 }
 0xdc9   :  { %v2058_v14 = vpop.permute.xlu2 %2057 }
 0xdd9   :  { %v2067_v7 = vpop.permute.xlu1 %2066 }
 0xdda   :  { %v2060_v11 = vpop.permute.xlu0 %2059  ;;  %2859 = vmatpush.xpose.msk.msrb.mxu2 %vm343_vm0, %v2067_v7 }
 0xddd   :  { %2860 = vmatmul.msk.f32.vlgmr.msrb.gmra.mxu2 %vm343_vm0, %v2060_v11 }
 0xde1   :  { %v2056_v12 = vpop.permute.xlu1 %2055 }
 0xde2   :  { %v2065_v13 = vpop.permute.xlu0 %2064  ;;  %2856 = vmatmul.msk.f32.vlgmr.msrb.gmra.mxu0 %vm343_vm0, %v2056_v12 }
 0xde3   :  { %2857 = vmatpush.xpose.msk.msrb.mxu1 %vm343_vm0, %v2065_v13 }
 0xde6   :  { %2858 = vmatmul.msk.f32.vlgmr.msrb.gmra.mxu1 %vm343_vm0, %v2058_v14 }
 0xdee   :  { %v2099_v22 = vpop.f32.mrf.mxu3 }
 0xdef   :  { %v2174_v25 = vsel %vm202_vm1, %v2099_v22, -1e+30 }
 0xdf0   :  { %v2178_v26 = vsel %vm444_vm2, %v2174_v25, -inf }
 0xe5f   :  { %v2123_v15 = vpop.f32.mrf.mxu0 }
 0xe60   :  { %v2175_v16 = vsel %vm202_vm1, %v2123_v15, -1e+30  ;;  %v2171_v17 = vpop.f32.mrf.mxu2 }
 0xe61   :  { %v2177_v18 = vsel %vm202_vm1, %v2171_v17, -1e+30  ;;  %v2181_v19 = vsel %vm444_vm2, %v2175_v16, -inf }
 0xe62   :  { %2182 = vmax.xlane.f32.xlu1 %v2181_v19  ;;  %v2187_v20 = vsel %vm444_vm2, %v2177_v18, -inf }
 0xe63   :  { %v2147_v21 = vpop.f32.mrf.mxu1  ;;  %2188 = vmax.xlane.f32.xlu0 %v2187_v20 }
 0xe64   :  { %v2176_v23 = vsel %vm202_vm1, %v2147_v21, -1e+30 }
 0xe65   :  { %v2184_v24 = vsel %vm444_vm2, %v2176_v23, -inf }
 0xe66   :  { %2185 = vmax.xlane.f32.xlu2 %v2184_v24 }
 0xe6b   :  { %2179 = vmax.xlane.f32.xlu0 %v2178_v26 }
 0xed5   :  { %v2183_v27 = vpop.xlane.xlu1 %2182 }
 0xed6   :  { %v2191_v28 = vsub.f32 %v2175_v16, %v2183_v27  ;;  %v2189_v29 = vpop.xlane.xlu0 %2188 }
 0xed7   :  { %v2193_v30 = vsub.f32 %v2177_v18, %v2189_v29 }
 0xed8   :  { %v2196_v32 = vmul.f32 1.442695, %v2191_v28 }
 0xed9   :  { %v2200_v33 = vmul.f32 1.442695, %v2193_v30  ;;  %v2186_v34 = vpop.xlane.xlu2 %2185 }
 0xeda   :  { %2953 = vpow2.f32 %v2196_v32  ;;  %v2192_v35 = vsub.f32 %v2176_v23, %v2186_v34 }
 0xedb   :  { %2955 = vpow2.f32 %v2200_v33 }
 0xedc   :  { %v2198_v36 = vmul.f32 1.442695, %v2192_v35 }
 0xede   :  { %2957 = vpow2.f32 %v2198_v36  ;;  %v2180_v42 = vpop.xlane.xlu0 %2179 }
 0xedf   :  { %v2190_v43 = vsub.f32 %v2174_v25, %v2180_v42  ;;  %v2394_v42 = vld [vmem:[#allocation8 + $0x160] sm:$0xff] }
 0xee0   :  { %v3641_v37 = vpop.eup %2953 }
 0xee1   :  { %v3643_v38 = vpop.eup %2955  ;;  %v2205_v2 = vsel %vm444_vm2, %v3641_v37, 0.0  ;;  %v2194_v44 = vmul.f32 1.442695, %v2190_v43  ;;  %v2393_v43 = vld [vmem:[#allocation8 + $0x158] sm:$0xff] }
 0xee2   :  { %2206 = vadd.xlane.f32.xlu1 %v2205_v2  ;;  %v2211_v39 = vsel %vm444_vm2, %v3643_v38, 0.0 }
 0xee3   :  { %2212 = vadd.xlane.f32.xlu2 %v2211_v39  ;;  %2959 = vpow2.f32 %v2194_v44  ;;  %v2397_v39 = vld [vmem:[#allocation8 + $0x178] sm:$0xff]  ;;  %v2392_v44 = vld [vmem:[#allocation8 + $0x150] sm:$0xff] }
 0xee4   :  { %v3649_v40 = vpop.eup %2957  ;;  %2403 = vmatpush.msra.mxu3 %v2397_v39  ;;  %v2490_v39 = vld [vmem:[#allocation10 + $0x4f8] sm:$0xff] }
 0xee5   :  { %v2208_v41 = vsel %vm444_vm2, %v3649_v40, 0.0 }
 0xee6   :  { %2209 = vadd.xlane.f32.xlu0 %v2208_v41  ;;  %v2395_v41 = vld [vmem:[#allocation8 + $0x168] sm:$0xff] }
 0xee9   :  { %v3656_v45 = vpop.eup %2959 }
 0xeea   :  { %v2202_v46 = vsel %vm444_vm2, %v3656_v45, 0.0 }
 0xefa   :  { %2072 = vrot.lane.b32.xlu0 %v2052_v10, %s3258_s28 }
 0xefb   :  { %2069 = vrot.lane.b32.xlu1 %v2052_v10, %s3273_s12  ;;  %2075 = vrot.lane.b32.xlu2 %v2052_v10, %s3269_s9 }
 0xf24   :  { %2203 = vadd.xlane.f32.xlu2 %v2202_v46  ;;  %v2390_v46 = vld [vmem:[#allocation8 + $0x140] sm:$0xff] }
 0xf55   :  { %v2207_v47 = vpop.xlane.xlu1 %2206 }
 0xf56   :  { %2961 = vrcp.f32 %v2207_v47  ;;  %v2213_v48 = vpop.xlane.xlu2 %2212  ;;  %vm2234_vm1 = vweird.f32 %v2207_v47  ;;  %v2238_v54 = vand.u32 2147483647, %v2207_v47  ;;  %v2240_v56 = vand.u32 2147483648, %v2207_v47 }
 0xf57   :  { %2963 = vrcp.f32 %v2213_v48  ;;  %v2270_v63 = vand.u32 2147483648, %v2213_v48  ;;  %v2268_v5 = vand.u32 2147483647, %v2213_v48  ;;  %vm2264_vm4 = vweird.f32 %v2213_v48 }
 0xf58   :  { %v2241_v14 = vor.u32 1.1754944e-38, %v2240_v56  ;;  %vm2239_vm13 = vcmp.eq.f32.partialorder %v2238_v54, 8.507059e+37 }
 0xf59   :  { %v2210_v49 = vpop.xlane.xlu0 %2209  ;;  %v2271_v60 = vor.u32 1.1754944e-38, %v2270_v63  ;;  %vm2269_vm10 = vcmp.eq.f32.partialorder %v2268_v5, 8.507059e+37  ;;  %v2905_v5 = vld [vmem:[%s3720_s4 + $0x2] ss:$0 sm:$0xff] }
 0xf5a   :  { %2965 = vrcp.f32 %v2210_v49  ;;  %v2255_v9 = vand.u32 2147483648, %v2210_v49  ;;  %v2253_v3 = vand.u32 2147483647, %v2210_v49  ;;  %vm2249_vm11 = vweird.f32 %v2210_v49 }
 0xf5c   :  { %v2962_v51 = vpop.eup %2961  ;;  %v2256_v15 = vor.u32 1.1754944e-38, %v2255_v9  ;;  %vm2254_vm14 = vcmp.eq.f32.partialorder %v2253_v3, 8.507059e+37  ;;  %v2520_v9 = vld [vmem:[#allocation10 + $0x5e8] sm:$0xff]  ;;  %v2515_v3 = vld [vmem:[#allocation10 + $0x5c0] sm:$0xff] }
 0xf5d   :  { %v2964_v52 = vpop.eup %2963  ;;  %v2230_v53 = vmul.f32 %v2962_v51, %v2207_v47  ;;  %vm2235_vm3 = vweird.f32 %v2962_v51  ;;  %v2389_v47 = vld [vmem:[#allocation8 + $0x138] sm:$0xff] }
 0xf5e   :  { %v2260_v55 = vmul.f32 %v2964_v52, %v2213_v48  ;;  %v2076_v57 = vpop.permute.xlu2 %2075  ;;  %vm2265_vm15 = vweird.f32 %v2964_v52  ;;  %vm2236_vm9 = vmor %vm2234_vm1, %vm2235_vm3  ;;  %v2388_v48 = vld [vmem:[#allocation8 + $0x130] sm:$0xff] }
 0xf5f   :  { %v2231_v58 = vsub.f32 1.0, %v2230_v53  ;;  %2361 = vmatpush.msra.mxu2 %v2076_v57  ;;  %vm2266_vm5 = vmor %vm2264_vm4, %vm2265_vm15  ;;  %v2384_v53 = vld [vmem:[#allocation8 + $0x110] sm:$0xff]  ;;  %v2382_v57 = vld [vmem:[#allocation8 + $0x100] sm:$0xff] }
 0xf60   :  { %v2966_v61 = vpop.eup %2965  ;;  %v2261_v31 = vsub.f32 1.0, %v2260_v55  ;;  %v2383_v55 = vld [vmem:[#allocation8 + $0x108] sm:$0xff] }
 0xf61   :  { %v2232_v62 = vmul.f32 %v2962_v51, %v2231_v58  ;;  %v2245_v0 = vmul.f32 %v2966_v61, %v2210_v49  ;;  %vm2250_vm8 = vweird.f32 %v2966_v61  ;;  %v2387_v49 = vld [vmem:[#allocation8 + $0x128] sm:$0xff] }
 0xf62   :  { %v2262_v4 = vmul.f32 %v2964_v52, %v2261_v31  ;;  %vm2251_vm12 = vmor %vm2249_vm11, %vm2250_vm8 }
 0xf63   :  { %v2233_v6 = vadd.f32 %v2962_v51, %v2232_v62  ;;  %v2246_v1 = vsub.f32 1.0, %v2245_v0 }
 0xf64   :  { %v2263_v8 = vadd.f32 %v2964_v52, %v2262_v4 }
 0xf65   :  { %v2247_v10 = vmul.f32 %v2966_v61, %v2246_v1  ;;  %v2237_v11 = vsel %vm2236_vm9, %v2962_v51, %v2233_v6  ;;  %v2386_v51 = vld [vmem:[#allocation8 + $0x120] sm:$0xff] }
 0xf66   :  { %v2267_v7 = vsel %vm2266_vm5, %v2964_v52, %v2263_v8  ;;  %v2242_v18 = vsel %vm2239_vm13, %v2241_v14, %v2237_v11  ;;  %v2385_v52 = vld [vmem:[#allocation8 + $0x118] sm:$0xff]  ;;  %v2519_v8 = vld [vmem:[#allocation10 + $0x5e0] sm:$0xff]  ;;  %v2517_v11 = vld [vmem:[#allocation10 + $0x5d0] sm:$0xff] }
 0xf67   :  { %v2272_v12 = vsel %vm2269_vm10, %v2271_v60, %v2267_v7  ;;  %v2248_v13 = vadd.f32 %v2966_v61, %v2247_v10  ;;  %v2243_v23 = vmul.f32 %v3641_v37, %v2242_v18  ;;  %v2521_v60 = vld [vmem:[#allocation10 + $0x5f0] sm:$0xff]  ;;  %v2522_v10 = vld [vmem:[#allocation10 + $0x5f8] sm:$0xff]  ;;  %v2516_v7 = vld [vmem:[#allocation10 + $0x5c8] sm:$0xff] }
 0xf68   :  { %v2273_v16 = vmul.f32 %v3643_v38, %v2272_v12  ;;  %2574 = vmatpush.msrb.mxu2 %v2521_v60  ;;  %v2511_v12 = vld [vmem:[#allocation10 + $0x5a0] sm:$0xff]  ;;  %v2513_v14 = vld [vmem:[#allocation10 + $0x5b0] sm:$0xff] }
 0xf69   :  { %v2252_v17 = vsel %vm2251_vm12, %v2966_v61, %v2248_v13  ;;  %v2512_v13 = vld [vmem:[#allocation10 + $0x5a8] sm:$0xff]  ;;  %v2509_v18 = vld [vmem:[#allocation10 + $0x590] sm:$0xff] }
 0xf6a   :  { %v2257_v19 = vsel %vm2254_vm14, %v2256_v15, %v2252_v17  ;;  %2864 = vmatmul.msk.f32.vlgmr.msra.gmra.mxu2 %vm444_vm2, %v2273_v16  ;;  %v2514_v15 = vld [vmem:[#allocation10 + $0x5b8] sm:$0xff]  ;;  %v2507_v16 = vld [vmem:[#allocation10 + $0x580] sm:$0xff]  ;;  %v2508_v17 = vld [vmem:[#allocation10 + $0x588] sm:$0xff] }
 0xf6b   :  { %v2258_v20 = vmul.f32 %v3649_v40, %v2257_v19  ;;  %v2396_v40 = vld [vmem:[#allocation8 + $0x170] sm:$0xff]  ;;  %2575 = vmatpush.msrb.mxu2 %v2517_v11  ;;  %v2510_v19 = vld [vmem:[#allocation10 + $0x598] sm:$0xff]  ;;  %v2650_v11 = vld [vmem:[#allocation13 + $0x4f8] sm:$0xff] }
 0xf6c   :  { %v2073_v21 = vpop.permute.xlu0 %2072  ;;  %2404 = vmatpush.msra.mxu3 %v2396_v40  ;;  %v2483_v40 = vld [vmem:[#allocation10 + $0x4c0] sm:$0xff] }
 0xf6d   :  { %2338 = vmatpush.msra.mxu1 %v2073_v21  ;;  %v2070_v22 = vpop.permute.xlu1 %2069  ;;  %2576 = vmatpush.msrb.mxu2 %v2513_v14  ;;  %v2504_v21 = vld [vmem:[#allocation10 + $0x568] sm:$0xff]  ;;  %v2649_v14 = vld [vmem:[#allocation13 + $0x4f0] sm:$0xff] }
 0xf6e   :  { %2863 = vmatmul.msk.f32.vlgmr.msra.gmra.mxu1 %vm444_vm2, %v2258_v20  ;;  %2315 = vmatpush.msra.mxu0 %v2070_v22  ;;  %v2503_v20 = vld [vmem:[#allocation10 + $0x560] sm:$0xff]  ;;  %v2505_v22 = vld [vmem:[#allocation10 + $0x570] sm:$0xff] }
 0xf6f   :  { %2862 = vmatmul.msk.f32.vlgmr.msra.gmra.mxu0 %vm444_vm2, %v2243_v23  ;;  %2405 = vmatpush.msra.mxu3 %v2395_v41  ;;  %v2506_v23 = vld [vmem:[#allocation10 + $0x578] sm:$0xff]  ;;  %v2484_v41 = vld [vmem:[#allocation10 + $0x4c8] sm:$0xff] }
 0xf70   :  { %2534 = vmatpush.msrb.mxu0 %v2519_v8  ;;  %2554 = vmatpush.msrb.mxu1 %v2520_v9  ;;  %v2461_v8 = vld [vmem:[#allocation10 + $0x410] sm:$0xff]  ;;  %v2462_v9 = vld [vmem:[#allocation10 + $0x418] sm:$0xff] }
 0xf71   :  { %2406 = vmatpush.msra.mxu3 %v2394_v42  ;;  %2577 = vmatpush.msrb.mxu2 %v2509_v18  ;;  %v2485_v42 = vld [vmem:[#allocation10 + $0x4d0] sm:$0xff] }
 0xf72   :  { %2535 = vmatpush.msrb.mxu0 %v2515_v3  ;;  %2555 = vmatpush.msrb.mxu1 %v2516_v7  ;;  %v2634_v7 = vld [vmem:[#allocation13 + $0x478] sm:$0xff] }
 0xf73   :  { %2407 = vmatpush.msra.mxu3 %v2393_v43  ;;  %2578 = vmatpush.msrb.mxu2 %v2505_v22  ;;  %v2486_v43 = vld [vmem:[#allocation10 + $0x4d8] sm:$0xff] }
 0xf74   :  { %2536 = vmatpush.msrb.mxu0 %v2511_v12  ;;  %2556 = vmatpush.msrb.mxu1 %v2512_v13  ;;  %v2665_v22 = vld [vmem:[#allocation13 + $0x570] sm:$0xff] }
 0xf75   :  { %2408 = vmatpush.msra.mxu3 %v2392_v44  ;;  %v2479_v44 = vld [vmem:[#allocation10 + $0x4a0] sm:$0xff] }
 0xf76   :  { %2537 = vmatpush.msrb.mxu0 %v2507_v16  ;;  %2557 = vmatpush.msrb.mxu1 %v2508_v17  ;;  %v2648_v16 = vld [vmem:[#allocation13 + $0x4e8] sm:$0xff]  ;;  %v2666_v17 = vld [vmem:[#allocation13 + $0x578] sm:$0xff] }
 0xf78   :  { %2538 = vmatpush.msrb.mxu0 %v2503_v20  ;;  %2558 = vmatpush.msrb.mxu1 %v2504_v21  ;;  %v2682_v20 = vld [vmem:[#allocation13 + $0x5f8] sm:$0xff]  ;;  %v2647_v21 = vld [vmem:[#allocation13 + $0x4e0] sm:$0xff] }
 0xf97   :  { %v2204_v24 = vpop.xlane.xlu2 %2203 }
 0xf98   :  { %2967 = vrcp.f32 %v2204_v24  ;;  %v2225_v28 = vand.u32 2147483648, %v2204_v24  ;;  %v2223_v30 = vand.u32 2147483647, %v2204_v24  ;;  %vm2219_vm15 = vweird.f32 %v2204_v24 }
 0xf9a   :  { %v2226_v33 = vor.u32 1.1754944e-38, %v2225_v28  ;;  %vm2224_vm4 = vcmp.eq.f32.partialorder %v2223_v30, 8.507059e+37  ;;  %v2495_v28 = vld [vmem:[#allocation10 + $0x520] sm:$0xff]  ;;  %v2497_v30 = vld [vmem:[#allocation10 + $0x530] sm:$0xff] }
 0xf9e   :  { %v2968_v25 = vpop.eup %2967 }
 0xf9f   :  { %v2215_v26 = vmul.f32 %v2968_v25, %v2204_v24  ;;  %vm2220_vm1 = vweird.f32 %v2968_v25  ;;  %v2499_v24 = vld [vmem:[#allocation10 + $0x540] sm:$0xff] }
 0xfa0   :  { %vm2221_vm3 = vmor %vm2219_vm15, %vm2220_vm1  ;;  %2539 = vmatpush.msrb.mxu0 %v2499_v24 }
 0xfa1   :  { %v2216_v27 = vsub.f32 1.0, %v2215_v26  ;;  %v2501_v26 = vld [vmem:[#allocation10 + $0x550] sm:$0xff] }
 0xfa2   :  { %2579 = vmatpush.msrb.mxu2 %v2501_v26  ;;  %2540 = vmatpush.msrb.mxu0 %v2495_v28  ;;  %v2680_v26 = vld [vmem:[#allocation13 + $0x5e8] sm:$0xff]  ;;  %v2646_v28 = vld [vmem:[#allocation13 + $0x4d8] sm:$0xff] }
 0xfa3   :  { %v2217_v29 = vmul.f32 %v2968_v25, %v2216_v27  ;;  %v2502_v27 = vld [vmem:[#allocation10 + $0x558] sm:$0xff] }
 0xfa4   :  { %2580 = vmatpush.msrb.mxu2 %v2497_v30  ;;  %v2679_v30 = vld [vmem:[#allocation13 + $0x5e0] sm:$0xff] }
 0xfa5   :  { %v2218_v32 = vadd.f32 %v2968_v25, %v2217_v29  ;;  %v2496_v29 = vld [vmem:[#allocation10 + $0x528] sm:$0xff] }
 0xfa7   :  { %v2222_v34 = vsel %vm2221_vm3, %v2968_v25, %v2218_v32  ;;  %v2500_v25 = vld [vmem:[#allocation10 + $0x548] sm:$0xff]  ;;  %v2498_v32 = vld [vmem:[#allocation10 + $0x538] sm:$0xff] }
 0xfa8   :  { %v2227_v35 = vsel %vm2224_vm4, %v2226_v33, %v2222_v34  ;;  %2559 = vmatpush.msrb.mxu1 %v2500_v25  ;;  %v2491_v33 = vld [vmem:[#allocation10 + $0x500] sm:$0xff]  ;;  %v2492_v34 = vld [vmem:[#allocation10 + $0x508] sm:$0xff]  ;;  %v2664_v25 = vld [vmem:[#allocation13 + $0x568] sm:$0xff] }
 0xfa9   :  { %v2228_v36 = vmul.f32 %v3656_v45, %v2227_v35  ;;  %v2391_v45 = vld [vmem:[#allocation8 + $0x148] sm:$0xff]  ;;  %v2493_v35 = vld [vmem:[#allocation10 + $0x510] sm:$0xff]  ;;  %2541 = vmatpush.msrb.mxu0 %v2491_v33  ;;  %v2645_v33 = vld [vmem:[#allocation13 + $0x4d0] sm:$0xff] }
 0xfaa   :  { %2409 = vmatpush.msra.mxu3 %v2391_v45  ;;  %2560 = vmatpush.msrb.mxu1 %v2496_v29  ;;  %v2480_v45 = vld [vmem:[#allocation10 + $0x4a8] sm:$0xff] }
 0xfab   :  { %2861 = vmatmul.msk.f32.vlgmr.msrb.gmra.mxu3 %vm444_vm2, %v2228_v36  ;;  %v2494_v36 = vld [vmem:[#allocation10 + $0x518] sm:$0xff]  ;;  %2581 = vmatpush.msrb.mxu2 %v2493_v35  ;;  %v2663_v29 = vld [vmem:[#allocation13 + $0x560] sm:$0xff]  ;;  %v2678_v35 = vld [vmem:[#allocation13 + $0x5d8] sm:$0xff] }
 0xfac   :  { %2410 = vmatpush.msra.mxu3 %v2390_v46  ;;  %2561 = vmatpush.msrb.mxu1 %v2492_v34  ;;  %v2481_v46 = vld [vmem:[#allocation10 + $0x4b0] sm:$0xff]  ;;  %v2662_v34 = vld [vmem:[#allocation13 + $0x558] sm:$0xff] }
 0xfae   :  { %2411 = vmatpush.msra.mxu3 %v2389_v47  ;;  %v2482_v47 = vld [vmem:[#allocation10 + $0x4b8] sm:$0xff] }
 0xfb0   :  { %2412 = vmatpush.msra.mxu3 %v2388_v48  ;;  %v2475_v48 = vld [vmem:[#allocation10 + $0x480] sm:$0xff] }
 0xfb2   :  { %2413 = vmatpush.msra.mxu3 %v2387_v49  ;;  %v2476_v49 = vld [vmem:[#allocation10 + $0x488] sm:$0xff] }
 0xfb4   :  { %2414 = vmatpush.msra.mxu3 %v2386_v51  ;;  %v2477_v51 = vld [vmem:[#allocation10 + $0x490] sm:$0xff] }
 0xfb6   :  { %2415 = vmatpush.msra.mxu3 %v2385_v52  ;;  %v2478_v52 = vld [vmem:[#allocation10 + $0x498] sm:$0xff] }
 0xfb8   :  { %2416 = vmatpush.msra.mxu3 %v2384_v53  ;;  %v2471_v53 = vld [vmem:[#allocation10 + $0x460] sm:$0xff] }
 0xfba   :  { %2417 = vmatpush.msra.mxu3 %v2383_v55  ;;  %v2472_v55 = vld [vmem:[#allocation10 + $0x468] sm:$0xff] }
 0xfbc   :  { %2418 = vmatpush.msra.mxu3 %v2382_v57  ;;  %v2473_v57 = vld [vmem:[#allocation10 + $0x470] sm:$0xff] }
 0xfbe   :  { %2594 = vmatpush.msrb.mxu3 %v2522_v10 }
 0xfeb   :  { %v2340_v37 = vpop.f32.mrf.mxu1 }
 0xfec   :  { %2371 = vrot.lane.b32.xlu1 %v2340_v37, %s3258_s28  ;;  %v2317_v38 = vpop.f32.mrf.mxu0  ;;  %v2487_v37 = vld [vmem:[#allocation10 + $0x4e0] sm:$0xff] }
 0xfed   :  { %2367 = vrot.lane.b32.xlu0 %v2317_v38, %s3269_s9  ;;  %v2363_v2 = vpop.f32.mrf.mxu2  ;;  %v2488_v38 = vld [vmem:[#allocation10 + $0x4e8] sm:$0xff]  ;;  %2542 = vmatpush.msrb.mxu0 %v2487_v37  ;;  %v2644_v37 = vld [vmem:[#allocation13 + $0x4c8] sm:$0xff] }
 0xfee   :  { %2562 = vmatpush.msrb.mxu1 %v2488_v38  ;;  %v2661_v38 = vld [vmem:[#allocation13 + $0x550] sm:$0xff] }
 0xfef   :  { %2543 = vmatpush.msrb.mxu0 %v2483_v40  ;;  %v2643_v40 = vld [vmem:[#allocation13 + $0x4c0] sm:$0xff] }
 0xff0   :  { %2563 = vmatpush.msrb.mxu1 %v2484_v41 }
 0xff1   :  { %2544 = vmatpush.msrb.mxu0 %v2479_v44 }
 0xff2   :  { %2564 = vmatpush.msrb.mxu1 %v2480_v45  ;;  %v2626_v45 = vld [vmem:[#allocation13 + $0x438] sm:$0xff] }
 0xff3   :  { %2545 = vmatpush.msrb.mxu0 %v2475_v48  ;;  %v2675_v48 = vld [vmem:[#allocation13 + $0x5c0] sm:$0xff] }
 0xff4   :  { %2565 = vmatpush.msrb.mxu1 %v2476_v49 }
 0xff5   :  { %2375 = vrot.lane.b32.xlu0 %v2363_v2, %s3273_s12  ;;  %v2489_v2 = vld [vmem:[#allocation10 + $0x4f0] sm:$0xff]  ;;  %2546 = vmatpush.msrb.mxu0 %v2471_v53  ;;  %v2658_v53 = vld [vmem:[#allocation13 + $0x538] sm:$0xff] }
 0xff6   :  { %2582 = vmatpush.msrb.mxu2 %v2489_v2  ;;  %2566 = vmatpush.msrb.mxu1 %v2472_v55  ;;  %v2677_v2 = vld [vmem:[#allocation13 + $0x5d0] sm:$0xff]  ;;  %v2674_v55 = vld [vmem:[#allocation13 + $0x5b8] sm:$0xff] }
 0xff8   :  { %2583 = vmatpush.msrb.mxu2 %v2485_v42  ;;  %v2660_v42 = vld [vmem:[#allocation13 + $0x548] sm:$0xff] }
 0xffa   :  { %2584 = vmatpush.msrb.mxu2 %v2481_v46  ;;  %v2642_v46 = vld [vmem:[#allocation13 + $0x4b8] sm:$0xff] }
 0xffc   :  { %2585 = vmatpush.msrb.mxu2 %v2477_v51  ;;  %v2625_v51 = vld [vmem:[#allocation13 + $0x430] sm:$0xff] }
 0xffe   :  { %2586 = vmatpush.msrb.mxu2 %v2473_v57 }
0x102e   :  { %v2294_v61 = vpop.f32.mrf.mxu3 }
0x105e   :  { %v2372_v62 = vpop.permute.xlu1 %2371 }
0x105f   :  { %v2368_v58 = vpop.permute.xlu0 %2367 }
0x1060   :  { %v2378_v31 = vsel %vm343_vm0, %v2294_v61, %v2368_v58  ;;  %v2474_v58 = vld [vmem:[#allocation10 + $0x478] sm:$0xff]  ;;  %v2467_v61 = vld [vmem:[#allocation10 + $0x440] sm:$0xff] }
0x1061   :  { %v2379_v63 = vsel %vm646_vm6, %v2378_v31, %v2372_v62  ;;  %v2468_v31 = vld [vmem:[#allocation10 + $0x448] sm:$0xff]  ;;  %v2469_v62 = vld [vmem:[#allocation10 + $0x450] sm:$0xff]  ;;  %2547 = vmatpush.msrb.mxu0 %v2467_v61 }
0x1062   :  { %2567 = vmatpush.msrb.mxu1 %v2468_v31  ;;  %2587 = vmatpush.msrb.mxu2 %v2469_v62  ;;  %v2640_v61 = vld [vmem:[#allocation13 + $0x4a8] sm:$0xff]  ;;  %v2657_v31 = vld [vmem:[#allocation13 + $0x530] sm:$0xff] }
0x1063   :  { %v2673_v62 = vld [vmem:[#allocation13 + $0x5b0] sm:$0xff] }
0x1067   :  { %v2376_v0 = vpop.permute.xlu0 %2375 }
0x1068   :  { %v2380_v4 = vsel %vm648_vm7, %v2379_v63, %v2376_v0  ;;  %v2470_v63 = vld [vmem:[#allocation10 + $0x458] sm:$0xff]  ;;  %v2463_v0 = vld [vmem:[#allocation10 + $0x420] sm:$0xff] }
0x1069   :  { %2419 = vmatmul.f32.vlgmr.msra.gmra.mxu3 %v2380_v4  ;;  %v2464_v4 = vld [vmem:[#allocation10 + $0x428] sm:$0xff]  ;;  %2548 = vmatpush.msrb.mxu0 %v2463_v0 }
0x106a   :  { %2568 = vmatpush.msrb.mxu1 %v2464_v4  ;;  %v2623_v0 = vld [vmem:[#allocation13 + $0x420] sm:$0xff] }
0x106b   :  { %v2639_v4 = vld [vmem:[#allocation13 + $0x4a0] sm:$0xff] }
0x10ec   :  { %v2420_v6 = vpop.f32.mrf.mxu3 }
0x10ed   :  { %v2421_v54 = vadd.f32 %v2905_v5, %v2420_v6  ;;  %v2465_v5 = vld [vmem:[#allocation10 + $0x430] sm:$0xff]  ;;  %v2466_v6 = vld [vmem:[#allocation10 + $0x438] sm:$0xff] }
0x10ee   :  { %2588 = vmatpush.msrb.mxu2 %v2465_v5 }
0x10ef   :  { %v3679_v1 = vadd.f32 %v2421_v54, %v3610_v50  ;;  %v2518_v50 = vld [vmem:[#allocation10 + $0x5d8] sm:$0xff]  ;;  %v2459_v54 = vld [vmem:[#allocation10 + $0x400] sm:$0xff] }
0x10f0   :  { %2595 = vmatpush.msrb.mxu3 %v2518_v50  ;;  %2549 = vmatpush.msrb.mxu0 %v2459_v54  ;;  %v2633_v50 = vld [vmem:[#allocation13 + $0x470] sm:$0xff]  ;;  %v2638_v54 = vld [vmem:[#allocation13 + $0x498] sm:$0xff] }
0x10f1   :  { %2428 = vadd.xlane.f32.xlu1 %v3679_v1  ;;  %v2431_v56 = vmul.f32 %v3679_v1, %v3679_v1  ;;  %2589 = vmatpush.msrb.mxu2 %v2461_v8  ;;  %v2906_v8 = vld [vmem:[#allocation14 + $0x2] ss:$0 sm:$0xff] }
0x10f2   :  { %2596 = vmatpush.msrb.mxu3 %v2514_v15  ;;  %2688 = vmatpush.msra.mxu0 %v2634_v7  ;;  %v2632_v15 = vld [vmem:[#allocation13 + $0x468] sm:$0xff] }
0x10f3   :  { %2432 = vadd.xlane.f32.xlu0 %v2431_v56  ;;  %v2460_v56 = vld [vmem:[#allocation10 + $0x408] sm:$0xff]  ;;  %2728 = vmatpush.msra.mxu2 %v2666_v17 }
0x10f4   :  { %2597 = vmatpush.msrb.mxu3 %v2510_v19  ;;  %2569 = vmatpush.msrb.mxu1 %v2460_v56  ;;  %v2631_v19 = vld [vmem:[#allocation13 + $0x460] sm:$0xff] }
0x10f5   :  { %2689 = vmatpush.msra.mxu0 %v2633_v50  ;;  %2729 = vmatpush.msra.mxu2 %v2665_v22  ;;  %v2656_v50 = vld [vmem:[#allocation13 + $0x528] sm:$0xff]  ;;  %v2619_v17 = vld [vmem:[#allocation13 + $0x400] sm:$0xff]  ;;  %v2669_v22 = vld [vmem:[#allocation13 + $0x590] sm:$0xff] }
0x10f6   :  { %2598 = vmatpush.msrb.mxu3 %v2506_v23  ;;  %2708 = vmatpush.msra.mxu1 %v2650_v11  ;;  %v2681_v23 = vld [vmem:[#allocation13 + $0x5f0] sm:$0xff] }
0x10f7   :  { %2690 = vmatpush.msra.mxu0 %v2632_v15  ;;  %2730 = vmatpush.msra.mxu2 %v2664_v25  ;;  %v2655_v15 = vld [vmem:[#allocation13 + $0x520] sm:$0xff] }
0x10f8   :  { %2599 = vmatpush.msrb.mxu3 %v2502_v27  ;;  %2709 = vmatpush.msra.mxu1 %v2649_v14  ;;  %v2630_v27 = vld [vmem:[#allocation13 + $0x458] sm:$0xff]  ;;  %v2636_v14 = vld [vmem:[#allocation13 + $0x488] sm:$0xff]  ;;  %v2651_v25 = vld [vmem:[#allocation13 + $0x500] sm:$0xff] }
0x10f9   :  { %2691 = vmatpush.msra.mxu0 %v2631_v19  ;;  %2731 = vmatpush.msra.mxu2 %v2663_v29  ;;  %v2654_v19 = vld [vmem:[#allocation13 + $0x518] sm:$0xff] }
0x10fa   :  { %2600 = vmatpush.msrb.mxu3 %v2498_v32  ;;  %2710 = vmatpush.msra.mxu1 %v2648_v16  ;;  %v2629_v32 = vld [vmem:[#allocation13 + $0x450] sm:$0xff]  ;;  %v2671_v16 = vld [vmem:[#allocation13 + $0x5a0] sm:$0xff] }
0x10fb   :  { %2692 = vmatpush.msra.mxu0 %v2630_v27  ;;  %2732 = vmatpush.msra.mxu2 %v2662_v34  ;;  %v2524_v27 = vld [vmem:[#allocation11 + $0x8] sm:$0xf] }
0x10fc   :  { %2601 = vmatpush.msrb.mxu3 %v2494_v36  ;;  %2711 = vmatpush.msra.mxu1 %v2647_v21  ;;  %v2628_v36 = vld [vmem:[#allocation13 + $0x448] sm:$0xff]  ;;  %v2653_v21 = vld [vmem:[#allocation13 + $0x510] sm:$0xff]  ;;  %v2527_v29 = vperm.slane %v2524_v27, 1 }
0x10fd   :  { %2693 = vmatpush.msra.mxu0 %v2629_v32  ;;  %2733 = vmatpush.msra.mxu2 %v2661_v38  ;;  %v2529_v38 = vperm.slane %v2524_v27, 3 }
0x10fe   :  { %2602 = vmatpush.msrb.mxu3 %v2490_v39  ;;  %2712 = vmatpush.msra.mxu1 %v2646_v28  ;;  %v2627_v39 = vld [vmem:[#allocation13 + $0x440] sm:$0xff]  ;;  %v2526_v28 = vperm.slane %v2524_v27, 0 }
0x10ff   :  { %2694 = vmatpush.msra.mxu0 %v2628_v36  ;;  %2734 = vmatpush.msra.mxu2 %v2660_v42 }
0x1100   :  { %2603 = vmatpush.msrb.mxu3 %v2486_v43  ;;  %2713 = vmatpush.msra.mxu1 %v2645_v33  ;;  %v2676_v43 = vld [vmem:[#allocation13 + $0x5c8] sm:$0xff] }
0x1101   :  { %2695 = vmatpush.msra.mxu0 %v2627_v39 }
0x1102   :  { %2604 = vmatpush.msrb.mxu3 %v2482_v47  ;;  %2714 = vmatpush.msra.mxu1 %v2644_v37  ;;  %v2659_v47 = vld [vmem:[#allocation13 + $0x540] sm:$0xff]  ;;  %v2528_v37 = vperm.slane %v2524_v27, 2 }
0x1103   :  { %2696 = vmatpush.msra.mxu0 %v2626_v45  ;;  %2735 = vmatpush.msra.mxu2 %v2659_v47 }
0x1104   :  { %2605 = vmatpush.msrb.mxu3 %v2478_v52  ;;  %2715 = vmatpush.msra.mxu1 %v2643_v40  ;;  %v2641_v52 = vld [vmem:[#allocation13 + $0x4b0] sm:$0xff] }
0x1105   :  { %2697 = vmatpush.msra.mxu0 %v2625_v51  ;;  %2736 = vmatpush.msra.mxu2 %v2658_v53 }
0x1106   :  { %2606 = vmatpush.msrb.mxu3 %v2474_v58  ;;  %2716 = vmatpush.msra.mxu1 %v2642_v46  ;;  %v2624_v58 = vld [vmem:[#allocation13 + $0x428] sm:$0xff] }
0x1107   :  { %2698 = vmatpush.msra.mxu0 %v2624_v58  ;;  %2737 = vmatpush.msra.mxu2 %v2657_v31 }
0x1108   :  { %2607 = vmatpush.msrb.mxu3 %v2470_v63  ;;  %2717 = vmatpush.msra.mxu1 %v2641_v52 }
0x1109   :  { %2699 = vmatpush.msra.mxu0 %v2623_v0  ;;  %2738 = vmatpush.msra.mxu2 %v2656_v50 }
0x110a   :  { %2608 = vmatpush.msrb.mxu3 %v2466_v6  ;;  %2718 = vmatpush.msra.mxu1 %v2640_v61  ;;  %v2622_v6 = vld [vmem:[#allocation13 + $0x418] sm:$0xff] }
0x110b   :  { %2700 = vmatpush.msra.mxu0 %v2622_v6  ;;  %2739 = vmatpush.msra.mxu2 %v2655_v15 }
0x110c   :  { %2609 = vmatpush.msrb.mxu3 %v2462_v9  ;;  %2719 = vmatpush.msra.mxu1 %v2639_v4 }
0x110d   :  { %2740 = vmatpush.msra.mxu2 %v2654_v19 }
0x110e   :  { %2748 = vmatpush.msra.mxu3 %v2682_v20  ;;  %2720 = vmatpush.msra.mxu1 %v2638_v54  ;;  %v2670_v20 = vld [vmem:[#allocation13 + $0x598] sm:$0xff] }
0x110f   :  { %2741 = vmatpush.msra.mxu2 %v2653_v21 }
0x1110   :  { %2749 = vmatpush.msra.mxu3 %v2681_v23  ;;  %v2652_v23 = vld [vmem:[#allocation13 + $0x508] sm:$0xff] }
0x1111   :  { %2742 = vmatpush.msra.mxu2 %v2652_v23 }
0x1112   :  { %2750 = vmatpush.msra.mxu3 %v2680_v26  ;;  %v2667_v26 = vld [vmem:[#allocation13 + $0x580] sm:$0xff] }
0x1113   :  { %2743 = vmatpush.msra.mxu2 %v2651_v25 }
0x1114   :  { %2751 = vmatpush.msra.mxu3 %v2679_v30 }
0x1116   :  { %2752 = vmatpush.msra.mxu3 %v2678_v35 }
0x1118   :  { %2753 = vmatpush.msra.mxu3 %v2677_v2 }
0x111a   :  { %2754 = vmatpush.msra.mxu3 %v2676_v43 }
0x111c   :  { %2755 = vmatpush.msra.mxu3 %v2675_v48 }
0x111e   :  { %2756 = vmatpush.msra.mxu3 %v2674_v55 }
0x1120   :  { %2757 = vmatpush.msra.mxu3 %v2673_v62 }
0x1164   :  { %v2429_v60 = vpop.xlane.xlu1 %2428 }
0x1165   :  { %v3685_v10 = vmul.f32 %v2429_v60, %v3473_v59 }
0x1166   :  { %v2433_v3 = vpop.xlane.xlu0 %2432 }
0x1167   :  { %v2435_v12 = vmul.f32 %v3685_v10, %v3685_v10  ;;  %v2434_v13 = vmul.f32 %v2433_v3, %v3473_v59  ;;  %v2437_v56 = vsub.f32 %v3679_v1, %v3685_v10  ;;  %v2907_v3 = vld [vmem:[%s3726_s10 + $0x2] ss:$0 sm:$0xff]  ;;  %v2621_v1 = vld [vmem:[#allocation13 + $0x410] sm:$0xff] }
0x1168   :  { %v2637_v10 = vld [vmem:[#allocation13 + $0x490] sm:$0xff]  ;;  %2701 = vmatpush.msra.mxu0 %v2621_v1  ;;  %v2910_v1 = vld [vmem:[#allocation17 + $0x2] ss:$0 sm:$0xff] }
0x1169   :  { %v2436_v18 = vsub.f32 %v2434_v13, %v2435_v12  ;;  %2721 = vmatpush.msra.mxu1 %v2637_v10  ;;  %v2672_v12 = vld [vmem:[#allocation13 + $0x5a8] sm:$0xff] }
0x116a   :  { %2758 = vmatpush.msra.mxu3 %v2672_v12  ;;  %v2620_v13 = vld [vmem:[#allocation13 + $0x408] sm:$0xff] }
0x116b   :  { %v3690_v24 = vadd.f32 1e-05, %v2436_v18  ;;  %2702 = vmatpush.msra.mxu0 %v2620_v13  ;;  %2722 = vmatpush.msra.mxu1 %v2636_v14  ;;  %v2635_v18 = vld [vmem:[#allocation13 + $0x480] sm:$0xff] }
0x116c   :  { %2759 = vmatpush.msra.mxu3 %v2671_v16 }
0x116d   :  { %2969 = vrsqrt.f32 %v3690_v24  ;;  %vm2445_vm2 = vweird.f32 %v3690_v24  ;;  %2703 = vmatpush.msra.mxu0 %v2619_v17  ;;  %2723 = vmatpush.msra.mxu1 %v2635_v18 }
0x116e   :  { %2760 = vmatpush.msra.mxu3 %v2670_v20 }
0x1170   :  { %2761 = vmatpush.msra.mxu3 %v2669_v22 }
0x1173   :  { %v2970_v41 = vpop.eup %2969 }
0x1174   :  { %v2440_v44 = vmul.f32 %v2970_v41, %v3690_v24  ;;  %vm2446_vm0 = vweird.f32 %v2970_v41  ;;  %v2668_v24 = vld [vmem:[#allocation13 + $0x588] sm:$0xff] }
0x1175   :  { %vm2447_vm6 = vmor %vm2445_vm2, %vm2446_vm0  ;;  %2762 = vmatpush.msra.mxu3 %v2668_v24 }
0x1176   :  { %v2441_v49 = vmul.f32 %v2970_v41, %v2440_v44  ;;  %v2908_v44 = vld [vmem:[%s3724_s8 + $0x2] ss:$0 sm:$0xff]  ;;  %s3275_s8 = smov [#allocation19]  }
0x1177   :  { %2763 = vmatpush.msra.mxu3 %v2667_v26  ;;  %s2809_s22 = sshll.u32 %s3275_s8, 4  ;;  %s2810_s22 = int_to_ptr.vmem [resolvable:$true] %s2809_s22 }
0x1178   :  { %v2442_v57 = vmul.f32 0.5, %v2441_v49 }
0x117a   :  { %v2443_v63 = vsub.f32 1.5, %v2442_v57 }
0x117c   :  { %v2444_v5 = vmul.f32 %v2970_v41, %v2443_v63 }
0x117e   :  { %v2448_v9 = vsel %vm2447_vm6, %v2970_v41, %v2444_v5 }
0x117f   :  { %v2449_v60 = vmul.f32 %v2448_v9, %v2437_v56 }
0x1181   :  { %v2453_v7 = vmul.f32 %v2906_v8, %v2449_v60 }
0x1183   :  { %v3701_v11 = vadd.f32 %v2907_v3, %v2453_v7  ;;  %v2909_v3 = vld [vmem:[#allocation16 + $0x2] ss:$0 sm:$0xff] }
0x1185   :  { %2550 = vmatmul.f32.vlgmr.msrb.gmra.mxu0 %v3701_v11  ;;  %2570 = vmatmul.f32.vlgmr.msrb.gmra.mxu1 %v3701_v11 }
0x1186   :  { %2590 = vmatmul.f32.vlgmr.msrb.gmra.mxu2 %v3701_v11  ;;  %2610 = vmatmul.f32.vlgmr.msrb.gmra.mxu3 %v3701_v11 }
0x1202   :  { %v2551_v30 = vpop.f32.mrf.mxu0  ;;  %v2571_v32 = vpop.f32.mrf.mxu1 }
0x1203   :  { %v2552_v33 = vadd.f32 %v2551_v30, %v2526_v28  ;;  %v2572_v34 = vadd.f32 %v2571_v32, %v2527_v29 }
0x1205   :  { %v2614_v35 = vmax.f32 %v2552_v33, 0.0  ;;  %v2615_v36 = vmax.f32 %v2572_v34, 0.0 }
0x1207   :  { %2704 = vmatmul.f32.vlgmr.msra.gmra.mxu0 %v2614_v35  ;;  %2724 = vmatmul.f32.vlgmr.msra.gmra.mxu1 %v2615_v36 }
0x1209   :  { %v2591_v2 = vpop.f32.mrf.mxu2  ;;  %v2611_v39 = vpop.f32.mrf.mxu3 }
0x120a   :  { %v2592_v40 = vadd.f32 %v2591_v2, %v2528_v37  ;;  %v2612_v41 = vadd.f32 %v2611_v39, %v2529_v38 }
0x120c   :  { %v2616_v42 = vmax.f32 %v2592_v40, 0.0  ;;  %v2617_v43 = vmax.f32 %v2612_v41, 0.0 }
0x120e   :  { %2744 = vmatmul.f32.vlgmr.msra.gmra.mxu2 %v2616_v42  ;;  %2764 = vmatmul.f32.vlgmr.msra.gmra.mxu3 %v2617_v43 }
0x1284   :  { %v2705_v45 = vpop.f32.mrf.mxu0  ;;  %v2725_v47 = vpop.f32.mrf.mxu1 }
0x1285   :  { %v2706_v46 = vadd.f32 %v2908_v44, %v2705_v45 }
0x1287   :  { %v2726_v48 = vadd.f32 %v2725_v47, %v2706_v46 }
0x1291   :  { %v2745_v49 = vpop.f32.mrf.mxu2  ;;  %v2765_v52 = vpop.f32.mrf.mxu3 }
0x1292   :  { %v2746_v51 = vadd.f32 %v2745_v49, %v2726_v48 }
0x1294   :  { %v2766_v53 = vadd.f32 %v2765_v52, %v2746_v51 }
0x1296   :  { %v2768_v55 = vadd.f32 %v2766_v53, %v3701_v11 }
0x1298   :  { %2773 = vadd.xlane.f32.xlu2 %v2768_v55  ;;  %v2776_v57 = vmul.f32 %v2768_v55, %v2768_v55 }
0x12a0   :  { %2777 = vadd.xlane.f32.xlu2 %v2776_v57 }
0x130b   :  { %v2774_v58 = vpop.xlane.xlu2 %2773 }
0x130c   :  { %v2775_v61 = vmul.f32 %v2774_v58, %v3473_v59 }
0x130e   :  { %v2780_v62 = vmul.f32 %v2775_v61, %v2775_v61  ;;  %v2782_v60 = vsub.f32 %v2768_v55, %v2775_v61 }
0x1313   :  { %v2778_v31 = vpop.xlane.xlu2 %2777 }
0x1314   :  { %v2779_v63 = vmul.f32 %v2778_v31, %v3473_v59 }
0x1316   :  { %v2781_v0 = vsub.f32 %v2779_v63, %v2780_v62 }
0x1318   :  { %v2783_v4 = vadd.f32 1e-05, %v2781_v0 }
0x131a   :  { %2971 = vrsqrt.f32 %v2783_v4  ;;  %vm2790_vm5 = vweird.f32 %v2783_v4 }
0x1320   :  { %v2972_v5 = vpop.eup %2971 }
0x1321   :  { %v2785_v6 = vmul.f32 %v2972_v5, %v2783_v4  ;;  %vm2791_vm7 = vweird.f32 %v2972_v5 }
0x1322   :  { %vm2792_vm8 = vmor %vm2790_vm5, %vm2791_vm7 }
0x1323   :  { %v2786_v54 = vmul.f32 %v2972_v5, %v2785_v6 }
0x1325   :  { %v2787_v56 = vmul.f32 0.5, %v2786_v54 }
0x1327   :  { %v2788_v8 = vsub.f32 1.5, %v2787_v56 }
0x1329   :  { %v2789_v9 = vmul.f32 %v2972_v5, %v2788_v8 }
0x132b   :  { %v2793_v7 = vsel %vm2792_vm8, %v2972_v5, %v2789_v9 }
0x132c   :  { %v2794_v11 = vmul.f32 %v2793_v7, %v2782_v60 }
0x132e   :  { %v2798_v59 = vmul.f32 %v2909_v3, %v2794_v11 }
0x1330   :  { %v2802_v10 = vadd.f32 %v2910_v1, %v2798_v59 }
0x1332   :  { %2803 = vst [vmem:[#allocation19] sm:$0xff] %v2802_v10 }
0x1333   :  { %2814 = dma.vmem_to_hbm [thread:$0]  %s2810_s22, 128, %s2812_s5, [#allocation4]  }
0x1334   :  { %3249 = dma.done.wait [#allocation4], 128  }
0x1335   :  { %3250 = vsyncadd [#allocation4], 4294967168 }
0x1336   :  { %2819 = vsyncpa [#allocation3], 1 }
0x1337   :  { %2820 = vsyncpa [#allocation6], 1 }
0x1338   :  { %2821 = vsyncpa [#allocation9], 1 }
0x1339   :  { %2822 = vsyncpa [#allocation12], 1 }
0x133a   :  { %2823 = vsyncpa [#allocation15], 1 }
0x133b   :  { %2824 = vsyncpa [#allocation18], 1 }
0x133c   :  { %2825 = vsyncpa [#allocation4], 1 }

</bundles_post_ra>
